<compile_context>
chip_gen: v5e
topology: v5e:2x2
jax: 0.10.0
libtpu: 0.0.40
codegen_flags: <defaults>
</compile_context>

<pallas_src>
import functools

import jax
import jax.numpy as jnp
from jax.experimental import pallas as pl
from jax.experimental.pallas import tpu as pltpu

LANE = 128
NEG_INF = -1e30


def _round_up(v, m):
    return ((v + m - 1) // m) * m


def _pick_tile(n, target, mult):
    """Largest multiple of `mult` <= target that divides n; falls back to the
    full dimension (full-dim blocks are always legal)."""
    if n <= target:
        return n
    t = (target // mult) * mult
    while t >= mult:
        if n % t == 0:
            return t
        t -= mult
    return n


# ---------------------------------------------------------------------------
# Kernel 1: feature projection + attention logits (tiled over node rows)
# ---------------------------------------------------------------------------
def gat_project_kernel(x_ref, w_ref, att_ref, xp_ref, alpha_ref):
    """xp = x @ W (bf16, per-head lane-padded);  alpha = xp @ att_blockdiag.

    x_ref:     [TM, Fin]       f32   node-feature row tile
    w_ref:     [Fin, H*Cpad]   bf16  lin.weight.T, zero-padded per head
    att_ref:   [H*Cpad, 2H]    bf16  block-diag [att_targ | att_source]
    xp_ref:    [TM, H*Cpad]    bf16  projected features (output)
    alpha_ref: [TM, 2H]        f32   [alpha_targ | alpha_source] (output)
    """
    x = x_ref[...].astype(jnp.bfloat16)
    xp = jnp.dot(x, w_ref[...], preferred_element_type=jnp.float32)
    xp_bf16 = xp.astype(jnp.bfloat16)
    xp_ref[...] = xp_bf16
    # All heads' (alpha_t, alpha_s) with one MXU matmul (no per-head VPU
    # multiplies + XLU lane reductions).
    alpha_ref[...] = jnp.dot(xp_bf16, att_ref[...],
                             preferred_element_type=jnp.float32)


# ---------------------------------------------------------------------------
# Kernel 2: flash-style masked softmax + aggregation
#           grid = (target-row tiles [parallel], source tiles [arbitrary])
# ---------------------------------------------------------------------------
def gat_aggregate_kernel(alpha_t_ref, alpha_s_ref, adj_ref, xp_ref, bias_ref,
                         out_ref, m_ref, l_ref, acc_ref, *, heads, cpad,
                         apply_relu):
    """Online (flash-style) per-target softmax over incoming edges + weighted
    source aggregation for one (row tile, source tile) grid point.

    alpha_t_ref: [TM, H]         f32   target logits for this row tile
    alpha_s_ref: [H, TK]         f32   source logits for this source tile
    adj_ref:     [TM, TK]        int8  adj[t, s] = 1 iff edge s -> t
    xp_ref:      [TK, H*Cpad]    bf16  projected source features (this tile)
    bias_ref:    [1, Cpad]       f32
    out_ref:     [TM, Cpad]      f32   (written on the last source tile)
    m_ref/l_ref: [TM, H]         f32   running max / denom (VMEM scratch)
    acc_ref:     [H, TM, Cpad]   f32   running unnormalized output (scratch)
    """
    j = pl.program_id(1)

    @pl.when(j == 0)
    def _init():
        m_ref[...] = jnp.full_like(m_ref, NEG_INF)
        l_ref[...] = jnp.zeros_like(l_ref)
        acc_ref[...] = jnp.zeros_like(acc_ref)

    alpha_t = alpha_t_ref[...]                          # [TM, H]
    alpha_s = alpha_s_ref[...]                          # [H, TK]
    # 0/1 edge mask, converted once per tile (reused by every head).
    edge = adj_ref[...].astype(jnp.float32)             # [TM, TK]

    for h in range(heads):                              # heads small & static
        # e[t, s] = alpha_t[t] + alpha_s[s]  (broadcast add, no transpose)
        e = alpha_t[:, h:h + 1] + alpha_s[h:h + 1, :]   # [TM, TK]
        e = jnp.maximum(e, 0.2 * e)                     # leaky_relu(0.2)

        m_prev = m_ref[:, h:h + 1]                      # [TM, 1]
        m_new = jnp.maximum(m_prev, jnp.max(e, axis=-1, keepdims=True))
        # Unnormalized probabilities; masking AFTER exp (multiply by 0/1 mask)
        # keeps all-masked source tiles exactly zero-contributing.
        p = jnp.exp(e - m_new) * edge                   # [TM, TK]
        corr = jnp.exp(m_prev - m_new)                  # [TM, 1]

        l_ref[:, h:h + 1] = corr * l_ref[:, h:h + 1] + jnp.sum(
            p, axis=-1, keepdims=True)
        xh = xp_ref[:, h * cpad:(h + 1) * cpad]         # [TK, Cpad] bf16
        acc_ref[h] = corr * acc_ref[h] + jnp.dot(
            p.astype(jnp.bfloat16), xh, preferred_element_type=jnp.float32)
        m_ref[:, h:h + 1] = m_new

    @pl.when(j == pl.num_programs(1) - 1)
    def _finalize():
        tm = out_ref.shape[0]
        total = jnp.zeros((tm, cpad), jnp.float32)
        for h in range(heads):
            # Normalization deferred to here (post-matmul): TM*Cpad*H mults
            # instead of N^2*H.  Self loops guarantee denom > 0.
            inv_l = pl.reciprocal(l_ref[:, h:h + 1], approx=True)
            total = total + acc_ref[h] * inv_l
        out = total * (1.0 / heads) + bias_ref[...]     # mean over heads
        if apply_relu:                                  # fused F.relu
            out = jnp.maximum(out, 0.0)
        out_ref[...] = out.astype(out_ref.dtype)


# ---------------------------------------------------------------------------
# One-time parameter packing (hoisted out of the per-call forward)
# ---------------------------------------------------------------------------
def pack_layer_params(w, att_t, att_s, bias, *, heads, out_channels, fin):
    """Lane-dense per-head packing of the projection weight and attention
    vectors (zero padding keeps the math exact)."""
    w_in = w.shape[0]
    assert w_in <= fin
    cpad = _round_up(out_channels, LANE)
    hc = heads * cpad
    w_p = jnp.zeros((fin, hc), jnp.bfloat16)
    att_mat = jnp.zeros((hc, 2 * heads), jnp.bfloat16)
    for hh in range(heads):
        col = hh * cpad
        w_p = w_p.at[:w_in, col:col + out_channels].set(
            w[:, hh * out_channels:(hh + 1) * out_channels].astype(
                jnp.bfloat16))
        att_mat = att_mat.at[col:col + out_channels, hh].set(
            att_t[hh].astype(jnp.bfloat16))
        att_mat = att_mat.at[col:col + out_channels, heads + hh].set(
            att_s[hh].astype(jnp.bfloat16))
    bias_p = jnp.zeros((1, cpad), jnp.float32).at[0, :out_channels].set(bias)
    return dict(w=w_p, att=att_mat, bias=bias_p)


def pack_gat_params(params, *, num_features, hidden_dim, num_classes, heads):
    cpad1 = _round_up(hidden_dim, LANE)
    return dict(
        l1=pack_layer_params(params["w1"], params["att_t1"], params["att_s1"],
                             params["b1"], heads=heads,
                             out_channels=hidden_dim, fin=num_features),
        l2=pack_layer_params(params["w2"], params["att_t2"], params["att_s2"],
                             params["b2"], heads=heads,
                             out_channels=num_classes, fin=cpad1),
    )


# ---------------------------------------------------------------------------
# Layer / model wrappers
# ---------------------------------------------------------------------------
def gat_layer(x, layer_p, adj_i8, *, heads, out_channels, apply_relu,
              block_m=256, block_k=512):
    """One GATLayer forward.

    x:        [N, Fin] f32 (Fin may already be a lane-padded hidden width)
    layer_p:  packed dict {w: [Fin, H*Cpad] bf16, att: [H*Cpad, 2H] bf16,
                           bias: [1, Cpad] f32}
    adj_i8:   [N, N] int8, adj[t, s] = 1 iff edge s -> t (self loops incl.)
    returns   [N, Cpad] f32, Cpad = round_up(out_channels, 128); columns
              >= out_channels are exactly zero.
    """
    n, fin = x.shape
    w_p, att_mat, bias_p = layer_p["w"], layer_p["att"], layer_p["bias"]
    assert w_p.shape[0] == fin
    cpad = _round_up(out_channels, LANE)
    hc = heads * cpad
    two_h = 2 * heads

    # --- stage 1: projection + attention logits -----------------------------
    if fin >= LANE:
        tmp = _pick_tile(n, block_m, 32)
        xp, alpha = pl.pallas_call(
            gat_project_kernel,
            out_shape=(jax.ShapeDtypeStruct((n, hc), jnp.bfloat16),
                       jax.ShapeDtypeStruct((n, two_h), jnp.float32)),
            grid=(n // tmp,),
            in_specs=[pl.BlockSpec((tmp, fin), lambda i: (i, 0)),
                      pl.BlockSpec((fin, hc), lambda i: (0, 0)),
                      pl.BlockSpec((hc, two_h), lambda i: (0, 0))],
            out_specs=(pl.BlockSpec((tmp, hc), lambda i: (i, 0)),
                       pl.BlockSpec((tmp, two_h), lambda i: (i, 0))),
            compiler_params=pltpu.CompilerParams(
                dimension_semantics=("parallel",)),
        )(x, w_p, att_mat)
    else:
        # Contraction < 128 badly underutilizes the MXU and stage 1 is tiny
        # relative to stage 2 -> let XLA do it (same math as the kernel).
        xp = jnp.dot(x.astype(jnp.bfloat16), w_p,
                     preferred_element_type=jnp.float32).astype(jnp.bfloat16)
        alpha = jnp.dot(xp, att_mat, preferred_element_type=jnp.float32)

    alpha_t = alpha[:, :heads]                  # [N, H]
    alpha_s = jnp.transpose(alpha[:, heads:])   # [H, N]  (tiny, outside kernel)

    # --- stage 2: flash-style masked softmax + aggregation ------------------
    tm = _pick_tile(n, block_m, 32)    # 32: int8 adjacency sublane tile
    tk = _pick_tile(n, block_k, 128)   # 128: lane tile for adj / alpha_s
    kernel = functools.partial(gat_aggregate_kernel, heads=heads, cpad=cpad,
                               apply_relu=apply_relu)
    out = pl.pallas_call(
        kernel,
        out_shape=jax.ShapeDtypeStruct((n, cpad), jnp.float32),
        grid=(n // tm, n // tk),
        in_specs=[pl.BlockSpec((tm, heads), lambda i, j: (i, 0)),
                  pl.BlockSpec((heads, tk), lambda i, j: (0, j)),
                  pl.BlockSpec((tm, tk), lambda i, j: (i, j)),
                  pl.BlockSpec((tk, hc), lambda i, j: (j, 0)),
                  pl.BlockSpec((1, cpad), lambda i, j: (0, 0))],
        out_specs=pl.BlockSpec((tm, cpad), lambda i, j: (i, 0)),
        scratch_shapes=[pltpu.VMEM((tm, heads), jnp.float32),    # running max
                        pltpu.VMEM((tm, heads), jnp.float32),    # running denom
                        pltpu.VMEM((heads, tm, cpad), jnp.float32)],  # acc
        compiler_params=pltpu.CompilerParams(
            dimension_semantics=("parallel", "arbitrary")),
    )(alpha_t, alpha_s, adj_i8, xp, bias_p)
    return out


def gat_forward(x, adj_i8, packed, *, heads, hidden_dim, num_classes,
                block_m=256, block_k=512):
    h = gat_layer(x, packed["l1"], adj_i8, heads=heads,
                  out_channels=hidden_dim, apply_relu=True,
                  block_m=block_m, block_k=block_k)
    # F.relu fused into the layer-1 epilogue above; hidden stays lane-padded.
    # TODO(synk): F.dropout is training-mode only; inference path is identity.
    out = gat_layer(h, packed["l2"], adj_i8, heads=heads,
                    out_channels=num_classes, apply_relu=False,
                    block_m=block_m, block_k=block_k)
    return out[:, :num_classes]


# ---------------------------------------------------------------------------
# Parameter init (matches the module's xavier_uniform / zero-bias scheme)
# ---------------------------------------------------------------------------
def xavier_uniform(key, shape, fan_in, fan_out):
    limit = (6.0 / (fan_in + fan_out)) ** 0.5
    return jax.random.uniform(key, shape, jnp.float32, -limit, limit)


def init_params(key, num_features, hidden_dim, num_classes, heads):
    ks = jax.random.split(key, 6)
    w1 = xavier_uniform(ks[0], (num_features, heads * hidden_dim),
                        num_features, heads * hidden_dim)
    att_t1 = xavier_uniform(ks[1], (heads, hidden_dim),
                            heads * hidden_dim, hidden_dim)
    att_s1 = xavier_uniform(ks[2], (heads, hidden_dim),
                            heads * hidden_dim, hidden_dim)
    b1 = jnp.zeros((hidden_dim,), jnp.float32)
    w2 = xavier_uniform(ks[3], (hidden_dim, heads * num_classes),
                        hidden_dim, heads * num_classes)
    att_t2 = xavier_uniform(ks[4], (heads, num_classes),
                            heads * num_classes, num_classes)
    att_s2 = xavier_uniform(ks[5], (heads, num_classes),
                            heads * num_classes, num_classes)
    b2 = jnp.zeros((num_classes,), jnp.float32)
    return dict(w1=w1, att_t1=att_t1, att_s1=att_s1, b1=b1,
                w2=w2, att_t2=att_t2, att_s2=att_s2, b2=b2)


if __name__ == "__main__":
    N, NUM_FEATURES, HIDDEN, NUM_CLASSES, HEADS = 64, 16, 32, 8, 2

    key = jax.random.PRNGKey(0)
    k_x, k_adj, k_p = jax.random.split(key, 3)

    # deterministic node features
    x = jax.random.normal(k_x, (N, NUM_FEATURES), jnp.float32)

    # deterministic random sparse graph (no pre-existing self loops),
    # then add_self_loops -> diagonal forced to 1.
    rand_adj = (jax.random.uniform(k_adj, (N, N)) < 0.2).astype(jnp.float32)
    rand_adj = rand_adj * (1.0 - jnp.eye(N, dtype=jnp.float32))
    adj = rand_adj + jnp.eye(N, dtype=jnp.float32)   # adj[t, s] = edge s -> t
    adj_i8 = (adj > 0).astype(jnp.int8)              # int8: smallest O(N^2) stream

    params = init_params(k_p, NUM_FEATURES, HIDDEN, NUM_CLASSES, HEADS)
    packed = pack_gat_params(params, num_features=NUM_FEATURES,
                             hidden_dim=HIDDEN, num_classes=NUM_CLASSES,
                             heads=HEADS)             # one-time packing

    fwd = jax.jit(functools.partial(gat_forward, heads=HEADS,
                                    hidden_dim=HIDDEN,
                                    num_classes=NUM_CLASSES))
    out = jax.block_until_ready(fwd(x, adj_i8, packed))

    assert out.shape == (N, NUM_CLASSES)
    assert bool(jnp.all(jnp.isfinite(out)))
    print("KERNEL_OK")
</pallas_src>

<mosaic_0001>
module attributes {stable_mosaic.version = 11 : i64} {
  func.func @gat_project_kernel(%arg0: i32, %arg1: memref<64x128xf32, #tpu.memory_space<vmem>>, %arg2: memref<128x256xbf16, #tpu.memory_space<vmem>>, %arg3: memref<256x4xbf16, #tpu.memory_space<vmem>>, %arg4: memref<64x256xbf16, #tpu.memory_space<vmem>>, %arg5: memref<64x4xf32, #tpu.memory_space<vmem>>) attributes {dimension_semantics = [#tpu.dimension_semantics<parallel>], iteration_bounds = array<i64: 1>, scalar_prefetch = 0 : i64, scratch_operands = 0 : i64, tpu.core_type = #tpu.core_type<tc>, window_params = [{transform_indices = @transform_0, window_bounds = array<i64: 64, 128>}, {pipeline_mode = #tpu.pipeline_mode<synchronous>, transform_indices = @transform_1, window_bounds = array<i64: 128, 256>}, {pipeline_mode = #tpu.pipeline_mode<synchronous>, transform_indices = @transform_2, window_bounds = array<i64: 256, 4>}, {transform_indices = @transform_3, window_bounds = array<i64: 64, 256>}, {transform_indices = @transform_4, window_bounds = array<i64: 64, 4>}]} {
    %c0 = arith.constant 0 : index
    %c0_0 = arith.constant 0 : index
    %0 = vector.load %arg1[%c0, %c0_0] : memref<64x128xf32, #tpu.memory_space<vmem>>, vector<64x128xf32>
    %1 = arith.truncf %0 : vector<64x128xf32> to vector<64x128xbf16>
    %c0_1 = arith.constant 0 : index
    %c0_2 = arith.constant 0 : index
    %2 = vector.load %arg2[%c0_1, %c0_2] : memref<128x256xbf16, #tpu.memory_space<vmem>>, vector<128x256xbf16>
    %cst = arith.constant dense<0.000000e+00> : vector<64x256xf32>
    %3 = tpu.matmul %1, %2, %cst {dimension_numbers = #tpu.dot_dimension_numbers<[1], [0], [0], [1], [0, 0, 1, 1], [], []>} : vector<64x128xbf16>, vector<128x256xbf16>, vector<64x256xf32> -> vector<64x256xf32>
    %4 = arith.truncf %3 : vector<64x256xf32> to vector<64x256xbf16>
    %c0_3 = arith.constant 0 : index
    %c0_4 = arith.constant 0 : index
    %5 = vector.load %arg4[%c0_3, %c0_4] : memref<64x256xbf16, #tpu.memory_space<vmem>>, vector<64x256xbf16>
    tpu.vector_store %arg4[%c0_3, %c0_4], %4 {strides = array<i32>} : memref<64x256xbf16, #tpu.memory_space<vmem>>, vector<64x256xbf16>,
    %c0_5 = arith.constant 0 : index
    %c0_6 = arith.constant 0 : index
    %6 = vector.load %arg3[%c0_5, %c0_6] : memref<256x4xbf16, #tpu.memory_space<vmem>>, vector<256x4xbf16>
    %cst_7 = arith.constant dense<0.000000e+00> : vector<64x4xf32>
    %7 = tpu.matmul %4, %6, %cst_7 {dimension_numbers = #tpu.dot_dimension_numbers<[1], [0], [0], [1], [0, 0, 1, 1], [], []>} : vector<64x256xbf16>, vector<256x4xbf16>, vector<64x4xf32> -> vector<64x4xf32>
    %c0_8 = arith.constant 0 : index
    %c0_9 = arith.constant 0 : index
    %8 = vector.load %arg5[%c0_8, %c0_9] : memref<64x4xf32, #tpu.memory_space<vmem>>, vector<64x4xf32>
    tpu.vector_store %arg5[%c0_8, %c0_9], %7 {strides = array<i32>} : memref<64x4xf32, #tpu.memory_space<vmem>>, vector<64x4xf32>,
    return
  }
  func.func @transform_0(%arg0: i32) -> (i32, i32) {
    %c0_i32 = arith.constant 0 : i32
    %c0_i32_0 = arith.constant 0 : i32
    return %arg0, %c0_i32 : i32, i32
  }
  func.func @transform_1(%arg0: i32) -> (i32, i32) {
    %c0_i32 = arith.constant 0 : i32
    %c0_i32_0 = arith.constant 0 : i32
    %c0_i32_1 = arith.constant 0 : i32
    return %c0_i32, %c0_i32_0 : i32, i32
  }
  func.func @transform_2(%arg0: i32) -> (i32, i32) {
    %c0_i32 = arith.constant 0 : i32
    %c0_i32_0 = arith.constant 0 : i32
    %c0_i32_1 = arith.constant 0 : i32
    return %c0_i32, %c0_i32_0 : i32, i32
  }
  func.func @transform_3(%arg0: i32) -> (i32, i32) {
    %c0_i32 = arith.constant 0 : i32
    %c0_i32_0 = arith.constant 0 : i32
    return %arg0, %c0_i32 : i32, i32
  }
  func.func @transform_4(%arg0: i32) -> (i32, i32) {
    %c0_i32 = arith.constant 0 : i32
    %c0_i32_0 = arith.constant 0 : i32
    return %arg0, %c0_i32 : i32, i32
  }
}

module attributes {stable_mosaic.version = 11 : i64} {
  func.func @gat_aggregate_kernel(%arg0: i32, %arg1: i32, %arg2: memref<64x2xf32, #tpu.memory_space<vmem>>, %arg3: memref<2x64xf32, #tpu.memory_space<vmem>>, %arg4: memref<64x64xi8, #tpu.memory_space<vmem>>, %arg5: memref<64x256xbf16, #tpu.memory_space<vmem>>, %arg6: memref<1x128xf32, #tpu.memory_space<vmem>>, %arg7: memref<64x128xf32, #tpu.memory_space<vmem>>, %arg8: memref<64x2xf32, #tpu.memory_space<vmem>>, %arg9: memref<64x2xf32, #tpu.memory_space<vmem>>, %arg10: memref<2x64x128xf32, #tpu.memory_space<vmem>>) attributes {dimension_semantics = [#tpu.dimension_semantics<parallel>, #tpu.dimension_semantics<arbitrary>], iteration_bounds = array<i64: 1, 1>, scalar_prefetch = 0 : i64, scratch_operands = 3 : i64, tpu.core_type = #tpu.core_type<tc>, window_params = [{transform_indices = @transform_0, window_bounds = array<i64: 64, 2>}, {transform_indices = @transform_1, window_bounds = array<i64: 2, 64>}, {transform_indices = @transform_2, window_bounds = array<i64: 64, 64>}, {transform_indices = @transform_3, window_bounds = array<i64: 64, 256>}, {pipeline_mode = #tpu.pipeline_mode<synchronous>, transform_indices = @transform_4, window_bounds = array<i64: 1, 128>}, {transform_indices = @transform_5, window_bounds = array<i64: 64, 128>}]} {
    %c0_i32 = arith.constant 0 : i32
    %0 = arith.cmpi eq, %arg1, %c0_i32 : i32
    %1 = arith.extui %0 : i1 to i32
    %c0_i32_0 = arith.constant 0 : i32
    %2 = arith.cmpi ne, %1, %c0_i32_0 : i32
    scf.if %2 {
      %cst_45 = arith.constant -1.000000e+30 : f32
      %82 = vector.broadcast %cst_45 : f32 to vector<64x2xf32>
      %c0_46 = arith.constant 0 : index
      %c0_47 = arith.constant 0 : index
      %83 = vector.load %arg8[%c0_46, %c0_47] : memref<64x2xf32, #tpu.memory_space<vmem>>, vector<64x2xf32>
      tpu.vector_store %arg8[%c0_46, %c0_47], %82 {strides = array<i32>} : memref<64x2xf32, #tpu.memory_space<vmem>>, vector<64x2xf32>,
      %cst_48 = arith.constant 0.000000e+00 : f32
      %84 = vector.broadcast %cst_48 : f32 to vector<64x2xf32>
      %c0_49 = arith.constant 0 : index
      %c0_50 = arith.constant 0 : index
      %85 = vector.load %arg9[%c0_49, %c0_50] : memref<64x2xf32, #tpu.memory_space<vmem>>, vector<64x2xf32>
      tpu.vector_store %arg9[%c0_49, %c0_50], %84 {strides = array<i32>} : memref<64x2xf32, #tpu.memory_space<vmem>>, vector<64x2xf32>,
      %cst_51 = arith.constant 0.000000e+00 : f32
      %86 = vector.broadcast %cst_51 : f32 to vector<2x64x128xf32>
      %c0_52 = arith.constant 0 : index
      %c0_53 = arith.constant 0 : index
      %c0_54 = arith.constant 0 : index
      %87 = vector.load %arg10[%c0_52, %c0_53, %c0_54] : memref<2x64x128xf32, #tpu.memory_space<vmem>>, vector<2x64x128xf32>
      tpu.vector_store %arg10[%c0_52, %c0_53, %c0_54], %86 {strides = array<i32>} : memref<2x64x128xf32, #tpu.memory_space<vmem>>, vector<2x64x128xf32>,
    } else {
    }
    %c0 = arith.constant 0 : index
    %c0_1 = arith.constant 0 : index
    %3 = vector.load %arg2[%c0, %c0_1] : memref<64x2xf32, #tpu.memory_space<vmem>>, vector<64x2xf32>
    %c0_2 = arith.constant 0 : index
    %c0_3 = arith.constant 0 : index
    %4 = vector.load %arg3[%c0_2, %c0_3] : memref<2x64xf32, #tpu.memory_space<vmem>>, vector<2x64xf32>
    %c0_4 = arith.constant 0 : index
    %c0_5 = arith.constant 0 : index
    %5 = vector.load %arg4[%c0_4, %c0_5] : memref<64x64xi8, #tpu.memory_space<vmem>>, vector<64x64xi8>
    %6 = arith.sitofp %5 : vector<64x64xi8> to vector<64x64xf32>
    %7 = vector.extract_strided_slice %3 {offsets = [0, 0], sizes = [64, 1], strides = [1, 1]} : vector<64x2xf32> to vector<64x1xf32>
    %8 = vector.extract_strided_slice %4 {offsets = [0, 0], sizes = [1, 64], strides = [1, 1]} : vector<2x64xf32> to vector<1x64xf32>
    %9 = vector.broadcast %7 : vector<64x1xf32> to vector<64x64xf32>
    %10 = vector.broadcast %8 : vector<1x64xf32> to vector<64x64xf32>
    %11 = arith.addf %9, %10 : vector<64x64xf32>
    %cst = arith.constant 2.000000e-01 : f32
    %12 = vector.broadcast %cst : f32 to vector<64x64xf32>
    %13 = arith.mulf %12, %11 : vector<64x64xf32>
    %14 = arith.maximumf %11, %13 : vector<64x64xf32>
    %c0_6 = arith.constant 0 : index
    %c0_7 = arith.constant 0 : index
    %15 = vector.load %arg8[%c0_6, %c0_7] : memref<64x2xf32, #tpu.memory_space<vmem>>, vector<64x1xf32>
    %cst_8 = arith.constant dense<0xFF800000> : vector<64xf32>
    %16 = vector.multi_reduction <maximumf>, %14, %cst_8 [1] : vector<64x64xf32> to vector<64xf32>
    %17 = vector.shape_cast %16 : vector<64xf32> to vector<64x1xf32>
    %18 = arith.maximumf %15, %17 : vector<64x1xf32>
    %19 = vector.broadcast %18 : vector<64x1xf32> to vector<64x64xf32>
    %20 = arith.subf %14, %19 : vector<64x64xf32>
    %21 = math.exp %20 : vector<64x64xf32>
    %22 = arith.mulf %21, %6 : vector<64x64xf32>
    %23 = arith.subf %15, %18 : vector<64x1xf32>
    %24 = math.exp %23 : vector<64x1xf32>
    %c0_9 = arith.constant 0 : index
    %c0_10 = arith.constant 0 : index
    %25 = vector.load %arg9[%c0_9, %c0_10] : memref<64x2xf32, #tpu.memory_space<vmem>>, vector<64x1xf32>
    %26 = arith.mulf %24, %25 : vector<64x1xf32>
    %cst_11 = arith.constant dense<0.000000e+00> : vector<64xf32>
    %27 = vector.multi_reduction <add>, %22, %cst_11 [1] : vector<64x64xf32> to vector<64xf32>
    %28 = vector.shape_cast %27 : vector<64xf32> to vector<64x1xf32>
    %29 = arith.addf %26, %28 : vector<64x1xf32>
    %c0_12 = arith.constant 0 : index
    %c0_13 = arith.constant 0 : index
    %30 = vector.load %arg9[%c0_12, %c0_13] : memref<64x2xf32, #tpu.memory_space<vmem>>, vector<64x1xf32>
    tpu.vector_store %arg9[%c0_12, %c0_13], %29 {strides = array<i32>} : memref<64x2xf32, #tpu.memory_space<vmem>>, vector<64x1xf32>,
    %c0_14 = arith.constant 0 : index
    %c0_15 = arith.constant 0 : index
    %31 = vector.load %arg5[%c0_14, %c0_15] : memref<64x256xbf16, #tpu.memory_space<vmem>>, vector<64x128xbf16>
    %c0_16 = arith.constant 0 : index
    %c0_17 = arith.constant 0 : index
    %c0_18 = arith.constant 0 : index
    %32 = vector.load %arg10[%c0_16, %c0_17, %c0_18] : memref<2x64x128xf32, #tpu.memory_space<vmem>>, vector<1x64x128xf32>
    %33 = vector.shape_cast %32 : vector<1x64x128xf32> to vector<64x128xf32>
    %34 = vector.broadcast %24 : vector<64x1xf32> to vector<64x128xf32>
    %35 = arith.mulf %34, %33 : vector<64x128xf32>
    %36 = arith.truncf %22 : vector<64x64xf32> to vector<64x64xbf16>
    %cst_19 = arith.constant dense<0.000000e+00> : vector<64x128xf32>
    %37 = tpu.matmul %36, %31, %cst_19 {dimension_numbers = #tpu.dot_dimension_numbers<[1], [0], [0], [1], [0, 0, 1, 1], [], []>} : vector<64x64xbf16>, vector<64x128xbf16>, vector<64x128xf32> -> vector<64x128xf32>
    %38 = arith.addf %35, %37 : vector<64x128xf32>
    %c0_20 = arith.constant 0 : index
    %c0_21 = arith.constant 0 : index
    %c0_22 = arith.constant 0 : index
    %39 = vector.load %arg10[%c0_20, %c0_21, %c0_22] : memref<2x64x128xf32, #tpu.memory_space<vmem>>, vector<1x64x128xf32>
    %40 = vector.shape_cast %39 : vector<1x64x128xf32> to vector<64x128xf32>
    %41 = vector.shape_cast %38 : vector<64x128xf32> to vector<1x64x128xf32>
    tpu.vector_store %arg10[%c0_20, %c0_21, %c0_22], %41 {strides = array<i32>} : memref<2x64x128xf32, #tpu.memory_space<vmem>>, vector<1x64x128xf32>,
    %c0_23 = arith.constant 0 : index
    %c0_24 = arith.constant 0 : index
    %42 = vector.load %arg8[%c0_23, %c0_24] : memref<64x2xf32, #tpu.memory_space<vmem>>, vector<64x1xf32>
    tpu.vector_store %arg8[%c0_23, %c0_24], %18 {strides = array<i32>} : memref<64x2xf32, #tpu.memory_space<vmem>>, vector<64x1xf32>,
    %43 = vector.extract_strided_slice %3 {offsets = [0, 1], sizes = [64, 1], strides = [1, 1]} : vector<64x2xf32> to vector<64x1xf32>
    %44 = vector.extract_strided_slice %4 {offsets = [1, 0], sizes = [1, 64], strides = [1, 1]} : vector<2x64xf32> to vector<1x64xf32>
    %45 = vector.broadcast %43 : vector<64x1xf32> to vector<64x64xf32>
    %46 = vector.broadcast %44 : vector<1x64xf32> to vector<64x64xf32>
    %47 = arith.addf %45, %46 : vector<64x64xf32>
    %cst_25 = arith.constant 2.000000e-01 : f32
    %48 = vector.broadcast %cst_25 : f32 to vector<64x64xf32>
    %49 = arith.mulf %48, %47 : vector<64x64xf32>
    %50 = arith.maximumf %47, %49 : vector<64x64xf32>
    %c0_26 = arith.constant 0 : index
    %c1 = arith.constant 1 : index
    %51 = vector.load %arg8[%c0_26, %c1] : memref<64x2xf32, #tpu.memory_space<vmem>>, vector<64x1xf32>
    %cst_27 = arith.constant dense<0xFF800000> : vector<64xf32>
    %52 = vector.multi_reduction <maximumf>, %50, %cst_27 [1] : vector<64x64xf32> to vector<64xf32>
    %53 = vector.shape_cast %52 : vector<64xf32> to vector<64x1xf32>
    %54 = arith.maximumf %51, %53 : vector<64x1xf32>
    %55 = vector.broadcast %54 : vector<64x1xf32> to vector<64x64xf32>
    %56 = arith.subf %50, %55 : vector<64x64xf32>
    %57 = math.exp %56 : vector<64x64xf32>
    %58 = arith.mulf %57, %6 : vector<64x64xf32>
    %59 = arith.subf %51, %54 : vector<64x1xf32>
    %60 = math.exp %59 : vector<64x1xf32>
    %c0_28 = arith.constant 0 : index
    %c1_29 = arith.constant 1 : index
    %61 = vector.load %arg9[%c0_28, %c1_29] : memref<64x2xf32, #tpu.memory_space<vmem>>, vector<64x1xf32>
    %62 = arith.mulf %60, %61 : vector<64x1xf32>
    %cst_30 = arith.constant dense<0.000000e+00> : vector<64xf32>
    %63 = vector.multi_reduction <add>, %58, %cst_30 [1] : vector<64x64xf32> to vector<64xf32>
    %64 = vector.shape_cast %63 : vector<64xf32> to vector<64x1xf32>
    %65 = arith.addf %62, %64 : vector<64x1xf32>
    %c0_31 = arith.constant 0 : index
    %c1_32 = arith.constant 1 : index
    %66 = vector.load %arg9[%c0_31, %c1_32] : memref<64x2xf32, #tpu.memory_space<vmem>>, vector<64x1xf32>
    tpu.vector_store %arg9[%c0_31, %c1_32], %65 {strides = array<i32>} : memref<64x2xf32, #tpu.memory_space<vmem>>, vector<64x1xf32>,
    %c0_33 = arith.constant 0 : index
    %c128 = arith.constant 128 : index
    %67 = vector.load %arg5[%c0_33, %c128] : memref<64x256xbf16, #tpu.memory_space<vmem>>, vector<64x128xbf16>
    %c1_34 = arith.constant 1 : index
    %c0_35 = arith.constant 0 : index
    %c0_36 = arith.constant 0 : index
    %68 = vector.load %arg10[%c1_34, %c0_35, %c0_36] : memref<2x64x128xf32, #tpu.memory_space<vmem>>, vector<1x64x128xf32>
    %69 = vector.shape_cast %68 : vector<1x64x128xf32> to vector<64x128xf32>
    %70 = vector.broadcast %60 : vector<64x1xf32> to vector<64x128xf32>
    %71 = arith.mulf %70, %69 : vector<64x128xf32>
    %72 = arith.truncf %58 : vector<64x64xf32> to vector<64x64xbf16>
    %cst_37 = arith.constant dense<0.000000e+00> : vector<64x128xf32>
    %73 = tpu.matmul %72, %67, %cst_37 {dimension_numbers = #tpu.dot_dimension_numbers<[1], [0], [0], [1], [0, 0, 1, 1], [], []>} : vector<64x64xbf16>, vector<64x128xbf16>, vector<64x128xf32> -> vector<64x128xf32>
    %74 = arith.addf %71, %73 : vector<64x128xf32>
    %c1_38 = arith.constant 1 : index
    %c0_39 = arith.constant 0 : index
    %c0_40 = arith.constant 0 : index
    %75 = vector.load %arg10[%c1_38, %c0_39, %c0_40] : memref<2x64x128xf32, #tpu.memory_space<vmem>>, vector<1x64x128xf32>
    %76 = vector.shape_cast %75 : vector<1x64x128xf32> to vector<64x128xf32>
    %77 = vector.shape_cast %74 : vector<64x128xf32> to vector<1x64x128xf32>
    tpu.vector_store %arg10[%c1_38, %c0_39, %c0_40], %77 {strides = array<i32>} : memref<2x64x128xf32, #tpu.memory_space<vmem>>, vector<1x64x128xf32>,
    %c0_41 = arith.constant 0 : index
    %c1_42 = arith.constant 1 : index
    %78 = vector.load %arg8[%c0_41, %c1_42] : memref<64x2xf32, #tpu.memory_space<vmem>>, vector<64x1xf32>
    tpu.vector_store %arg8[%c0_41, %c1_42], %54 {strides = array<i32>} : memref<64x2xf32, #tpu.memory_space<vmem>>, vector<64x1xf32>,
    %c0_i32_43 = arith.constant 0 : i32
    %79 = arith.cmpi eq, %arg1, %c0_i32_43 : i32
    %80 = arith.extui %79 : i1 to i32
    %c0_i32_44 = arith.constant 0 : i32
    %81 = arith.cmpi ne, %80, %c0_i32_44 : i32
    scf.if %81 {
      %cst_45 = arith.constant 0.000000e+00 : f32
      %82 = vector.broadcast %cst_45 : f32 to vector<64x128xf32>
      %c0_46 = arith.constant 0 : index
      %c0_47 = arith.constant 0 : index
      %83 = vector.load %arg9[%c0_46, %c0_47] : memref<64x2xf32, #tpu.memory_space<vmem>>, vector<64x1xf32>
      %84 = tpu.reciprocal %83 {approx = true} : vector<64x1xf32> -> vector<64x1xf32>
      %c0_48 = arith.constant 0 : index
      %c0_49 = arith.constant 0 : index
      %c0_50 = arith.constant 0 : index
      %85 = vector.load %arg10[%c0_48, %c0_49, %c0_50] : memref<2x64x128xf32, #tpu.memory_space<vmem>>, vector<1x64x128xf32>
      %86 = vector.shape_cast %85 : vector<1x64x128xf32> to vector<64x128xf32>
      %87 = vector.broadcast %84 : vector<64x1xf32> to vector<64x128xf32>
      %88 = arith.mulf %86, %87 : vector<64x128xf32>
      %89 = arith.addf %82, %88 : vector<64x128xf32>
      %c0_51 = arith.constant 0 : index
      %c1_52 = arith.constant 1 : index
      %90 = vector.load %arg9[%c0_51, %c1_52] : memref<64x2xf32, #tpu.memory_space<vmem>>, vector<64x1xf32>
      %91 = tpu.reciprocal %90 {approx = true} : vector<64x1xf32> -> vector<64x1xf32>
      %c1_53 = arith.constant 1 : index
      %c0_54 = arith.constant 0 : index
      %c0_55 = arith.constant 0 : index
      %92 = vector.load %arg10[%c1_53, %c0_54, %c0_55] : memref<2x64x128xf32, #tpu.memory_space<vmem>>, vector<1x64x128xf32>
      %93 = vector.shape_cast %92 : vector<1x64x128xf32> to vector<64x128xf32>
      %94 = vector.broadcast %91 : vector<64x1xf32> to vector<64x128xf32>
      %95 = arith.mulf %93, %94 : vector<64x128xf32>
      %96 = arith.addf %89, %95 : vector<64x128xf32>
      %cst_56 = arith.constant 5.000000e-01 : f32
      %97 = vector.broadcast %cst_56 : f32 to vector<64x128xf32>
      %98 = arith.mulf %96, %97 : vector<64x128xf32>
      %c0_57 = arith.constant 0 : index
      %c0_58 = arith.constant 0 : index
      %99 = vector.load %arg6[%c0_57, %c0_58] : memref<1x128xf32, #tpu.memory_space<vmem>>, vector<1x128xf32>
      %100 = vector.broadcast %99 : vector<1x128xf32> to vector<64x128xf32>
      %101 = arith.addf %98, %100 : vector<64x128xf32>
      %cst_59 = arith.constant 0.000000e+00 : f32
      %102 = vector.broadcast %cst_59 : f32 to vector<64x128xf32>
      %103 = arith.maximumf %101, %102 : vector<64x128xf32>
      %c0_60 = arith.constant 0 : index
      %c0_61 = arith.constant 0 : index
      %104 = vector.load %arg7[%c0_60, %c0_61] : memref<64x128xf32, #tpu.memory_space<vmem>>, vector<64x128xf32>
      tpu.vector_store %arg7[%c0_60, %c0_61], %103 {strides = array<i32>} : memref<64x128xf32, #tpu.memory_space<vmem>>, vector<64x128xf32>,
    } else {
    }
    return
  }
  func.func @transform_0(%arg0: i32, %arg1: i32) -> (i32, i32) {
    %c0_i32 = arith.constant 0 : i32
    %c0_i32_0 = arith.constant 0 : i32
    return %arg0, %c0_i32 : i32, i32
  }
  func.func @transform_1(%arg0: i32, %arg1: i32) -> (i32, i32) {
    %c0_i32 = arith.constant 0 : i32
    %c0_i32_0 = arith.constant 0 : i32
    return %c0_i32, %arg1 : i32, i32
  }
  func.func @transform_2(%arg0: i32, %arg1: i32) -> (i32, i32) {
    %c0_i32 = arith.constant 0 : i32
    return %arg0, %arg1 : i32, i32
  }
  func.func @transform_3(%arg0: i32, %arg1: i32) -> (i32, i32) {
    %c0_i32 = arith.constant 0 : i32
    %c0_i32_0 = arith.constant 0 : i32
    return %arg1, %c0_i32 : i32, i32
  }
  func.func @transform_4(%arg0: i32, %arg1: i32) -> (i32, i32) {
    %c0_i32 = arith.constant 0 : i32
    %c0_i32_0 = arith.constant 0 : i32
    %c0_i32_1 = arith.constant 0 : i32
    return %c0_i32, %c0_i32_0 : i32, i32
  }
  func.func @transform_5(%arg0: i32, %arg1: i32) -> (i32, i32) {
    %c0_i32 = arith.constant 0 : i32
    %c0_i32_0 = arith.constant 0 : i32
    return %arg0, %c0_i32 : i32, i32
  }
}

module attributes {stable_mosaic.version = 11 : i64} {
  func.func @gat_aggregate_kernel(%arg0: i32, %arg1: i32, %arg2: memref<64x2xf32, #tpu.memory_space<vmem>>, %arg3: memref<2x64xf32, #tpu.memory_space<vmem>>, %arg4: memref<64x64xi8, #tpu.memory_space<vmem>>, %arg5: memref<64x256xbf16, #tpu.memory_space<vmem>>, %arg6: memref<1x128xf32, #tpu.memory_space<vmem>>, %arg7: memref<64x128xf32, #tpu.memory_space<vmem>>, %arg8: memref<64x2xf32, #tpu.memory_space<vmem>>, %arg9: memref<64x2xf32, #tpu.memory_space<vmem>>, %arg10: memref<2x64x128xf32, #tpu.memory_space<vmem>>) attributes {dimension_semantics = [#tpu.dimension_semantics<parallel>, #tpu.dimension_semantics<arbitrary>], iteration_bounds = array<i64: 1, 1>, scalar_prefetch = 0 : i64, scratch_operands = 3 : i64, tpu.core_type = #tpu.core_type<tc>, window_params = [{transform_indices = @transform_0, window_bounds = array<i64: 64, 2>}, {transform_indices = @transform_1, window_bounds = array<i64: 2, 64>}, {transform_indices = @transform_2, window_bounds = array<i64: 64, 64>}, {transform_indices = @transform_3, window_bounds = array<i64: 64, 256>}, {pipeline_mode = #tpu.pipeline_mode<synchronous>, transform_indices = @transform_4, window_bounds = array<i64: 1, 128>}, {transform_indices = @transform_5, window_bounds = array<i64: 64, 128>}]} {
    %c0_i32 = arith.constant 0 : i32
    %0 = arith.cmpi eq, %arg1, %c0_i32 : i32
    %1 = arith.extui %0 : i1 to i32
    %c0_i32_0 = arith.constant 0 : i32
    %2 = arith.cmpi ne, %1, %c0_i32_0 : i32
    scf.if %2 {
      %cst_45 = arith.constant -1.000000e+30 : f32
      %82 = vector.broadcast %cst_45 : f32 to vector<64x2xf32>
      %c0_46 = arith.constant 0 : index
      %c0_47 = arith.constant 0 : index
      %83 = vector.load %arg8[%c0_46, %c0_47] : memref<64x2xf32, #tpu.memory_space<vmem>>, vector<64x2xf32>
      tpu.vector_store %arg8[%c0_46, %c0_47], %82 {strides = array<i32>} : memref<64x2xf32, #tpu.memory_space<vmem>>, vector<64x2xf32>,
      %cst_48 = arith.constant 0.000000e+00 : f32
      %84 = vector.broadcast %cst_48 : f32 to vector<64x2xf32>
      %c0_49 = arith.constant 0 : index
      %c0_50 = arith.constant 0 : index
      %85 = vector.load %arg9[%c0_49, %c0_50] : memref<64x2xf32, #tpu.memory_space<vmem>>, vector<64x2xf32>
      tpu.vector_store %arg9[%c0_49, %c0_50], %84 {strides = array<i32>} : memref<64x2xf32, #tpu.memory_space<vmem>>, vector<64x2xf32>,
      %cst_51 = arith.constant 0.000000e+00 : f32
      %86 = vector.broadcast %cst_51 : f32 to vector<2x64x128xf32>
      %c0_52 = arith.constant 0 : index
      %c0_53 = arith.constant 0 : index
      %c0_54 = arith.constant 0 : index
      %87 = vector.load %arg10[%c0_52, %c0_53, %c0_54] : memref<2x64x128xf32, #tpu.memory_space<vmem>>, vector<2x64x128xf32>
      tpu.vector_store %arg10[%c0_52, %c0_53, %c0_54], %86 {strides = array<i32>} : memref<2x64x128xf32, #tpu.memory_space<vmem>>, vector<2x64x128xf32>,
    } else {
    }
    %c0 = arith.constant 0 : index
    %c0_1 = arith.constant 0 : index
    %3 = vector.load %arg2[%c0, %c0_1] : memref<64x2xf32, #tpu.memory_space<vmem>>, vector<64x2xf32>
    %c0_2 = arith.constant 0 : index
    %c0_3 = arith.constant 0 : index
    %4 = vector.load %arg3[%c0_2, %c0_3] : memref<2x64xf32, #tpu.memory_space<vmem>>, vector<2x64xf32>
    %c0_4 = arith.constant 0 : index
    %c0_5 = arith.constant 0 : index
    %5 = vector.load %arg4[%c0_4, %c0_5] : memref<64x64xi8, #tpu.memory_space<vmem>>, vector<64x64xi8>
    %6 = arith.sitofp %5 : vector<64x64xi8> to vector<64x64xf32>
    %7 = vector.extract_strided_slice %3 {offsets = [0, 0], sizes = [64, 1], strides = [1, 1]} : vector<64x2xf32> to vector<64x1xf32>
    %8 = vector.extract_strided_slice %4 {offsets = [0, 0], sizes = [1, 64], strides = [1, 1]} : vector<2x64xf32> to vector<1x64xf32>
    %9 = vector.broadcast %7 : vector<64x1xf32> to vector<64x64xf32>
    %10 = vector.broadcast %8 : vector<1x64xf32> to vector<64x64xf32>
    %11 = arith.addf %9, %10 : vector<64x64xf32>
    %cst = arith.constant 2.000000e-01 : f32
    %12 = vector.broadcast %cst : f32 to vector<64x64xf32>
    %13 = arith.mulf %12, %11 : vector<64x64xf32>
    %14 = arith.maximumf %11, %13 : vector<64x64xf32>
    %c0_6 = arith.constant 0 : index
    %c0_7 = arith.constant 0 : index
    %15 = vector.load %arg8[%c0_6, %c0_7] : memref<64x2xf32, #tpu.memory_space<vmem>>, vector<64x1xf32>
    %cst_8 = arith.constant dense<0xFF800000> : vector<64xf32>
    %16 = vector.multi_reduction <maximumf>, %14, %cst_8 [1] : vector<64x64xf32> to vector<64xf32>
    %17 = vector.shape_cast %16 : vector<64xf32> to vector<64x1xf32>
    %18 = arith.maximumf %15, %17 : vector<64x1xf32>
    %19 = vector.broadcast %18 : vector<64x1xf32> to vector<64x64xf32>
    %20 = arith.subf %14, %19 : vector<64x64xf32>
    %21 = math.exp %20 : vector<64x64xf32>
    %22 = arith.mulf %21, %6 : vector<64x64xf32>
    %23 = arith.subf %15, %18 : vector<64x1xf32>
    %24 = math.exp %23 : vector<64x1xf32>
    %c0_9 = arith.constant 0 : index
    %c0_10 = arith.constant 0 : index
    %25 = vector.load %arg9[%c0_9, %c0_10] : memref<64x2xf32, #tpu.memory_space<vmem>>, vector<64x1xf32>
    %26 = arith.mulf %24, %25 : vector<64x1xf32>
    %cst_11 = arith.constant dense<0.000000e+00> : vector<64xf32>
    %27 = vector.multi_reduction <add>, %22, %cst_11 [1] : vector<64x64xf32> to vector<64xf32>
    %28 = vector.shape_cast %27 : vector<64xf32> to vector<64x1xf32>
    %29 = arith.addf %26, %28 : vector<64x1xf32>
    %c0_12 = arith.constant 0 : index
    %c0_13 = arith.constant 0 : index
    %30 = vector.load %arg9[%c0_12, %c0_13] : memref<64x2xf32, #tpu.memory_space<vmem>>, vector<64x1xf32>
    tpu.vector_store %arg9[%c0_12, %c0_13], %29 {strides = array<i32>} : memref<64x2xf32, #tpu.memory_space<vmem>>, vector<64x1xf32>,
    %c0_14 = arith.constant 0 : index
    %c0_15 = arith.constant 0 : index
    %31 = vector.load %arg5[%c0_14, %c0_15] : memref<64x256xbf16, #tpu.memory_space<vmem>>, vector<64x128xbf16>
    %c0_16 = arith.constant 0 : index
    %c0_17 = arith.constant 0 : index
    %c0_18 = arith.constant 0 : index
    %32 = vector.load %arg10[%c0_16, %c0_17, %c0_18] : memref<2x64x128xf32, #tpu.memory_space<vmem>>, vector<1x64x128xf32>
    %33 = vector.shape_cast %32 : vector<1x64x128xf32> to vector<64x128xf32>
    %34 = vector.broadcast %24 : vector<64x1xf32> to vector<64x128xf32>
    %35 = arith.mulf %34, %33 : vector<64x128xf32>
    %36 = arith.truncf %22 : vector<64x64xf32> to vector<64x64xbf16>
    %cst_19 = arith.constant dense<0.000000e+00> : vector<64x128xf32>
    %37 = tpu.matmul %36, %31, %cst_19 {dimension_numbers = #tpu.dot_dimension_numbers<[1], [0], [0], [1], [0, 0, 1, 1], [], []>} : vector<64x64xbf16>, vector<64x128xbf16>, vector<64x128xf32> -> vector<64x128xf32>
    %38 = arith.addf %35, %37 : vector<64x128xf32>
    %c0_20 = arith.constant 0 : index
    %c0_21 = arith.constant 0 : index
    %c0_22 = arith.constant 0 : index
    %39 = vector.load %arg10[%c0_20, %c0_21, %c0_22] : memref<2x64x128xf32, #tpu.memory_space<vmem>>, vector<1x64x128xf32>
    %40 = vector.shape_cast %39 : vector<1x64x128xf32> to vector<64x128xf32>
    %41 = vector.shape_cast %38 : vector<64x128xf32> to vector<1x64x128xf32>
    tpu.vector_store %arg10[%c0_20, %c0_21, %c0_22], %41 {strides = array<i32>} : memref<2x64x128xf32, #tpu.memory_space<vmem>>, vector<1x64x128xf32>,
    %c0_23 = arith.constant 0 : index
    %c0_24 = arith.constant 0 : index
    %42 = vector.load %arg8[%c0_23, %c0_24] : memref<64x2xf32, #tpu.memory_space<vmem>>, vector<64x1xf32>
    tpu.vector_store %arg8[%c0_23, %c0_24], %18 {strides = array<i32>} : memref<64x2xf32, #tpu.memory_space<vmem>>, vector<64x1xf32>,
    %43 = vector.extract_strided_slice %3 {offsets = [0, 1], sizes = [64, 1], strides = [1, 1]} : vector<64x2xf32> to vector<64x1xf32>
    %44 = vector.extract_strided_slice %4 {offsets = [1, 0], sizes = [1, 64], strides = [1, 1]} : vector<2x64xf32> to vector<1x64xf32>
    %45 = vector.broadcast %43 : vector<64x1xf32> to vector<64x64xf32>
    %46 = vector.broadcast %44 : vector<1x64xf32> to vector<64x64xf32>
    %47 = arith.addf %45, %46 : vector<64x64xf32>
    %cst_25 = arith.constant 2.000000e-01 : f32
    %48 = vector.broadcast %cst_25 : f32 to vector<64x64xf32>
    %49 = arith.mulf %48, %47 : vector<64x64xf32>
    %50 = arith.maximumf %47, %49 : vector<64x64xf32>
    %c0_26 = arith.constant 0 : index
    %c1 = arith.constant 1 : index
    %51 = vector.load %arg8[%c0_26, %c1] : memref<64x2xf32, #tpu.memory_space<vmem>>, vector<64x1xf32>
    %cst_27 = arith.constant dense<0xFF800000> : vector<64xf32>
    %52 = vector.multi_reduction <maximumf>, %50, %cst_27 [1] : vector<64x64xf32> to vector<64xf32>
    %53 = vector.shape_cast %52 : vector<64xf32> to vector<64x1xf32>
    %54 = arith.maximumf %51, %53 : vector<64x1xf32>
    %55 = vector.broadcast %54 : vector<64x1xf32> to vector<64x64xf32>
    %56 = arith.subf %50, %55 : vector<64x64xf32>
    %57 = math.exp %56 : vector<64x64xf32>
    %58 = arith.mulf %57, %6 : vector<64x64xf32>
    %59 = arith.subf %51, %54 : vector<64x1xf32>
    %60 = math.exp %59 : vector<64x1xf32>
    %c0_28 = arith.constant 0 : index
    %c1_29 = arith.constant 1 : index
    %61 = vector.load %arg9[%c0_28, %c1_29] : memref<64x2xf32, #tpu.memory_space<vmem>>, vector<64x1xf32>
    %62 = arith.mulf %60, %61 : vector<64x1xf32>
    %cst_30 = arith.constant dense<0.000000e+00> : vector<64xf32>
    %63 = vector.multi_reduction <add>, %58, %cst_30 [1] : vector<64x64xf32> to vector<64xf32>
    %64 = vector.shape_cast %63 : vector<64xf32> to vector<64x1xf32>
    %65 = arith.addf %62, %64 : vector<64x1xf32>
    %c0_31 = arith.constant 0 : index
    %c1_32 = arith.constant 1 : index
    %66 = vector.load %arg9[%c0_31, %c1_32] : memref<64x2xf32, #tpu.memory_space<vmem>>, vector<64x1xf32>
    tpu.vector_store %arg9[%c0_31, %c1_32], %65 {strides = array<i32>} : memref<64x2xf32, #tpu.memory_space<vmem>>, vector<64x1xf32>,
    %c0_33 = arith.constant 0 : index
    %c128 = arith.constant 128 : index
    %67 = vector.load %arg5[%c0_33, %c128] : memref<64x256xbf16, #tpu.memory_space<vmem>>, vector<64x128xbf16>
    %c1_34 = arith.constant 1 : index
    %c0_35 = arith.constant 0 : index
    %c0_36 = arith.constant 0 : index
    %68 = vector.load %arg10[%c1_34, %c0_35, %c0_36] : memref<2x64x128xf32, #tpu.memory_space<vmem>>, vector<1x64x128xf32>
    %69 = vector.shape_cast %68 : vector<1x64x128xf32> to vector<64x128xf32>
    %70 = vector.broadcast %60 : vector<64x1xf32> to vector<64x128xf32>
    %71 = arith.mulf %70, %69 : vector<64x128xf32>
    %72 = arith.truncf %58 : vector<64x64xf32> to vector<64x64xbf16>
    %cst_37 = arith.constant dense<0.000000e+00> : vector<64x128xf32>
    %73 = tpu.matmul %72, %67, %cst_37 {dimension_numbers = #tpu.dot_dimension_numbers<[1], [0], [0], [1], [0, 0, 1, 1], [], []>} : vector<64x64xbf16>, vector<64x128xbf16>, vector<64x128xf32> -> vector<64x128xf32>
    %74 = arith.addf %71, %73 : vector<64x128xf32>
    %c1_38 = arith.constant 1 : index
    %c0_39 = arith.constant 0 : index
    %c0_40 = arith.constant 0 : index
    %75 = vector.load %arg10[%c1_38, %c0_39, %c0_40] : memref<2x64x128xf32, #tpu.memory_space<vmem>>, vector<1x64x128xf32>
    %76 = vector.shape_cast %75 : vector<1x64x128xf32> to vector<64x128xf32>
    %77 = vector.shape_cast %74 : vector<64x128xf32> to vector<1x64x128xf32>
    tpu.vector_store %arg10[%c1_38, %c0_39, %c0_40], %77 {strides = array<i32>} : memref<2x64x128xf32, #tpu.memory_space<vmem>>, vector<1x64x128xf32>,
    %c0_41 = arith.constant 0 : index
    %c1_42 = arith.constant 1 : index
    %78 = vector.load %arg8[%c0_41, %c1_42] : memref<64x2xf32, #tpu.memory_space<vmem>>, vector<64x1xf32>
    tpu.vector_store %arg8[%c0_41, %c1_42], %54 {strides = array<i32>} : memref<64x2xf32, #tpu.memory_space<vmem>>, vector<64x1xf32>,
    %c0_i32_43 = arith.constant 0 : i32
    %79 = arith.cmpi eq, %arg1, %c0_i32_43 : i32
    %80 = arith.extui %79 : i1 to i32
    %c0_i32_44 = arith.constant 0 : i32
    %81 = arith.cmpi ne, %80, %c0_i32_44 : i32
    scf.if %81 {
      %cst_45 = arith.constant 0.000000e+00 : f32
      %82 = vector.broadcast %cst_45 : f32 to vector<64x128xf32>
      %c0_46 = arith.constant 0 : index
      %c0_47 = arith.constant 0 : index
      %83 = vector.load %arg9[%c0_46, %c0_47] : memref<64x2xf32, #tpu.memory_space<vmem>>, vector<64x1xf32>
      %84 = tpu.reciprocal %83 {approx = true} : vector<64x1xf32> -> vector<64x1xf32>
      %c0_48 = arith.constant 0 : index
      %c0_49 = arith.constant 0 : index
      %c0_50 = arith.constant 0 : index
      %85 = vector.load %arg10[%c0_48, %c0_49, %c0_50] : memref<2x64x128xf32, #tpu.memory_space<vmem>>, vector<1x64x128xf32>
      %86 = vector.shape_cast %85 : vector<1x64x128xf32> to vector<64x128xf32>
      %87 = vector.broadcast %84 : vector<64x1xf32> to vector<64x128xf32>
      %88 = arith.mulf %86, %87 : vector<64x128xf32>
      %89 = arith.addf %82, %88 : vector<64x128xf32>
      %c0_51 = arith.constant 0 : index
      %c1_52 = arith.constant 1 : index
      %90 = vector.load %arg9[%c0_51, %c1_52] : memref<64x2xf32, #tpu.memory_space<vmem>>, vector<64x1xf32>
      %91 = tpu.reciprocal %90 {approx = true} : vector<64x1xf32> -> vector<64x1xf32>
      %c1_53 = arith.constant 1 : index
      %c0_54 = arith.constant 0 : index
      %c0_55 = arith.constant 0 : index
      %92 = vector.load %arg10[%c1_53, %c0_54, %c0_55] : memref<2x64x128xf32, #tpu.memory_space<vmem>>, vector<1x64x128xf32>
      %93 = vector.shape_cast %92 : vector<1x64x128xf32> to vector<64x128xf32>
      %94 = vector.broadcast %91 : vector<64x1xf32> to vector<64x128xf32>
      %95 = arith.mulf %93, %94 : vector<64x128xf32>
      %96 = arith.addf %89, %95 : vector<64x128xf32>
      %cst_56 = arith.constant 5.000000e-01 : f32
      %97 = vector.broadcast %cst_56 : f32 to vector<64x128xf32>
      %98 = arith.mulf %96, %97 : vector<64x128xf32>
      %c0_57 = arith.constant 0 : index
      %c0_58 = arith.constant 0 : index
      %99 = vector.load %arg6[%c0_57, %c0_58] : memref<1x128xf32, #tpu.memory_space<vmem>>, vector<1x128xf32>
      %100 = vector.broadcast %99 : vector<1x128xf32> to vector<64x128xf32>
      %101 = arith.addf %98, %100 : vector<64x128xf32>
      %c0_59 = arith.constant 0 : index
      %c0_60 = arith.constant 0 : index
      %102 = vector.load %arg7[%c0_59, %c0_60] : memref<64x128xf32, #tpu.memory_space<vmem>>, vector<64x128xf32>
      tpu.vector_store %arg7[%c0_59, %c0_60], %101 {strides = array<i32>} : memref<64x128xf32, #tpu.memory_space<vmem>>, vector<64x128xf32>,
    } else {
    }
    return
  }
  func.func @transform_0(%arg0: i32, %arg1: i32) -> (i32, i32) {
    %c0_i32 = arith.constant 0 : i32
    %c0_i32_0 = arith.constant 0 : i32
    return %arg0, %c0_i32 : i32, i32
  }
  func.func @transform_1(%arg0: i32, %arg1: i32) -> (i32, i32) {
    %c0_i32 = arith.constant 0 : i32
    %c0_i32_0 = arith.constant 0 : i32
    return %c0_i32, %arg1 : i32, i32
  }
  func.func @transform_2(%arg0: i32, %arg1: i32) -> (i32, i32) {
    %c0_i32 = arith.constant 0 : i32
    return %arg0, %arg1 : i32, i32
  }
  func.func @transform_3(%arg0: i32, %arg1: i32) -> (i32, i32) {
    %c0_i32 = arith.constant 0 : i32
    %c0_i32_0 = arith.constant 0 : i32
    return %arg1, %c0_i32 : i32, i32
  }
  func.func @transform_4(%arg0: i32, %arg1: i32) -> (i32, i32) {
    %c0_i32 = arith.constant 0 : i32
    %c0_i32_0 = arith.constant 0 : i32
    %c0_i32_1 = arith.constant 0 : i32
    return %c0_i32, %c0_i32_0 : i32, i32
  }
  func.func @transform_5(%arg0: i32, %arg1: i32) -> (i32, i32) {
    %c0_i32 = arith.constant 0 : i32
    %c0_i32_0 = arith.constant 0 : i32
    return %arg0, %c0_i32 : i32, i32
  }
}

</mosaic_0001>

<bundles_post_ra>
// kernel: gat_forward.4
= control target key start
LH: loop header
LB: loop body
LE: loop exit
PB: predicated region body
PF: predicated region fallthrough
CT: control target
= control target key end

     0   :  { %vm424_vm0 = vcmask 31744   ;;  %s850_s1 = inlined_call_operand.vmem [shape: bf16[128,256], index: 1, kind: input, shape index: {}]   ;;  %s851_s0 = inlined_call_operand.vmem [shape: f32[64,128], index: 0, kind: input, shape index: {}]   ;;  %s852_s2 = inlined_call_operand.vmem [shape: bf16[256,4], index: 2, kind: input, shape index: {}]   ;;  %s853_s3 = inlined_call_operand.vmem [shape: bf16[64,256], index: 3, kind: output, shape index: {0}]   ;;  %s854_s4 = inlined_call_operand.vmem [shape: f32[64,4], index: 4, kind: output, shape index: {1}]  }
   0x1   :  { %v499_v0 = vld [vmem:[%s850_s1 + $0x70] sm:$0xf]  ;;  %v584_v1 = vld [vmem:[%s850_s1 + $0x74] sm:$0xf0]  ;;  %v583_v2 = vld [vmem:[%s850_s1 + $0x74] sm:$0xf] }
   0x2   :  { %v500_v3 = vor.u32 %v584_v1, %v499_v0  ;;  %v501_v4 = vld [vmem:[%s850_s1 + $0x78] sm:$0xf0]  ;;  %v491_v5 = vld [vmem:[%s850_s1 + $0x60] sm:$0xf]  ;;  %v582_v6 = vld [vmem:[%s850_s1 + $0x64] sm:$0xf0] }
   0x3   :  { %v504_v7 = vor.u32 %v583_v2, %v501_v4  ;;  %v581_v8 = vld [vmem:[%s850_s1 + $0x64] sm:$0xf]  ;;  %v493_v9 = vld [vmem:[%s850_s1 + $0x68] sm:$0xf0]  ;;  %v492_v10 = vor.u32 %v582_v6, %v491_v5  ;;  %v483_v12 = vld [vmem:[%s850_s1 + $0x50] sm:$0xf] }
   0x4   :  { %124 = vmatpush.bf16.msra.mxu0 %v500_v3  ;;  %v496_v11 = vor.u32 %v581_v8, %v493_v9  ;;  %v580_v13 = vld [vmem:[%s850_s1 + $0x54] sm:$0xf0]  ;;  %v579_v14 = vld [vmem:[%s850_s1 + $0x54] sm:$0xf]  ;;  %v485_v15 = vld [vmem:[%s850_s1 + $0x58] sm:$0xf0] }
   0x5   :  { %153 = vmatpush.bf16.msra.mxu1 %v504_v7  ;;  %v484_v16 = vor.u32 %v580_v13, %v483_v12  ;;  %v488_v17 = vor.u32 %v579_v14, %v485_v15  ;;  %v475_v18 = vld [vmem:[%s850_s1 + $0x40] sm:$0xf]  ;;  %v578_v19 = vld [vmem:[%s850_s1 + $0x44] sm:$0xf0]  ;;  %v577_v20 = vld [vmem:[%s850_s1 + $0x44] sm:$0xf] }
   0x6   :  { %v477_v21 = vld [vmem:[%s850_s1 + $0x48] sm:$0xf0]  ;;  %v476_v22 = vor.u32 %v578_v19, %v475_v18  ;;  %v467_v24 = vld [vmem:[%s850_s1 + $0x30] sm:$0xf]  ;;  %v576_v25 = vld [vmem:[%s850_s1 + $0x34] sm:$0xf0] }
   0x7   :  { %v480_v23 = vor.u32 %v577_v20, %v477_v21  ;;  %v575_v26 = vld [vmem:[%s850_s1 + $0x34] sm:$0xf]  ;;  %v469_v27 = vld [vmem:[%s850_s1 + $0x38] sm:$0xf0]  ;;  %v468_v28 = vor.u32 %v576_v25, %v467_v24  ;;  %v459_v30 = vld [vmem:[%s850_s1 + $0x20] sm:$0xf] }
   0x8   :  { %125 = vmatpush.bf16.msra.mxu0 %v492_v10  ;;  %v472_v29 = vor.u32 %v575_v26, %v469_v27  ;;  %v574_v31 = vld [vmem:[%s850_s1 + $0x24] sm:$0xf0]  ;;  %v573_v32 = vld [vmem:[%s850_s1 + $0x24] sm:$0xf]  ;;  %v461_v33 = vld [vmem:[%s850_s1 + $0x28] sm:$0xf0] }
   0x9   :  { %154 = vmatpush.bf16.msra.mxu1 %v496_v11  ;;  %v460_v34 = vor.u32 %v574_v31, %v459_v30  ;;  %v464_v35 = vor.u32 %v573_v32, %v461_v33  ;;  %v451_v36 = vld [vmem:[%s850_s1 + $0x10] sm:$0xf]  ;;  %v572_v37 = vld [vmem:[%s850_s1 + $0x14] sm:$0xf0]  ;;  %v571_v38 = vld [vmem:[%s850_s1 + $0x14] sm:$0xf] }
   0xa   :  { %v453_v39 = vld [vmem:[%s850_s1 + $0x18] sm:$0xf0]  ;;  %v452_v40 = vor.u32 %v572_v37, %v451_v36  ;;  %v443_v42 = vld [vmem:[%s850_s1] sm:$0xf]  ;;  %v570_v43 = vld [vmem:[%s850_s1 + $0x4] sm:$0xf0] }
   0xb   :  { %v456_v41 = vor.u32 %v571_v38, %v453_v39  ;;  %v569_v44 = vld [vmem:[%s850_s1 + $0x4] sm:$0xf]  ;;  %v445_v45 = vld [vmem:[%s850_s1 + $0x8] sm:$0xf0]  ;;  %v444_v46 = vor.u32 %v570_v43, %v443_v42  ;;  %v18_v51 = vld [vmem:[%s851_s0 + $0x10] sm:$0xff] }
   0xc   :  { %126 = vmatpush.bf16.msra.mxu0 %v484_v16  ;;  %v16_v47 = vld [vmem:[%s851_s0] sm:$0xff]  ;;  %v17_v48 = vld [vmem:[%s851_s0 + $0x8] sm:$0xff]  ;;  %v448_v49 = vor.u32 %v569_v44, %v445_v45  ;;  %v19_v52 = vld [vmem:[%s851_s0 + $0x18] sm:$0xff] }
   0xd   :  { %155 = vmatpush.bf16.msra.mxu1 %v488_v17  ;;  %v24_v50 = vpack.c.bf16 %v17_v48, %v16_v47  ;;  %v25_v53 = vpack.c.bf16 %v19_v52, %v18_v51  ;;  %v592_v54 = vld [vmem:[%s852_s2 + $0x38] sm:$0xff]  ;;  %v591_v56 = vld [vmem:[%s852_s2 + $0x30] sm:$0xff]  ;;  %v590_v58 = vld [vmem:[%s852_s2 + $0x28] sm:$0xff] }
   0xe   :  { %v600_v55 = vld [vmem:[%s852_s2 + $0x78] sm:$0xff]  ;;  %366 = vmatpush.bf16.msra.mxu2 %v592_v54  ;;  %v599_v57 = vld [vmem:[%s852_s2 + $0x70] sm:$0xff]  ;;  %v598_v59 = vld [vmem:[%s852_s2 + $0x68] sm:$0xff] }
   0xf   :  { %395 = vmatpush.bf16.msra.mxu3 %v600_v55  ;;  %v20_v60 = vld [vmem:[%s851_s0 + $0x20] sm:$0xff]  ;;  %v21_v61 = vld [vmem:[%s851_s0 + $0x28] sm:$0xff]  ;;  %v22_v1 = vld [vmem:[%s851_s0 + $0x30] sm:$0xff] }
  0x10   :  { %127 = vmatpush.bf16.msra.mxu0 %v476_v22  ;;  %v589_v62 = vld [vmem:[%s852_s2 + $0x20] sm:$0xff]  ;;  %v26_v0 = vpack.c.bf16 %v21_v61, %v20_v60  ;;  %v23_v2 = vld [vmem:[%s851_s0 + $0x38] sm:$0xff]  ;;  %v587_v6 = vld [vmem:[%s852_s2 + $0x10] sm:$0xff] }
  0x11   :  { %156 = vmatpush.bf16.msra.mxu1 %v480_v23  ;;  %v597_v63 = vld [vmem:[%s852_s2 + $0x60] sm:$0xff]  ;;  %v27_v3 = vpack.c.bf16 %v23_v2, %v22_v1  ;;  %v588_v4 = vld [vmem:[%s852_s2 + $0x18] sm:$0xff]  ;;  %v595_v7 = vld [vmem:[%s852_s2 + $0x50] sm:$0xff] }
  0x12   :  { %367 = vmatpush.bf16.msra.mxu2 %v591_v56  ;;  %v596_v5 = vld [vmem:[%s852_s2 + $0x58] sm:$0xff]  ;;  %v586_v8 = vld [vmem:[%s852_s2 + $0x8] sm:$0xff]  ;;  %v585_v10 = vld [vmem:[%s852_s2] sm:$0xff] }
  0x13   :  { %396 = vmatpush.bf16.msra.mxu3 %v599_v57  ;;  %v594_v9 = vld [vmem:[%s852_s2 + $0x48] sm:$0xff]  ;;  %v593_v11 = vld [vmem:[%s852_s2 + $0x40] sm:$0xff] }
  0x14   :  { %128 = vmatpush.bf16.msra.mxu0 %v468_v28 }
  0x15   :  { %157 = vmatpush.bf16.msra.mxu1 %v472_v29 }
  0x16   :  { %368 = vmatpush.bf16.msra.mxu2 %v590_v58 }
  0x17   :  { %397 = vmatpush.bf16.msra.mxu3 %v598_v59 }
  0x18   :  { %129 = vmatpush.bf16.msra.mxu0 %v460_v34 }
  0x19   :  { %158 = vmatpush.bf16.msra.mxu1 %v464_v35 }
  0x1a   :  { %369 = vmatpush.bf16.msra.mxu2 %v589_v62 }
  0x1b   :  { %398 = vmatpush.bf16.msra.mxu3 %v597_v63 }
  0x1c   :  { %130 = vmatpush.bf16.msra.mxu0 %v452_v40 }
  0x1d   :  { %159 = vmatpush.bf16.msra.mxu1 %v456_v41 }
  0x1e   :  { %370 = vmatpush.bf16.msra.mxu2 %v588_v4 }
  0x1f   :  { %399 = vmatpush.bf16.msra.mxu3 %v596_v5 }
  0x20   :  { %131 = vmatpush.bf16.msra.mxu0 %v444_v46 }
  0x21   :  { %160 = vmatpush.bf16.msra.mxu1 %v448_v49 }
  0x22   :  { %371 = vmatpush.bf16.msra.mxu2 %v587_v6 }
  0x23   :  { %132 = vmatmul.bf16.vlgmr.msra.gmra.mxu0 %v24_v50  ;;  %400 = vmatpush.bf16.msra.mxu3 %v595_v7 }
  0x24   :  { %161 = vmatmul.bf16.vlgmr.msra.gmra.mxu1 %v24_v50 }
  0x26   :  { %372 = vmatpush.bf16.msra.mxu2 %v586_v8 }
  0x27   :  { %401 = vmatpush.bf16.msra.mxu3 %v594_v9 }
  0x2a   :  { %373 = vmatpush.bf16.msra.mxu2 %v585_v10 }
  0x2b   :  { %402 = vmatpush.bf16.msra.mxu3 %v593_v11 }
  0x33   :  { %137 = vmatmul.bf16.gmra.mxu0 %v25_v53 }
  0x34   :  { %166 = vmatmul.bf16.gmra.mxu1 %v25_v53 }
  0x43   :  { %142 = vmatmul.bf16.gmra.mxu0 %v26_v0 }
  0x44   :  { %171 = vmatmul.bf16.gmra.mxu1 %v26_v0 }
  0x53   :  { %147 = vmatmul.bf16.gmra.mxu0 %v27_v3 }
  0x54   :  { %176 = vmatmul.bf16.gmra.mxu1 %v27_v3 }
  0xa0   :  { %v133_v12 = vpop.f32.mrf.mxu0 }
  0xa1   :  { %v162_v13 = vpop.f32.mrf.mxu1 }
  0xa2   :  { %v182_v14 = vpack.c.bf16 %v162_v13, %v133_v12 }
  0xa4   :  { %190 = vst [vmem:[%s853_s3] sm:$0xff] %v182_v14  ;;  %v238_v18 = vunpack.c.l.b16 %v182_v14  ;;  %v239_v20 = vunpack.c.h.b16 %v182_v14 }
  0xa8   :  { %v135_v15 = vpop.f32.mrf.mxu0 }
  0xa9   :  { %v164_v16 = vpop.f32.mrf.mxu1 }
  0xaa   :  { %v183_v17 = vpack.c.bf16 %v164_v16, %v135_v15 }
  0xac   :  { %191 = vst [vmem:[%s853_s3 + $0x8] sm:$0xff] %v183_v17  ;;  %v240_v19 = vunpack.c.l.b16 %v183_v17  ;;  %v241_v21 = vunpack.c.h.b16 %v183_v17 }
  0xae   :  { %v254_v22 = vpack.c.b16 %v240_v19, %v238_v18  ;;  %v255_v23 = vpack.c.b16 %v241_v21, %v239_v20 }
  0xb0   :  { %374 = vmatmul.bf16.vlgmr.msra.gmra.mxu2 %v254_v22  ;;  %403 = vmatmul.bf16.vlgmr.msra.gmra.mxu3 %v255_v23  ;;  %v138_v24 = vpop.f32.mrf.mxu0 }
  0xb1   :  { %v167_v25 = vpop.f32.mrf.mxu1 }
  0xb2   :  { %v184_v26 = vpack.c.bf16 %v167_v25, %v138_v24 }
  0xb4   :  { %192 = vst [vmem:[%s853_s3 + $0x10] sm:$0xff] %v184_v26  ;;  %v242_v30 = vunpack.c.l.b16 %v184_v26  ;;  %v243_v32 = vunpack.c.h.b16 %v184_v26 }
  0xb8   :  { %v140_v27 = vpop.f32.mrf.mxu0 }
  0xb9   :  { %v169_v28 = vpop.f32.mrf.mxu1 }
  0xba   :  { %v185_v29 = vpack.c.bf16 %v169_v28, %v140_v27 }
  0xbc   :  { %193 = vst [vmem:[%s853_s3 + $0x18] sm:$0xff] %v185_v29  ;;  %v244_v31 = vunpack.c.l.b16 %v185_v29  ;;  %v245_v33 = vunpack.c.h.b16 %v185_v29 }
  0xbe   :  { %v256_v34 = vpack.c.b16 %v244_v31, %v242_v30  ;;  %v257_v35 = vpack.c.b16 %v245_v33, %v243_v32 }
  0xc0   :  { %379 = vmatmul.bf16.gmra.mxu2 %v256_v34  ;;  %408 = vmatmul.bf16.gmra.mxu3 %v257_v35  ;;  %v143_v36 = vpop.f32.mrf.mxu0 }
  0xc1   :  { %v172_v37 = vpop.f32.mrf.mxu1 }
  0xc2   :  { %v186_v38 = vpack.c.bf16 %v172_v37, %v143_v36 }
  0xc4   :  { %194 = vst [vmem:[%s853_s3 + $0x20] sm:$0xff] %v186_v38  ;;  %v246_v42 = vunpack.c.l.b16 %v186_v38  ;;  %v247_v44 = vunpack.c.h.b16 %v186_v38 }
  0xc8   :  { %v145_v39 = vpop.f32.mrf.mxu0 }
  0xc9   :  { %v174_v40 = vpop.f32.mrf.mxu1 }
  0xca   :  { %v187_v41 = vpack.c.bf16 %v174_v40, %v145_v39 }
  0xcc   :  { %195 = vst [vmem:[%s853_s3 + $0x28] sm:$0xff] %v187_v41  ;;  %v248_v43 = vunpack.c.l.b16 %v187_v41  ;;  %v249_v45 = vunpack.c.h.b16 %v187_v41 }
  0xce   :  { %v258_v46 = vpack.c.b16 %v248_v43, %v246_v42  ;;  %v259_v47 = vpack.c.b16 %v249_v45, %v247_v44 }
  0xd0   :  { %384 = vmatmul.bf16.gmra.mxu2 %v258_v46  ;;  %413 = vmatmul.bf16.gmra.mxu3 %v259_v47  ;;  %v148_v48 = vpop.f32.mrf.mxu0 }
  0xd1   :  { %v177_v49 = vpop.f32.mrf.mxu1 }
  0xd2   :  { %v188_v50 = vpack.c.bf16 %v177_v49, %v148_v48 }
  0xd4   :  { %196 = vst [vmem:[%s853_s3 + $0x30] sm:$0xff] %v188_v50  ;;  %v250_v54 = vunpack.c.l.b16 %v188_v50  ;;  %v251_v56 = vunpack.c.h.b16 %v188_v50 }
  0xd8   :  { %v150_v51 = vpop.f32.mrf.mxu0 }
  0xd9   :  { %v179_v52 = vpop.f32.mrf.mxu1 }
  0xda   :  { %v189_v53 = vpack.c.bf16 %v179_v52, %v150_v51 }
  0xdc   :  { %197 = vst [vmem:[%s853_s3 + $0x38] sm:$0xff] %v189_v53  ;;  %v252_v55 = vunpack.c.l.b16 %v189_v53  ;;  %v253_v57 = vunpack.c.h.b16 %v189_v53 }
  0xde   :  { %v260_v58 = vpack.c.b16 %v252_v55, %v250_v54  ;;  %v261_v59 = vpack.c.b16 %v253_v57, %v251_v56 }
  0xe0   :  { %389 = vmatmul.bf16.gmra.mxu2 %v260_v58  ;;  %418 = vmatmul.bf16.gmra.mxu3 %v261_v59 }
 0x133   :  { %v375_v60 = vpop.f32.mrf.mxu2  ;;  %v404_v61 = vpop.f32.mrf.mxu3 }
 0x134   :  { %v405_v62 = vadd.f32 %v404_v61, %v375_v60 }
 0x136   :  { %425 = vst.msk [vmem:[%s854_s4] sm:$0xff] %vm424_vm0, %v405_v62 }
 0x13b   :  { %v377_v63 = vpop.f32.mrf.mxu2  ;;  %v406_v0 = vpop.f32.mrf.mxu3 }
 0x13c   :  { %v407_v1 = vadd.f32 %v406_v0, %v377_v63 }
 0x13e   :  { %426 = vst.msk [vmem:[%s854_s4 + $0x8] sm:$0xff] %vm424_vm0, %v407_v1 }
 0x143   :  { %v380_v2 = vpop.f32.mrf.mxu2  ;;  %v409_v3 = vpop.f32.mrf.mxu3 }
 0x144   :  { %v410_v4 = vadd.f32 %v409_v3, %v380_v2 }
 0x146   :  { %427 = vst.msk [vmem:[%s854_s4 + $0x10] sm:$0xff] %vm424_vm0, %v410_v4 }
 0x14b   :  { %v382_v5 = vpop.f32.mrf.mxu2  ;;  %v411_v6 = vpop.f32.mrf.mxu3 }
 0x14c   :  { %v412_v7 = vadd.f32 %v411_v6, %v382_v5 }
 0x14e   :  { %428 = vst.msk [vmem:[%s854_s4 + $0x18] sm:$0xff] %vm424_vm0, %v412_v7 }
 0x153   :  { %v385_v8 = vpop.f32.mrf.mxu2  ;;  %v414_v9 = vpop.f32.mrf.mxu3 }
 0x154   :  { %v415_v10 = vadd.f32 %v414_v9, %v385_v8 }
 0x156   :  { %429 = vst.msk [vmem:[%s854_s4 + $0x20] sm:$0xff] %vm424_vm0, %v415_v10 }
 0x15b   :  { %v387_v11 = vpop.f32.mrf.mxu2  ;;  %v416_v12 = vpop.f32.mrf.mxu3 }
 0x15c   :  { %v417_v13 = vadd.f32 %v416_v12, %v387_v11 }
 0x15e   :  { %430 = vst.msk [vmem:[%s854_s4 + $0x28] sm:$0xff] %vm424_vm0, %v417_v13 }
 0x163   :  { %v390_v14 = vpop.f32.mrf.mxu2  ;;  %v419_v15 = vpop.f32.mrf.mxu3 }
 0x164   :  { %v420_v16 = vadd.f32 %v419_v15, %v390_v14 }
 0x166   :  { %431 = vst.msk [vmem:[%s854_s4 + $0x30] sm:$0xff] %vm424_vm0, %v420_v16 }
 0x16b   :  { %v392_v17 = vpop.f32.mrf.mxu2  ;;  %v421_v18 = vpop.f32.mrf.mxu3 }
 0x16c   :  { %v422_v19 = vadd.f32 %v421_v18, %v392_v17 }
 0x16e   :  { %432 = vst.msk [vmem:[%s854_s4 + $0x38] sm:$0xff] %vm424_vm0, %v422_v19 }

// kernel: gat_forward.3
= control target key start
LH: loop header
LB: loop body
LE: loop exit
PB: predicated region body
PF: predicated region fallthrough
CT: control target
= control target key end

     0   :  { %v1869_v0 = vmov 1   ;;  %v1871_v1 = vmov 0   ;;  %vm158_vm0 = vcmask 523264   ;;  %vm25_vm1 = vcmask 15360   ;;  %s1863_s0 = inlined_call_operand.vmem [shape: f32[64,2], index: 0, kind: input, shape index: {}]   ;;  %s1864_s1 = inlined_call_operand.vmem [shape: f32[2,64], index: 1, kind: input, shape index: {}]   ;;  %s1865_s3 = inlined_call_operand.vmem [shape: bf16[64,256], index: 3, kind: input, shape index: {}]   ;;  %s1866_s2 = inlined_call_operand.vmem [shape: s8[64,64], index: 2, kind: input, shape index: {}]   ;;  %s1867_s4 = inlined_call_operand.vmem [shape: f32[1,128], index: 4, kind: input, shape index: {}]   ;;  %s1868_s5 = inlined_call_operand.vmem [shape: f32[64,128], index: 5, kind: output, shape index: {}]  }
   0x1   :  { %1151 = vset.pattern.permute.xlu0 %v1869_v0  ;;  %1148 = vset.pattern.permute.xlu1 %v1871_v1  ;;  %v60_v2 = vld [vmem:[%s1863_s0 + $0x10] sm:$0xff]  ;;  %v59_v3 = vld [vmem:[%s1863_s0 + $0x8] sm:$0xff]  ;;  %v62_v4 = vld [vmem:[%s1863_s0 + $0x20] sm:$0xff]  ;;  %v1252_v63 = vmov -1e+30   ;;  %vm335_vm2 = vcmask 7168  }
   0x2   :  { %97 = vperm.xlu1 %1148, %v60_v2   ;;  %506 = vperm.xlu0 %1151, %v59_v3   ;;  %v64_v5 = vld [vmem:[%s1863_s0 + $0x30] sm:$0xff]  ;;  %v61_v6 = vld [vmem:[%s1863_s0 + $0x18] sm:$0xff]  ;;  %v63_v7 = vld [vmem:[%s1863_s0 + $0x28] sm:$0xff]  ;;  %28 = vst.msk [vmem:[#allocation2 + $0x10] sm:$0xff] %vm25_vm1, %v1252_v63  ;;  %vm742_vm3 = vcmask 15368  }
   0x3   :  { %1149 = vset.pattern.permute.xlu2 %v1871_v1  ;;  %v65_v8 = vld [vmem:[%s1863_s0 + $0x38] sm:$0xff]  ;;  %v58_v9 = vld [vmem:[%s1863_s0] sm:$0xff]  ;;  %26 = vst.msk [vmem:[#allocation2] sm:$0xff] %vm25_vm1, %v1252_v63 }
   0x4   :  { %107 = vperm.xlu2 %1149, %v62_v4   ;;  %v66_v10 = vld [vmem:[%s1864_s1] sm:$0x3]  ;;  %27 = vst.msk [vmem:[#allocation2 + $0x8] sm:$0xff] %vm25_vm1, %v1252_v63 }
   0x5   :  { %v125_v11 = vperm.slane %v66_v10, 0  ;;  %v1335_v40 = vperm.slane %v66_v10, 1  ;;  %29 = vst.msk [vmem:[#allocation2 + $0x18] sm:$0xff] %vm25_vm1, %v1252_v63 }
   0x6   :  { %30 = vst.msk [vmem:[#allocation2 + $0x20] sm:$0xff] %vm25_vm1, %v1252_v63 }
   0x7   :  { %31 = vst.msk [vmem:[#allocation2 + $0x28] sm:$0xff] %vm25_vm1, %v1252_v63 }
   0x8   :  { %32 = vst.msk [vmem:[#allocation2 + $0x30] sm:$0xff] %vm25_vm1, %v1252_v63 }
   0x9   :  { %33 = vst.msk [vmem:[#allocation2 + $0x38] sm:$0xff] %vm25_vm1, %v1252_v63 }
   0xa   :  { %526 = vperm.xlu0 %1151, %v64_v5   ;;  %102 = vperm.xlu1 %1148, %v61_v6  }
   0xc   :  { %112 = vperm.xlu2 %1149, %v63_v7  }
  0x12   :  { %1153 = vset.pattern.permute.xlu0 %v1871_v1  ;;  %122 = vperm.xlu1 %1148, %v65_v8  }
  0x13   :  { %87 = vperm.xlu0 %1153, %v58_v9  }
  0x14   :  { %1150 = vset.pattern.permute.xlu2 %v1869_v0 }
  0x15   :  { %502 = vperm.xlu2 %1150, %v58_v9  }
  0x1a   :  { %1152 = vset.pattern.permute.xlu1 %v1869_v0 }
  0x1b   :  { %92 = vperm.xlu0 %1153, %v59_v3   ;;  %510 = vperm.xlu1 %1152, %v60_v2  }
  0x1d   :  { %518 = vperm.xlu2 %1150, %v62_v4  }
  0x23   :  { %117 = vperm.xlu0 %1153, %v64_v5   ;;  %522 = vperm.xlu1 %1152, %v63_v7  }
  0x25   :  { %514 = vperm.xlu2 %1150, %v61_v6  }
  0x2b   :  { %530 = vperm.xlu1 %1152, %v65_v8  }
  0x2d   :  { %1155 = vset.pattern.permute.xlu2 %v1871_v1 }
  0x33   :  { %1154 = vset.pattern.permute.xlu1 %v1871_v1 }
  0x5e   :  { %v108_v14 = vpop.permute.xlu2 %107 }
  0x5f   :  { %v130_v37 = vadd.f32 %v125_v11, %v108_v14 }
  0x61   :  { %v138_v44 = vmul.f32 0.2, %v130_v37 }
  0x63   :  { %v1345_v53 = vmax.f32 %v130_v37, %v138_v44  ;;  %v1426_v44 = vld [vmem:[#allocation2 + $0x18] sm:$0xff] }
  0x65   :  { %v171_v61 = vsel %vm158_vm0, %v1345_v53, -inf }
  0x66   :  { %v113_v21 = vpop.permute.xlu2 %112 }
  0x67   :  { %v131_v34 = vadd.f32 %v125_v11, %v113_v21 }
  0x69   :  { %v139_v41 = vmul.f32 0.2, %v131_v34 }
  0x6b   :  { %v1343_v51 = vmax.f32 %v131_v34, %v139_v41 }
  0x6d   :  { %v174_v57 = vsel %vm158_vm0, %v1343_v51, -inf }
  0x6f   :  { %v503_v27 = vpop.permute.xlu2 %502 }
  0x70   :  { %v534_v5 = vadd.f32 %v1335_v40, %v503_v27 }
  0x74   :  { %v98_v12 = vpop.permute.xlu1 %97  ;;  %v1319_v13 = vpop.permute.xlu0 %506 }
  0x75   :  { %v128_v15 = vadd.f32 %v125_v11, %v98_v12 }
  0x77   :  { %v136_v16 = vmul.f32 0.2, %v128_v15  ;;  %v519_v39 = vpop.permute.xlu2 %518 }
  0x78   :  { %v538_v49 = vadd.f32 %v1335_v40, %v519_v39 }
  0x79   :  { %v1321_v17 = vmax.f32 %v128_v15, %v136_v16 }
  0x7a   :  { %v546_v56 = vmul.f32 0.2, %v538_v49 }
  0x7b   :  { %v165_v18 = vsel %vm158_vm0, %v1321_v17, -inf }
  0x7c   :  { %166 = vmax.xlane.f32.xlu1 %v165_v18  ;;  %v1325_v19 = vpop.permute.xlu0 %526  ;;  %v103_v20 = vpop.permute.xlu1 %102  ;;  %v1360_v4 = vmax.f32 %v538_v49, %v546_v56  ;;  %v154_v56 = vld [vmem:[#allocation2 + $0x20] sm:$0xff] }
  0x7d   :  { %v129_v25 = vadd.f32 %v125_v11, %v103_v20  ;;  %v535_v20 = vadd.f32 %v1335_v40, %v1319_v13  ;;  %v540_v13 = vadd.f32 %v1335_v40, %v1325_v19  ;;  %v1412_v19 = vld [vmem:[#allocation2 + $0x10] sm:$0xff] }
  0x7e   :  { %v578_v10 = vsel %vm158_vm0, %v1360_v4, -inf }
  0x7f   :  { %v137_v29 = vmul.f32 0.2, %v129_v25  ;;  %v515_v60 = vpop.permute.xlu2 %514 }
  0x80   :  { %v537_v3 = vadd.f32 %v1335_v40, %v515_v60 }
  0x81   :  { %v1331_v36 = vmax.f32 %v129_v25, %v137_v29  ;;  %v543_v25 = vmul.f32 0.2, %v535_v20 }
  0x82   :  { %v545_v9 = vmul.f32 0.2, %v537_v3 }
  0x83   :  { %v168_v43 = vsel %vm158_vm0, %v1331_v36, -inf  ;;  %v1397_v29 = vmax.f32 %v535_v20, %v543_v25 }
  0x84   :  { %v123_v23 = vpop.permute.xlu1 %122  ;;  %v1381_v18 = vmax.f32 %v537_v3, %v545_v9  ;;  %v1463_v3 = vld [vmem:[#allocation2 + $0x38] sm:$0xff] }
  0x85   :  { %v88_v22 = vpop.permute.xlu0 %87  ;;  %v133_v52 = vadd.f32 %v125_v11, %v123_v23 }
  0x86   :  { %v126_v24 = vadd.f32 %v125_v11, %v88_v22 }
  0x87   :  { %v141_v59 = vmul.f32 0.2, %v133_v52 }
  0x88   :  { %v134_v26 = vmul.f32 0.2, %v126_v24 }
  0x89   :  { %v1364_v6 = vmax.f32 %v133_v52, %v141_v59  ;;  %v1444_v52 = vld [vmem:[#allocation2 + $0x30] sm:$0xff] }
  0x8a   :  { %v1327_v28 = vmax.f32 %v126_v24, %v134_v26  ;;  %v575_v24 = vsel %vm158_vm0, %v1381_v18, -inf }
  0x8b   :  { %v180_v14 = vsel %vm158_vm0, %v1364_v6, -inf }
  0x8c   :  { %v159_v30 = vsel %vm158_vm0, %v1327_v28, -inf }
  0x8d   :  { %v93_v31 = vpop.permute.xlu0 %92  ;;  %160 = vmax.xlane.f32.xlu2 %v159_v30  ;;  %v511_v32 = vpop.permute.xlu1 %510 }
  0x8e   :  { %v127_v33 = vadd.f32 %v125_v11, %v93_v31  ;;  %v536_v2 = vadd.f32 %v1335_v40, %v511_v32  ;;  %v548_v31 = vmul.f32 0.2, %v540_v13  ;;  %v569_v32 = vsel %vm158_vm0, %v1397_v29, -inf }
  0x90   :  { %v135_v35 = vmul.f32 0.2, %v127_v33  ;;  %v544_v8 = vmul.f32 0.2, %v536_v2 }
  0x92   :  { %v1333_v38 = vmax.f32 %v127_v33, %v135_v35  ;;  %v1379_v16 = vmax.f32 %v536_v2, %v544_v8  ;;  %v1403_v33 = vmax.f32 %v540_v13, %v548_v31  ;;  %v1253_v35 = vmov 0.0  }
  0x93   :  { %36 = vst.msk [vmem:[#allocation3 + $0x10] sm:$0xff] %vm25_vm1, %v1253_v35 }
  0x94   :  { %v162_v42 = vsel %vm158_vm0, %v1333_v38, -inf  ;;  %v572_v23 = vsel %vm158_vm0, %v1379_v16, -inf  ;;  %v584_v34 = vsel %vm158_vm0, %v1403_v33, -inf  ;;  %34 = vst.msk [vmem:[#allocation3] sm:$0xff] %vm25_vm1, %v1253_v35 }
  0x95   :  { %163 = vmax.xlane.f32.xlu0 %v162_v42  ;;  %v118_v45 = vpop.permute.xlu0 %117  ;;  %169 = vmax.xlane.f32.xlu2 %v168_v43  ;;  %v523_v46 = vpop.permute.xlu1 %522  ;;  %35 = vst.msk [vmem:[#allocation3 + $0x8] sm:$0xff] %vm25_vm1, %v1253_v35  ;;  %v1424_v43 = vld [vmem:[#allocation2 + $0x8] sm:$0xff] }
  0x96   :  { %v132_v47 = vadd.f32 %v125_v11, %v118_v45  ;;  %v539_v48 = vadd.f32 %v1335_v40, %v523_v46  ;;  %v542_v11 = vmul.f32 0.2, %v534_v5  ;;  %37 = vst.msk [vmem:[#allocation3 + $0x18] sm:$0xff] %vm25_vm1, %v1253_v35 }
  0x97   :  { %38 = vst.msk [vmem:[#allocation3 + $0x20] sm:$0xff] %vm25_vm1, %v1253_v35 }
  0x98   :  { %v140_v50 = vmul.f32 0.2, %v132_v47  ;;  %v547_v54 = vmul.f32 0.2, %v539_v48  ;;  %v1385_v21 = vmax.f32 %v534_v5, %v542_v11  ;;  %39 = vst.msk [vmem:[#allocation3 + $0x28] sm:$0xff] %vm25_vm1, %v1253_v35 }
  0x99   :  { %40 = vst.msk [vmem:[#allocation3 + $0x30] sm:$0xff] %vm25_vm1, %v1253_v35 }
  0x9a   :  { %v1347_v55 = vmax.f32 %v132_v47, %v140_v50  ;;  %v1355_v62 = vmax.f32 %v539_v48, %v547_v54  ;;  %v566_v26 = vsel %vm158_vm0, %v1385_v21, -inf  ;;  %41 = vst.msk [vmem:[#allocation3 + $0x38] sm:$0xff] %vm25_vm1, %v1253_v35  ;;  %v1446_v54 = vld [vmem:[#allocation2 + $0x28] sm:$0xff] }
  0x9c   :  { %v177_v58 = vsel %vm158_vm0, %v1347_v55, -inf  ;;  %v581_v7 = vsel %vm158_vm0, %v1355_v62, -inf }
  0x9d   :  { %175 = vmax.xlane.f32.xlu0 %v174_v57  ;;  %178 = vmax.xlane.f32.xlu1 %v177_v58  ;;  %v531_v12 = vpop.permute.xlu1 %530 }
  0x9e   :  { %172 = vmax.xlane.f32.xlu2 %v171_v61  ;;  %v541_v15 = vadd.f32 %v1335_v40, %v531_v12  ;;  %v150_v40 = vld [vmem:[#allocation2] sm:$0xff] }
  0xa0   :  { %v549_v22 = vmul.f32 0.2, %v541_v15 }
  0xa2   :  { %v1393_v27 = vmax.f32 %v541_v15, %v549_v22 }
  0xa4   :  { %v587_v30 = vsel %vm158_vm0, %v1393_v27, -inf }
  0xa5   :  { %582 = vmax.xlane.f32.xlu1 %v581_v7  ;;  %579 = vmax.xlane.f32.xlu0 %v578_v10 }
  0xa6   :  { %181 = vmax.xlane.f32.xlu2 %v180_v14 }
  0xad   :  { %573 = vmax.xlane.f32.xlu0 %v572_v23  ;;  %576 = vmax.xlane.f32.xlu1 %v575_v24 }
  0xae   :  { %567 = vmax.xlane.f32.xlu2 %v566_v26 }
  0xb5   :  { %588 = vmax.xlane.f32.xlu0 %v587_v30 }
  0xb6   :  { %570 = vmax.xlane.f32.xlu2 %v569_v32 }
  0xbe   :  { %585 = vmax.xlane.f32.xlu2 %v584_v34 }
  0xef   :  { %v167_v37 = vpop.xlane.xlu1 %166 }
  0xf0   :  { %v1418_v39 = vmax.f32 %v1412_v19, %v167_v37  ;;  %v1114_v37 = vld [vmem:[%s1865_s3 + $0x14] sm:$0xf] }
  0xf2   :  { %495 = vst.msk [vmem:[#allocation2 + $0x10] sm:$0xff] %vm335_vm2, %v1418_v39  ;;  %203 = vperm.xlu2 %1155, %v1418_v39  }
  0xf9   :  { %v1491_v23 = vld [vmem:[#allocation2 + $0x10] sm:$0xff] }
 0x100   :  { %v161_v41 = vpop.xlane.xlu2 %160 }
 0x101   :  { %v183_v42 = vmax.f32 %v150_v40, %v161_v41  ;;  %v265_v41 = vsub.f32 %v1412_v19, %v1418_v39 }
 0x103   :  { %493 = vst.msk [vmem:[#allocation2] sm:$0xff] %vm335_vm2, %v183_v42  ;;  %193 = vperm.xlu0 %1153, %v183_v42   ;;  %v263_v20 = vsub.f32 %v150_v40, %v183_v42 }
 0x105   :  { %v271_v35 = vmul.f32 1.442695, %v263_v20  ;;  %v1133_v20 = vld [vmem:[%s1865_s3 + $0x18] sm:$0xf0] }
 0x107   :  { %1170 = vpow2.f32 %v271_v35 }
 0x108   :  { %v164_v45 = vpop.xlane.xlu0 %163  ;;  %v170_v46 = vpop.xlane.xlu2 %169 }
 0x109   :  { %v1429_v47 = vmax.f32 %v1424_v43, %v164_v45  ;;  %v1432_v48 = vmax.f32 %v1426_v44, %v170_v46 }
 0x10a   :  { %v558_v31 = vld [vmem:[#allocation2] sm:$0xff] }
 0x10b   :  { %v264_v49 = vsub.f32 %v1424_v43, %v1429_v47  ;;  %494 = vst.msk [vmem:[#allocation2 + $0x8] sm:$0xff] %vm335_vm2, %v1429_v47  ;;  %198 = vperm.xlu1 %1154, %v1429_v47   ;;  %208 = vperm.xlu0 %1153, %v1432_v48   ;;  %v1874_v47 = vsub.f32 %v1426_v44, %v1432_v48 }
 0x10c   :  { %496 = vst.msk [vmem:[#allocation2 + $0x18] sm:$0xff] %vm335_vm2, %v1432_v48 }
 0x110   :  { %v179_v57 = vpop.xlane.xlu1 %178  ;;  %v176_v58 = vpop.xlane.xlu0 %175 }
 0x111   :  { %v1449_v59 = vmax.f32 %v1444_v52, %v179_v57  ;;  %v1452_v60 = vmax.f32 %v1446_v54, %v176_v58  ;;  %v173_v61 = vpop.xlane.xlu2 %172 }
 0x112   :  { %v187_v63 = vmax.f32 %v154_v56, %v173_v61  ;;  %v1519_v58 = vld [vmem:[#allocation2 + $0x8] sm:$0xff] }
 0x113   :  { %499 = vst.msk [vmem:[#allocation2 + $0x30] sm:$0xff] %vm335_vm2, %v1449_v59  ;;  %223 = vperm.xlu2 %1155, %v1449_v59   ;;  %218 = vperm.xlu0 %1153, %v1452_v60   ;;  %v1493_v26 = vld [vmem:[#allocation2 + $0x18] sm:$0xff]  ;;  %v1877_v44 = vsub.f32 %v1444_v52, %v1449_v59 }
 0x114   :  { %498 = vst.msk [vmem:[#allocation2 + $0x28] sm:$0xff] %vm335_vm2, %v1452_v60  ;;  %213 = vperm.xlu1 %1154, %v187_v63   ;;  %v267_v42 = vsub.f32 %v154_v56, %v187_v63  ;;  %v1534_v56 = vpop.eup %1170 }
 0x115   :  { %497 = vst.msk [vmem:[#allocation2 + $0x20] sm:$0xff] %vm335_vm2, %v187_v63  ;;  %v268_v63 = vsub.f32 %v1446_v54, %v1452_v60  ;;  %v283_v48 = vmul.f32 1.442695, %v1877_v44 }
 0x118   :  { %v583_v5 = vpop.xlane.xlu1 %582  ;;  %v580_v7 = vpop.xlane.xlu0 %579 }
 0x119   :  { %v182_v8 = vpop.xlane.xlu2 %181 }
 0x11a   :  { %v1466_v9 = vmax.f32 %v1463_v3, %v182_v8  ;;  %v279_v8 = vmul.f32 1.442695, %v267_v42 }
 0x11b   :  { %v1468_v10 = vld [vmem:[#allocation2 + $0x28] sm:$0xff]  ;;  %1158 = vset.pattern.permute.xlu0 %v1869_v0  ;;  %1157 = vset.pattern.permute.xlu2 %v1869_v0 }
 0x11c   :  { %v1473_v11 = vmax.f32 %v1468_v10, %v583_v5  ;;  %v1475_v12 = vld [vmem:[#allocation2 + $0x20] sm:$0xff]  ;;  %500 = vst.msk [vmem:[#allocation2 + $0x38] sm:$0xff] %vm335_vm2, %v1466_v9  ;;  %228 = vperm.xlu1 %1154, %v1466_v9   ;;  %v275_v5 = vmul.f32 1.442695, %v265_v41 }
 0x11d   :  { %v1481_v14 = vmax.f32 %v1475_v12, %v580_v7 }
 0x11e   :  { %v675_v15 = vsub.f32 %v1468_v10, %v1473_v11  ;;  %906 = vst.msk [vmem:[#allocation2 + $0x28] sm:$0xff] %vm742_vm3, %v1473_v11  ;;  %1172 = vpow2.f32 %v275_v5  ;;  %v1131_v5 = vld [vmem:[%s1865_s3 + $0x34] sm:$0xf0] }
 0x11f   :  { %905 = vst.msk [vmem:[#allocation2 + $0x20] sm:$0xff] %vm742_vm3, %v1481_v14  ;;  %1174 = vpow2.f32 %v279_v8 }
 0x120   :  { %v574_v24 = vpop.xlane.xlu0 %573  ;;  %v577_v25 = vpop.xlane.xlu1 %576 }
 0x121   :  { %v1496_v13 = vmax.f32 %v1491_v23, %v574_v24  ;;  %v1499_v30 = vmax.f32 %v1493_v26, %v577_v25  ;;  %v568_v32 = vpop.xlane.xlu2 %567  ;;  %v270_v24 = vsub.f32 %v1463_v3, %v1466_v9 }
 0x122   :  { %v590_v34 = vmax.f32 %v558_v31, %v568_v32 }
 0x123   :  { %903 = vst.msk [vmem:[#allocation2 + $0x10] sm:$0xff] %vm742_vm3, %v1496_v13  ;;  %v673_v40 = vsub.f32 %v1493_v26, %v1499_v30  ;;  %610 = vperm.xlu0 %1158, %v1496_v13   ;;  %v1514_v46 = vld [vmem:[#allocation2 + $0x38] sm:$0xff]  ;;  %v285_v41 = vmul.f32 1.442695, %v270_v24  ;;  %v1130_v24 = vld [vmem:[%s1865_s3 + $0x24] sm:$0xf0] }
 0x124   :  { %904 = vst.msk [vmem:[#allocation2 + $0x18] sm:$0xff] %vm742_vm3, %v1499_v30  ;;  %1156 = vset.pattern.permute.xlu1 %v1869_v0  ;;  %v670_v19 = vsub.f32 %v558_v31, %v590_v34  ;;  %v1542_v31 = vld [vmem:[#allocation2 + $0x30] sm:$0xff]  ;;  %v1548_v42 = vpop.eup %1172 }
 0x125   :  { %901 = vst.msk [vmem:[#allocation2] sm:$0xff] %vm742_vm3, %v590_v34  ;;  %600 = vperm.xlu1 %1156, %v590_v34   ;;  %v281_v34 = vmul.f32 1.442695, %v268_v63  ;;  %v1555_v60 = vpop.eup %1174  ;;  %v1098_v63 = vld [vmem:[%s1865_s3 + $0x20] sm:$0xf] }
 0x126   :  { %v678_v25 = vmul.f32 1.442695, %v670_v19 }
 0x128   :  { %v589_v45 = vpop.xlane.xlu0 %588  ;;  %1176 = vpow2.f32 %v678_v25  ;;  %v1099_v25 = vor.u32 %v1130_v24, %v1098_v63 }
 0x129   :  { %v1517_v57 = vmax.f32 %v1514_v46, %v589_v45  ;;  %v571_v61 = vpop.xlane.xlu2 %570  ;;  %1178 = vpow2.f32 %v281_v34  ;;  %v1094_v34 = vld [vmem:[%s1865_s3 + $0x10] sm:$0xf] }
 0x12a   :  { %v1522_v7 = vmax.f32 %v1519_v58, %v571_v61  ;;  %1180 = vpow2.f32 %v285_v41  ;;  %v1102_v61 = vld [vmem:[%s1865_s3 + $0x30] sm:$0xf]  ;;  %v1129_v41 = vld [vmem:[%s1865_s3 + $0x14] sm:$0xf0] }
 0x12b   :  { %908 = vst.msk [vmem:[#allocation2 + $0x38] sm:$0xff] %vm742_vm3, %v1517_v57  ;;  %625 = vperm.xlu0 %1158, %v1473_v11   ;;  %v1103_v8 = vor.u32 %v1131_v5, %v1102_v61  ;;  %v1095_v61 = vor.u32 %v1129_v41, %v1094_v34 }
 0x12c   :  { %902 = vst.msk [vmem:[#allocation2 + $0x8] sm:$0xff] %vm742_vm3, %v1522_v7  ;;  %605 = vperm.xlu2 %1157, %v1522_v7  }
 0x12d   :  { %1159 = vset.pattern.permute.xlu1 %v1871_v1  ;;  %452 = vmatpush.bf16.msra.mxu0 %v1103_v8 }
 0x12e   :  { %362 = vperm.xlu1 %1159, %v1534_v56   ;;  %v1559_v3 = vpop.eup %1176  ;;  %1136 = vmatpush.bf16.msra.mxu2 %v1103_v8  ;;  %v67_v8 = vld [vmem:[%s1866_s2] sm:$0xff] }
 0x12f   :  { %v1562_v9 = vpop.eup %1178  ;;  %v71_v24 = vunpack.c.2.s8 %v67_v8 }
 0x130   :  { %v1564_v45 = vpop.eup %1180 }
 0x131   :  { %v586_v32 = vpop.xlane.xlu2 %585  ;;  %453 = vmatpush.bf16.msra.mxu0 %v1099_v25 }
 0x132   :  { %v1545_v35 = vmax.f32 %v1542_v31, %v586_v32  ;;  %1137 = vmatpush.bf16.msra.mxu2 %v1099_v25  ;;  %v1601_v25 = vcvt.s32.f32 %v71_v24  ;;  %v69_v24 = vunpack.c.0.s8 %v67_v8 }
 0x133   :  { %615 = vperm.xlu0 %1158, %v1499_v30  }
 0x134   :  { %907 = vst.msk [vmem:[#allocation2 + $0x30] sm:$0xff] %vm742_vm3, %v1545_v35  ;;  %1160 = vset.pattern.permute.xlu2 %v1871_v1 }
 0x135   :  { %372 = vperm.xlu2 %1160, %v1548_v42   ;;  %454 = vmatpush.bf16.msra.mxu0 %v1095_v61 }
 0x136   :  { %382 = vperm.xlu1 %1159, %v1555_v60   ;;  %1138 = vmatpush.bf16.msra.mxu2 %v1095_v61 }
 0x13b   :  { %770 = vperm.xlu0 %1158, %v1559_v3  }
 0x13d   :  { %387 = vperm.xlu2 %1160, %v1562_v9  }
 0x13e   :  { %397 = vperm.xlu1 %1159, %v1564_v45  }
 0x145   :  { %1162 = vset.pattern.permute.xlu2 %v1869_v0 }
 0x146   :  { %1161 = vset.pattern.permute.xlu1 %v1869_v0  ;;  %630 = vperm.xlu2 %1162, %v1545_v35   ;;  %v1122_v0 = vld [vmem:[%s1865_s3 + $0x34] sm:$0xf] }
 0x147   :  { %620 = vperm.xlu1 %1161, %v1481_v14  }
 0x14c   :  { %v204_v19 = vpop.permute.xlu2 %203 }
 0x14d   :  { %v233_v32 = vsub.f32 %v1321_v17, %v204_v19  ;;  %v1090_v17 = vld [vmem:[%s1865_s3] sm:$0xf]  ;;  %v1128_v19 = vld [vmem:[%s1865_s3 + $0x4] sm:$0xf0] }
 0x14e   :  { %v1091_v63 = vor.u32 %v1128_v19, %v1090_v17 }
 0x14f   :  { %635 = vperm.xlu1 %1161, %v1517_v57   ;;  %v243_v5 = vmul.f32 1.442695, %v233_v32 }
 0x150   :  { %455 = vmatpush.bf16.msra.mxu0 %v1091_v63  ;;  %1139 = vmatpush.bf16.msra.mxu2 %v1091_v63 }
 0x151   :  { %1182 = vpow2.f32 %v243_v5  ;;  %v1135_v5 = vld [vmem:[%s1865_s3 + $0x38] sm:$0xf0] }
 0x152   :  { %v1123_v17 = vor.u32 %v1135_v5, %v1122_v0  ;;  %v1621_v5 = vcvt.s32.f32 %v69_v24 }
 0x154   :  { %860 = vmatpush.bf16.msra.mxu1 %v1123_v17  ;;  %1140 = vmatpush.bf16.msra.mxu3 %v1123_v17 }
 0x157   :  { %v1183_v32 = vpop.eup %1182 }
 0x158   :  { %v1604_v34 = vmul.f32 %v1183_v32, %v1601_v25  ;;  %v1134_v32 = vld [vmem:[%s1865_s3 + $0x28] sm:$0xf0] }
 0x15a   :  { %v309_v63 = vsel %vm158_vm0, %v1604_v34, 0.0 }
 0x16d   :  { %v224_v54 = vpop.permute.xlu2 %223 }
 0x16e   :  { %v237_v17 = vsub.f32 %v1347_v55, %v224_v54 }
 0x170   :  { %v251_v55 = vmul.f32 1.442695, %v237_v17 }
 0x175   :  { %v194_v41 = vpop.permute.xlu0 %193 }
 0x176   :  { %v231_v61 = vsub.f32 %v1327_v28, %v194_v41  ;;  %v1118_v28 = vld [vmem:[%s1865_s3 + $0x24] sm:$0xf] }
 0x177   :  { %v1119_v41 = vor.u32 %v1134_v32, %v1118_v28  ;;  %v1115_v28 = vor.u32 %v1133_v20, %v1114_v37 }
 0x178   :  { %v239_v19 = vmul.f32 1.442695, %v231_v61 }
 0x179   :  { %310 = vadd.xlane.f32.xlu1 %v309_v63  ;;  %861 = vmatpush.bf16.msra.mxu1 %v1119_v41 }
 0x17a   :  { %1184 = vpow2.f32 %v239_v19  ;;  %1141 = vmatpush.bf16.msra.mxu3 %v1119_v41  ;;  %v1132_v41 = vld [vmem:[%s1865_s3 + $0x8] sm:$0xf0] }
 0x17d   :  { %v199_v0 = vpop.permute.xlu1 %198  ;;  %v209_v61 = vpop.permute.xlu0 %208  ;;  %862 = vmatpush.bf16.msra.mxu1 %v1115_v28 }
 0x17e   :  { %v232_v63 = vsub.f32 %v1333_v38, %v199_v0  ;;  %v234_v19 = vsub.f32 %v1331_v36, %v209_v61  ;;  %v70_v38 = vunpack.c.1.s8 %v67_v8  ;;  %v72_v36 = vunpack.c.3.s8 %v67_v8  ;;  %v1110_v0 = vld [vmem:[%s1865_s3 + $0x4] sm:$0xf]  ;;  %1142 = vmatpush.bf16.msra.mxu3 %v1115_v28  ;;  %v68_v8 = vld [vmem:[%s1866_s2 + $0x8] sm:$0xff] }
 0x17f   :  { %v1111_v20 = vor.u32 %v1132_v41, %v1110_v0  ;;  %v74_v50 = vunpack.c.1.s8 %v68_v8 }
 0x180   :  { %v1185_v32 = vpop.eup %1184  ;;  %v241_v24 = vmul.f32 1.442695, %v232_v63  ;;  %v245_v2 = vmul.f32 1.442695, %v234_v19  ;;  %v78_v61 = vcvt.s32.f32 %v70_v38  ;;  %v75_v38 = vunpack.c.2.s8 %v68_v8 }
 0x181   :  { %v255_v22 = vmul.f32 %v1185_v32, %v1621_v5  ;;  %863 = vmatpush.bf16.msra.mxu1 %v1111_v20 }
 0x182   :  { %1186 = vpow2.f32 %v241_v24  ;;  %v1644_v24 = vcvt.s32.f32 %v72_v36  ;;  %1143 = vmatpush.bf16.msra.mxu3 %v1111_v20 }
 0x183   :  { %1188 = vpow2.f32 %v245_v2  ;;  %v303_v37 = vsel %vm158_vm0, %v255_v22, 0.0 }
 0x184   :  { %304 = vadd.xlane.f32.xlu0 %v303_v37  ;;  %1190 = vpow2.f32 %v251_v55 }
 0x185   :  { %v219_v54 = vpop.permute.xlu0 %218 }
 0x186   :  { %v236_v63 = vsub.f32 %v1343_v51, %v219_v54  ;;  %v214_v19 = vpop.permute.xlu1 %213  ;;  %v606_v32 = vpop.permute.xlu2 %605  ;;  %v73_v54 = vunpack.c.0.s8 %v68_v8 }
 0x187   :  { %v235_v2 = vsub.f32 %v1345_v53, %v214_v19  ;;  %v639_v17 = vsub.f32 %v1397_v29, %v606_v32  ;;  %v1651_v29 = vcvt.s32.f32 %v75_v38 }
 0x188   :  { %v1187_v28 = vpop.eup %1186  ;;  %v249_v0 = vmul.f32 1.442695, %v236_v63  ;;  %v1654_v63 = vcvt.s32.f32 %v74_v50  ;;  %v1656_v32 = vcvt.s32.f32 %v73_v54 }
 0x189   :  { %v1189_v41 = vpop.eup %1188  ;;  %v247_v37 = vmul.f32 1.442695, %v235_v2  ;;  %v256_v1 = vmul.f32 %v1187_v28, %v78_v61  ;;  %v648_v39 = vmul.f32 1.442695, %v639_v17 }
 0x18a   :  { %1192 = vpow2.f32 %v249_v0  ;;  %v258_v51 = vmul.f32 %v1189_v41, %v1644_v24  ;;  %v1191_v20 = vpop.eup %1190 }
 0x18b   :  { %1194 = vpow2.f32 %v247_v37  ;;  %v306_v36 = vsel %vm158_vm0, %v256_v1, 0.0  ;;  %v408_v55 = vpack.c.bf16 %v256_v1, %v255_v22  ;;  %v261_v22 = vmul.f32 %v1191_v20, %v1651_v29 }
 0x18c   :  { %v312_v53 = vsel %vm158_vm0, %v258_v51, 0.0  ;;  %307 = vadd.xlane.f32.xlu2 %v306_v36  ;;  %1196 = vpow2.f32 %v648_v39  ;;  %v76_v37 = vunpack.c.3.s8 %v68_v8 }
 0x18d   :  { %313 = vadd.xlane.f32.xlu0 %v312_v53  ;;  %1104 = vmatmul.msk.bf16.vlgmr.msra.gmra.mxu0 %vm158_vm0, %v408_v55 }
 0x18e   :  { %v229_v19 = vpop.permute.xlu1 %228  ;;  %v1669_v20 = vcvt.s32.f32 %v76_v37 }
 0x18f   :  { %v238_v2 = vsub.f32 %v1364_v6, %v229_v19  ;;  %v1659_v17 = vpop.permute.xlu2 %372  ;;  %v321_v6 = vsel %vm158_vm0, %v261_v22, 0.0 }
 0x190   :  { %v1193_v1 = vpop.eup %1192 }
 0x191   :  { %v1195_v28 = vpop.eup %1194  ;;  %v253_v0 = vmul.f32 1.442695, %v238_v2  ;;  %v260_v38 = vmul.f32 %v1193_v1, %v1654_v63 }
 0x192   :  { %v259_v41 = vmul.f32 %v1195_v28, %v1656_v32  ;;  %v1197_v39 = vpop.eup %1196 }
 0x193   :  { %1198 = vpow2.f32 %v253_v0  ;;  %v318_v50 = vsel %vm158_vm0, %v260_v38, 0.0  ;;  %v663_v19 = vmul.f32 %v1197_v39, %v78_v61 }
 0x194   :  { %v315_v54 = vsel %vm158_vm0, %v259_v41, 0.0  ;;  %319 = vadd.xlane.f32.xlu1 %v318_v50  ;;  %v410_v36 = vpack.c.bf16 %v260_v38, %v259_v41 }
 0x195   :  { %316 = vadd.xlane.f32.xlu2 %v315_v54  ;;  %322 = vadd.xlane.f32.xlu0 %v321_v6  ;;  %v611_v55 = vpop.permute.xlu0 %610  ;;  %v713_v41 = vsel %vm158_vm0, %v663_v19, 0.0 }
 0x196   :  { %v640_v53 = vsub.f32 %v1379_v16, %v611_v55  ;;  %1106 = vmatmul.msk.bf16.vlgmr.msra.gmra.mxu2 %vm158_vm0, %v410_v36  ;;  %v409_v16 = vpack.c.bf16 %v258_v51, %v1604_v34 }
 0x197   :  { %v601_v8 = vpop.permute.xlu1 %600  ;;  %v1672_v0 = vpop.permute.xlu2 %387 }
 0x198   :  { %v650_v2 = vmul.f32 1.442695, %v640_v53  ;;  %v638_v1 = vsub.f32 %v1385_v21, %v601_v8 }
 0x199   :  { %v1199_v28 = vpop.eup %1198 }
 0x19a   :  { %1200 = vpow2.f32 %v650_v2  ;;  %v646_v50 = vmul.f32 1.442695, %v638_v1  ;;  %v262_v38 = vmul.f32 %v1199_v28, %v1669_v20 }
 0x19c   :  { %1202 = vpow2.f32 %v646_v50  ;;  %v324_v37 = vsel %vm158_vm0, %v262_v38, 0.0  ;;  %714 = vadd.xlane.f32.xlu1 %v713_v41  ;;  %v411_v8 = vpack.c.bf16 %v262_v38, %v261_v22 }
 0x19d   :  { %325 = vadd.xlane.f32.xlu2 %v324_v37  ;;  %v626_v61 = vpop.permute.xlu0 %625  ;;  %1105 = vmatmul.msk.bf16.gmra.mxu0 %vm158_vm0, %v409_v16 }
 0x19e   :  { %v643_v21 = vsub.f32 %v1355_v62, %v626_v61 }
 0x1a0   :  { %v1201_v39 = vpop.eup %1200  ;;  %v656_v54 = vmul.f32 1.442695, %v643_v21  ;;  %v1680_v6 = vpop.permute.xlu1 %362 }
 0x1a1   :  { %v664_v36 = vmul.f32 %v1201_v39, %v1601_v25  ;;  %v631_v53 = vpop.permute.xlu2 %630 }
 0x1a2   :  { %v1203_v55 = vpop.eup %1202  ;;  %1204 = vpow2.f32 %v656_v54  ;;  %v644_v62 = vsub.f32 %v1403_v33, %v631_v53 }
 0x1a3   :  { %v716_v34 = vsel %vm158_vm0, %v664_v36, 0.0  ;;  %v662_v51 = vmul.f32 %v1203_v55, %v1621_v5 }
 0x1a4   :  { %717 = vadd.xlane.f32.xlu0 %v716_v34  ;;  %v658_v22 = vmul.f32 1.442695, %v644_v62 }
 0x1a5   :  { %v616_v2 = vpop.permute.xlu0 %615  ;;  %v710_v1 = vsel %vm158_vm0, %v662_v51, 0.0  ;;  %v816_v28 = vpack.c.bf16 %v663_v19, %v662_v51  ;;  %v273_v51 = vmul.f32 1.442695, %v264_v49  ;;  %v277_v49 = vmul.f32 1.442695, %v1874_v47  ;;  %v294_v47 = vld [vmem:[#allocation3 + $0x38] sm:$0xff] }
 0x1a6   :  { %v641_v50 = vsub.f32 %v1381_v18, %v616_v2  ;;  %711 = vadd.xlane.f32.xlu2 %v710_v1  ;;  %1107 = vmatmul.msk.bf16.gmra.mxu2 %vm158_vm0, %v411_v8 }
 0x1a7   :  { %1124 = vmatmul.msk.bf16.vlgmr.msra.gmra.mxu1 %vm158_vm0, %v816_v28  ;;  %v1875_v28 = vmov 0  }
 0x1a8   :  { %v1205_v25 = vpop.eup %1204  ;;  %v652_v41 = vmul.f32 1.442695, %v641_v50  ;;  %v1690_v16 = vpop.permute.xlu1 %382 }
 0x1a9   :  { %v667_v5 = vmul.f32 %v1205_v25, %v1654_v63  ;;  %v684_v63 = vmul.f32 1.442695, %v673_v40  ;;  %v1878_v25 = vsub.f32 %v1514_v46, %v1517_v57  ;;  %v1880_v46 = vsub.f32 %v1542_v31, %v1545_v35  ;;  %v287_v31 = vld [vmem:[#allocation3] sm:$0xff] }
 0x1aa   :  { %1206 = vpow2.f32 %v652_v41  ;;  %v295_v35 = vmul.f32 %v1534_v56, %v287_v31  ;;  %v293_v56 = vld [vmem:[#allocation3 + $0x30] sm:$0xff] }
 0x1ab   :  { %v725_v38 = vsel %vm158_vm0, %v667_v5, 0.0  ;;  %1208 = vpow2.f32 %v658_v22  ;;  %v692_v41 = vmul.f32 1.442695, %v1878_v25  ;;  %v690_v57 = vmul.f32 1.442695, %v1880_v46 }
 0x1ac   :  { %726 = vadd.xlane.f32.xlu0 %v725_v38  ;;  %1210 = vpow2.f32 %v684_v63  ;;  %v289_v38 = vld [vmem:[#allocation3 + $0x10] sm:$0xff]  ;;  %v290_v63 = vld [vmem:[#allocation3 + $0x18] sm:$0xff] }
 0x1b0   :  { %v1207_v33 = vpop.eup %1206  ;;  %v1694_v19 = vpop.permute.xlu1 %397 }
 0x1b1   :  { %v665_v18 = vmul.f32 %v1207_v33, %v1644_v24  ;;  %v1209_v21 = vpop.eup %1208  ;;  %v297_v33 = vmul.f32 %v1548_v42, %v289_v38  ;;  %v288_v42 = vld [vmem:[#allocation3 + $0x8] sm:$0xff] }
 0x1b2   :  { %v668_v39 = vmul.f32 %v1209_v21, %v1651_v29  ;;  %v1708_v34 = vpop.eup %1210 }
 0x1b3   :  { %v719_v37 = vsel %vm158_vm0, %v665_v18, 0.0  ;;  %v817_v61 = vpack.c.bf16 %v665_v18, %v664_v36  ;;  %v688_v36 = vmul.f32 1.442695, %v675_v15 }
 0x1b4   :  { %720 = vadd.xlane.f32.xlu2 %v719_v37  ;;  %v728_v53 = vsel %vm158_vm0, %v668_v39, 0.0 }
 0x1b7   :  { %1125 = vmatmul.msk.bf16.gmra.mxu1 %vm158_vm0, %v817_v61 }
 0x1b9   :  { %v621_v54 = vpop.permute.xlu1 %620 }
 0x1ba   :  { %v642_v55 = vsub.f32 %v1360_v4, %v621_v54 }
 0x1bc   :  { %v654_v24 = vmul.f32 1.442695, %v642_v55  ;;  %729 = vadd.xlane.f32.xlu2 %v728_v53 }
 0x1be   :  { %1212 = vpow2.f32 %v654_v24 }
 0x1bf   :  { %1214 = vpow2.f32 %v688_v36 }
 0x1c0   :  { %785 = vperm.xlu0 %1158, %v1708_v34  }
 0x1c1   :  { %v636_v26 = vpop.permute.xlu1 %635 }
 0x1c2   :  { %v645_v30 = vsub.f32 %v1393_v27, %v636_v26  ;;  %v1873_v27 = vsub.f32 %v1519_v58, %v1522_v7  ;;  %v1876_v58 = vsub.f32 %v1475_v12, %v1481_v14  ;;  %v1879_v14 = vsub.f32 %v1491_v23, %v1496_v13  ;;  %v1757_v13 = vpop.permute.xlu0 %770  ;;  %v292_v26 = vld [vmem:[#allocation3 + $0x28] sm:$0xff] }
 0x1c4   :  { %v1213_v40 = vpop.eup %1212  ;;  %v660_v29 = vmul.f32 1.442695, %v645_v30  ;;  %v680_v8 = vmul.f32 1.442695, %v1873_v27  ;;  %v686_v7 = vmul.f32 1.442695, %v1876_v58 }
 0x1c5   :  { %v666_v4 = vmul.f32 %v1213_v40, %v1656_v32  ;;  %v1716_v10 = vpop.eup %1214  ;;  %v682_v52 = vmul.f32 1.442695, %v1879_v14  ;;  %v291_v30 = vld [vmem:[#allocation3 + $0x20] sm:$0xff]  ;;  %v300_v40 = vmul.f32 %v1562_v9, %v292_v26 }
 0x1c6   :  { %1216 = vpow2.f32 %v660_v29 }
 0x1c7   :  { %v722_v11 = vsel %vm158_vm0, %v666_v4, 0.0  ;;  %v818_v15 = vpack.c.bf16 %v667_v5, %v666_v4  ;;  %1218 = vpow2.f32 %v273_v51  ;;  %v299_v51 = vmul.f32 %v1555_v60, %v291_v30 }
 0x1c8   :  { %723 = vadd.xlane.f32.xlu1 %v722_v11  ;;  %795 = vperm.xlu0 %1158, %v1716_v10   ;;  %1220 = vpow2.f32 %v680_v8 }
 0x1c9   :  { %1126 = vmatmul.msk.bf16.vlgmr.msra.gmra.mxu3 %vm158_vm0, %v818_v15  ;;  %1222 = vpow2.f32 %v277_v49 }
 0x1ca   :  { %1224 = vpow2.f32 %v686_v7 }
 0x1cb   :  { %1226 = vpow2.f32 %v283_v48 }
 0x1cc   :  { %v1217_v32 = vpop.eup %1216  ;;  %1228 = vpow2.f32 %v692_v41 }
 0x1cd   :  { %v669_v43 = vmul.f32 %v1217_v32, %v1669_v20  ;;  %v1219_v1 = vpop.eup %1218  ;;  %1230 = vpow2.f32 %v682_v52 }
 0x1ce   :  { %v1733_v62 = vpop.eup %1220  ;;  %1232 = vpow2.f32 %v690_v57 }
 0x1cf   :  { %v731_v2 = vsel %vm158_vm0, %v669_v43, 0.0  ;;  %v819_v20 = vpack.c.bf16 %v669_v43, %v668_v39  ;;  %v1223_v50 = vpop.eup %1222  ;;  %v296_v39 = vmul.f32 %v1219_v1, %v288_v42 }
 0x1d0   :  { %732 = vadd.xlane.f32.xlu1 %v731_v2  ;;  %1163 = vset.pattern.permute.xlu0 %v1875_v28  ;;  %v1743_v12 = vpop.eup %1224  ;;  %v298_v54 = vmul.f32 %v1223_v50, %v290_v63  ;;  %v302_v2 = vmul.f32 %v1564_v45, %v294_v47 }
 0x1d1   :  { %367 = vperm.xlu0 %1163, %v1219_v1   ;;  %v1227_v59 = vpop.eup %1226 }
 0x1d2   :  { %v1749_v5 = vpop.eup %1228  ;;  %v301_v4 = vmul.f32 %v1227_v59, %v293_v56 }
 0x1d3   :  { %v1231_v22 = vpop.eup %1230 }
 0x1d4   :  { %775 = vperm.xlu2 %1162, %v1733_v62   ;;  %v1760_v37 = vpop.eup %1232 }
 0x1d9   :  { %1127 = vmatmul.msk.bf16.gmra.mxu3 %vm158_vm0, %v819_v20  ;;  %377 = vperm.xlu0 %1163, %v1223_v50  }
 0x1dc   :  { %790 = vperm.xlu2 %1162, %v1743_v12  }
 0x1e1   :  { %392 = vperm.xlu0 %1163, %v1227_v59  }
 0x1e4   :  { %805 = vperm.xlu2 %1162, %v1749_v5  }
 0x1e9   :  { %780 = vperm.xlu1 %1161, %v1231_v22  }
 0x1ec   :  { %v311_v18 = vpop.xlane.xlu1 %310  ;;  %1165 = vset.pattern.permute.xlu2 %v1875_v28 }
 0x1ed   :  { %v329_v23 = vadd.f32 %v311_v18, %v297_v33 }
 0x1ef   :  { %338 = vst.msk [vmem:[#allocation3 + $0x10] sm:$0xff] %vm335_vm2, %v329_v23 }
 0x1f1   :  { %800 = vperm.xlu1 %1161, %v1760_v37  }
 0x1f6   :  { %v696_v58 = vld [vmem:[#allocation3 + $0x10] sm:$0xff] }
 0x1f7   :  { %v305_v61 = vpop.xlane.xlu0 %304  ;;  %v704_v44 = vmul.f32 %v1231_v22, %v696_v58 }
 0x1f8   :  { %v327_v21 = vadd.f32 %v305_v61, %v295_v35 }
 0x1f9   :  { %1164 = vset.pattern.permute.xlu1 %v1875_v28 }
 0x1fa   :  { %336 = vst.msk [vmem:[#allocation3] sm:$0xff] %vm335_vm2, %v327_v21 }
 0x1ff   :  { %v308_v55 = vpop.xlane.xlu2 %307 }
 0x200   :  { %v314_v53 = vpop.xlane.xlu0 %313  ;;  %v328_v24 = vadd.f32 %v308_v55, %v296_v39 }
 0x201   :  { %v330_v36 = vadd.f32 %v314_v53, %v298_v54  ;;  %v694_v7 = vld [vmem:[#allocation3] sm:$0xff] }
 0x202   :  { %337 = vst.msk [vmem:[#allocation3 + $0x8] sm:$0xff] %vm335_vm2, %v328_v24  ;;  %v702_v50 = vmul.f32 %v1559_v3, %v694_v7 }
 0x203   :  { %339 = vst.msk [vmem:[#allocation3 + $0x18] sm:$0xff] %vm335_vm2, %v330_v36  ;;  %v1881_v36 = vmov 1  }
 0x207   :  { %v320_v29 = vpop.xlane.xlu1 %319 }
 0x208   :  { %v332_v11 = vadd.f32 %v320_v29, %v300_v40  ;;  %v323_v15 = vpop.xlane.xlu0 %322  ;;  %v317_v27 = vpop.xlane.xlu2 %316 }
 0x209   :  { %v333_v8 = vadd.f32 %v323_v15, %v301_v4  ;;  %v331_v32 = vadd.f32 %v317_v27, %v299_v51  ;;  %v695_v43 = vld [vmem:[#allocation3 + $0x8] sm:$0xff] }
 0x20a   :  { %341 = vst.msk [vmem:[#allocation3 + $0x28] sm:$0xff] %vm335_vm2, %v332_v11  ;;  %v703_v49 = vmul.f32 %v1733_v62, %v695_v43  ;;  %v697_v3 = vld [vmem:[#allocation3 + $0x18] sm:$0xff] }
 0x20b   :  { %342 = vst.msk [vmem:[#allocation3 + $0x30] sm:$0xff] %vm335_vm2, %v333_v8  ;;  %v705_v38 = vmul.f32 %v1708_v34, %v697_v3 }
 0x20c   :  { %340 = vst.msk [vmem:[#allocation3 + $0x20] sm:$0xff] %vm335_vm2, %v331_v32 }
 0x20f   :  { %v715_v9 = vpop.xlane.xlu1 %714 }
 0x210   :  { %v735_v1 = vadd.f32 %v715_v9, %v703_v49  ;;  %v326_v60 = vpop.xlane.xlu2 %325 }
 0x211   :  { %v334_v28 = vadd.f32 %v326_v60, %v302_v2  ;;  %v699_v45 = vld [vmem:[#allocation3 + $0x28] sm:$0xff]  ;;  %v457_v60 = vpop.f32.mrf.mxu0 }
 0x212   :  { %744 = vst.msk [vmem:[#allocation3 + $0x8] sm:$0xff] %vm742_vm3, %v735_v1  ;;  %v707_v14 = vmul.f32 %v1716_v10, %v699_v45  ;;  %v700_v10 = vld [vmem:[#allocation3 + $0x30] sm:$0xff] }
 0x213   :  { %343 = vst.msk [vmem:[#allocation3 + $0x38] sm:$0xff] %vm335_vm2, %v334_v28  ;;  %v708_v61 = vmul.f32 %v1760_v37, %v700_v10  ;;  %v698_v34 = vld [vmem:[#allocation3 + $0x20] sm:$0xff] }
 0x214   :  { %v706_v53 = vmul.f32 %v1743_v12, %v698_v34 }
 0x217   :  { %v718_v48 = vpop.xlane.xlu0 %717 }
 0x218   :  { %v736_v20 = vadd.f32 %v718_v48, %v704_v44 }
 0x219   :  { %v712_v25 = vpop.xlane.xlu2 %711  ;;  %v913_v41 = vld [vmem:[#allocation3 + $0x8] sm:$0xff]  ;;  %v467_v44 = vpop.f32.mrf.mxu2 }
 0x21a   :  { %745 = vst.msk [vmem:[#allocation3 + $0x10] sm:$0xff] %vm742_vm3, %v736_v20  ;;  %v734_v62 = vadd.f32 %v712_v25, %v702_v50  ;;  %1234 = vrcp.f32 %v913_v41  ;;  %v701_v37 = vld [vmem:[#allocation3 + $0x38] sm:$0xff]  ;;  %v459_v25 = vpop.f32.mrf.mxu0  ;;  %v400_v41 = vmul.f32 0.0, %v1680_v6 }
 0x21b   :  { %v709_v30 = vmul.f32 %v1749_v5, %v701_v37 }
 0x21c   :  { %743 = vst.msk [vmem:[#allocation3] sm:$0xff] %vm742_vm3, %v734_v62  ;;  %v808_v62 = vmul.f32 0.0, %v1757_v13  ;;  %v405_v13 = vmul.f32 0.0, %v1672_v0 }
 0x21f   :  { %v727_v52 = vpop.xlane.xlu0 %726 }
 0x220   :  { %v1235_v59 = vpop.eup %1234  ;;  %v739_v46 = vadd.f32 %v727_v52, %v707_v14  ;;  %v477_v52 = vadd.f32 %v457_v60, %v400_v41 }
 0x221   :  { %943 = vperm.xlu1 %1164, %v1235_v59   ;;  %v914_v57 = vld [vmem:[#allocation3 + $0x10] sm:$0xff] }
 0x222   :  { %748 = vst.msk [vmem:[#allocation3 + $0x28] sm:$0xff] %vm742_vm3, %v739_v46  ;;  %1236 = vrcp.f32 %v914_v57  ;;  %v469_v57 = vpop.f32.mrf.mxu2 }
 0x223   :  { %v912_v22 = vld [vmem:[#allocation3] sm:$0xff] }
 0x224   :  { %1238 = vrcp.f32 %v912_v22  ;;  %v865_v58 = vpop.f32.mrf.mxu1 }
 0x227   :  { %v721_v33 = vpop.xlane.xlu2 %720 }
 0x228   :  { %v1237_v18 = vpop.eup %1236  ;;  %v737_v23 = vadd.f32 %v721_v33, %v705_v38 }
 0x229   :  { %948 = vperm.xlu2 %1165, %v1237_v18   ;;  %v917_v31 = vld [vmem:[#allocation3 + $0x28] sm:$0xff] }
 0x22a   :  { %v1239_v35 = vpop.eup %1238  ;;  %746 = vst.msk [vmem:[#allocation3 + $0x18] sm:$0xff] %vm742_vm3, %v737_v23  ;;  %1240 = vrcp.f32 %v917_v31  ;;  %v462_v23 = vpop.f32.mrf.mxu0 }
 0x22b   :  { %938 = vperm.xlu0 %1163, %v1239_v35  }
 0x22c   :  { %v867_v14 = vpop.f32.mrf.mxu1 }
 0x22f   :  { %v730_v21 = vpop.xlane.xlu2 %729 }
 0x230   :  { %v1241_v42 = vpop.eup %1240  ;;  %v740_v63 = vadd.f32 %v730_v21, %v708_v61  ;;  %v402_v21 = vmul.f32 0.0, %v1659_v17 }
 0x231   :  { %v915_v39 = vld [vmem:[#allocation3 + $0x18] sm:$0xff] }
 0x232   :  { %749 = vst.msk [vmem:[#allocation3 + $0x30] sm:$0xff] %vm742_vm3, %v740_v63  ;;  %1242 = vrcp.f32 %v915_v39  ;;  %v1793_v5 = vpop.permute.xlu0 %785  ;;  %v479_v34 = vadd.f32 %v462_v23, %v402_v21 }
 0x233   :  { %963 = vperm.xlu0 %1163, %v1241_v42  }
 0x237   :  { %v776_v8 = vpop.permute.xlu2 %775 }
 0x238   :  { %v1243_v54 = vpop.eup %1242 }
 0x239   :  { %953 = vperm.xlu1 %1164, %v1243_v54   ;;  %v918_v55 = vld [vmem:[#allocation3 + $0x30] sm:$0xff] }
 0x23a   :  { %1244 = vrcp.f32 %v918_v55  ;;  %v796_v15 = vpop.permute.xlu0 %795  ;;  %v809_v55 = vmul.f32 0.0, %v776_v8 }
 0x23b   :  { %v724_v24 = vpop.xlane.xlu1 %723  ;;  %1166 = vset.pattern.permute.xlu0 %v1881_v36  ;;  %v813_v31 = vmul.f32 0.0, %v796_v15 }
 0x23c   :  { %v738_v26 = vadd.f32 %v724_v24, %v706_v53  ;;  %1001 = vperm.xlu0 %1166, %v1239_v35   ;;  %v886_v15 = vadd.f32 %v867_v14, %v809_v55 }
 0x23e   :  { %747 = vst.msk [vmem:[#allocation3 + $0x20] sm:$0xff] %vm742_vm3, %v738_v26 }
 0x23f   :  { %v791_v43 = vpop.permute.xlu2 %790 }
 0x240   :  { %v1245_v56 = vpop.eup %1244  ;;  %v812_v8 = vmul.f32 0.0, %v791_v43 }
 0x241   :  { %968 = vperm.xlu1 %1164, %v1245_v56  }
 0x243   :  { %v733_v40 = vpop.xlane.xlu1 %732  ;;  %v368_v27 = vpop.permute.xlu0 %367 }
 0x244   :  { %v741_v29 = vadd.f32 %v733_v40, %v709_v30  ;;  %1021 = vperm.xlu0 %1166, %v1241_v42   ;;  %v482_v42 = vadd.f32 %v469_v57, %v405_v13  ;;  %v401_v53 = vmul.f32 0.0, %v368_v27  ;;  %v472_v30 = vpop.f32.mrf.mxu2  ;;  %v404_v27 = vmul.f32 0.0, %v1690_v16 }
 0x245   :  { %v916_v4 = vld [vmem:[#allocation3 + $0x20] sm:$0xff] }
 0x246   :  { %750 = vst.msk [vmem:[#allocation3 + $0x38] sm:$0xff] %vm742_vm3, %v741_v29  ;;  %1246 = vrcp.f32 %v916_v4 }
 0x247   :  { %v1799_v9 = vpop.permute.xlu2 %805 }
 0x249   :  { %1167 = vset.pattern.permute.xlu1 %v1881_v36 }
 0x24a   :  { %1005 = vperm.xlu1 %1167, %v1235_v59   ;;  %v885_v59 = vadd.f32 %v865_v58, %v808_v62 }
 0x24b   :  { %v1795_v32 = vpop.permute.xlu0 %377 }
 0x24c   :  { %v1247_v12 = vpop.eup %1246  ;;  %v875_v20 = vpop.f32.mrf.mxu3  ;;  %v403_v41 = vmul.f32 0.0, %v1795_v32 }
 0x24d   :  { %958 = vperm.xlu2 %1165, %v1247_v12   ;;  %v919_v51 = vld [vmem:[#allocation3 + $0x38] sm:$0xff]  ;;  %v889_v62 = vadd.f32 %v875_v20, %v812_v8  ;;  %v474_v32 = vpop.f32.mrf.mxu2 }
 0x24e   :  { %1248 = vrcp.f32 %v919_v51 }
 0x252   :  { %1013 = vperm.xlu1 %1167, %v1243_v54   ;;  %v870_v54 = vpop.f32.mrf.mxu1 }
 0x253   :  { %v1797_v49 = vpop.permute.xlu0 %392 }
 0x254   :  { %v1249_v11 = vpop.eup %1248  ;;  %v877_v33 = vpop.f32.mrf.mxu3 }
 0x255   :  { %973 = vperm.xlu2 %1165, %v1249_v11   ;;  %v890_v63 = vadd.f32 %v877_v33, %v813_v31 }
 0x25a   :  { %1025 = vperm.xlu1 %1167, %v1245_v56   ;;  %v872_v14 = vpop.f32.mrf.mxu1 }
 0x25b   :  { %v781_v47 = vpop.permute.xlu1 %780 }
 0x25c   :  { %v810_v35 = vmul.f32 0.0, %v781_v47  ;;  %v880_v4 = vpop.f32.mrf.mxu3 }
 0x25d   :  { %1168 = vset.pattern.permute.xlu2 %v1881_v36 }
 0x25e   :  { %1009 = vperm.xlu2 %1168, %v1237_v18   ;;  %v1814_v18 = vld [vmem:[%s1867_s4] ss:$0 sm:$0xff]  ;;  %v887_v37 = vadd.f32 %v870_v54, %v810_v35 }
 0x263   :  { %v1801_v2 = vpop.permute.xlu1 %800 }
 0x264   :  { %v882_v13 = vpop.f32.mrf.mxu3 }
 0x266   :  { %1017 = vperm.xlu2 %1168, %v1247_v12   ;;  %v478_v12 = vadd.f32 %v459_v25, %v401_v53 }
 0x26e   :  { %1029 = vperm.xlu2 %1168, %v1249_v11  }
 0x283   :  { %v949_v28 = vpop.permute.xlu2 %948 }
 0x284   :  { %v978_v40 = vmul.f32 %v949_v28, %v479_v34 }
 0x293   :  { %v944_v7 = vpop.permute.xlu1 %943 }
 0x29d   :  { %v939_v1 = vpop.permute.xlu0 %938 }
 0x29e   :  { %v976_v3 = vmul.f32 %v939_v1, %v477_v52  ;;  %v977_v1 = vmul.f32 %v944_v7, %v478_v12 }
 0x2a5   :  { %v964_v48 = vpop.permute.xlu0 %963 }
 0x2a6   :  { %v981_v36 = vmul.f32 %v964_v48, %v482_v42  ;;  %v481_v48 = vadd.f32 %v467_v44, %v404_v27 }
 0x2a7   :  { %v1803_v50 = vpop.permute.xlu2 %958 }
 0x2a8   :  { %v980_v16 = vmul.f32 %v1803_v50, %v481_v48  ;;  %v407_v50 = vmul.f32 0.0, %v1694_v19 }
 0x2aa   :  { %v484_v42 = vadd.f32 %v474_v32, %v407_v50 }
 0x2ab   :  { %v1807_v45 = vpop.permute.xlu1 %953 }
 0x2ae   :  { %v1002_v46 = vpop.permute.xlu0 %1001 }
 0x2af   :  { %v1032_v22 = vmul.f32 %v1002_v46, %v885_v59  ;;  %v1809_v38 = vpop.permute.xlu2 %973  ;;  %v811_v46 = vmul.f32 0.0, %v1793_v5 }
 0x2b0   :  { %v983_v55 = vmul.f32 %v1809_v38, %v484_v42 }
 0x2b1   :  { %v1040_v6 = vadd.f32 %v1032_v22, %v976_v3  ;;  %v464_v3 = vpop.f32.mrf.mxu0  ;;  %v888_v20 = vadd.f32 %v872_v14, %v811_v46 }
 0x2b2   :  { %v480_v22 = vadd.f32 %v464_v3, %v403_v41 }
 0x2b3   :  { %v1048_v10 = vmul.f32 0.5, %v1040_v6  ;;  %v1817_v61 = vpop.permute.xlu1 %968  ;;  %v815_v6 = vmul.f32 0.0, %v1799_v9 }
 0x2b4   :  { %v979_v31 = vmul.f32 %v1807_v45, %v480_v22 }
 0x2b5   :  { %v1060_v39 = vadd.f32 %v1814_v18, %v1048_v10  ;;  %v892_v34 = vadd.f32 %v882_v13, %v815_v6 }
 0x2b6   :  { %v1022_v24 = vpop.permute.xlu0 %1021 }
 0x2b7   :  { %v1068_v26 = vmax.f32 %v1060_v39, 0.0  ;;  %v1037_v0 = vmul.f32 %v1022_v24, %v890_v63  ;;  %v406_v63 = vmul.f32 0.0, %v1797_v49  ;;  %v814_v39 = vmul.f32 0.0, %v1801_v2 }
 0x2b8   :  { %v1010_v56 = vpop.permute.xlu2 %1009 }
 0x2b9   :  { %1076 = vst [vmem:[%s1868_s5] sm:$0xff] %v1068_v26  ;;  %v1045_v17 = vadd.f32 %v1037_v0, %v981_v36  ;;  %v1034_v29 = vmul.f32 %v1010_v56, %v887_v37  ;;  %v483_v36 = vadd.f32 %v472_v30, %v406_v63  ;;  %v891_v26 = vadd.f32 %v880_v4, %v814_v39 }
 0x2bb   :  { %v1053_v51 = vmul.f32 0.5, %v1045_v17  ;;  %v1042_v11 = vadd.f32 %v1034_v29, %v978_v40  ;;  %v982_v37 = vmul.f32 %v1817_v61, %v483_v36 }
 0x2bc   :  { %v1006_v47 = vpop.permute.xlu1 %1005 }
 0x2bd   :  { %v1065_v60 = vadd.f32 %v1814_v18, %v1053_v51  ;;  %v1050_v58 = vmul.f32 0.5, %v1042_v11  ;;  %v1033_v28 = vmul.f32 %v1006_v47, %v886_v15 }
 0x2bf   :  { %v1073_v52 = vmax.f32 %v1065_v60, 0.0  ;;  %v1062_v59 = vadd.f32 %v1814_v18, %v1050_v58  ;;  %v1041_v25 = vadd.f32 %v1033_v28, %v977_v1 }
 0x2c0   :  { %v1018_v57 = vpop.permute.xlu2 %1017 }
 0x2c1   :  { %1081 = vst [vmem:[%s1868_s5 + $0x28] sm:$0xff] %v1073_v52  ;;  %v1070_v43 = vmax.f32 %v1062_v59, 0.0  ;;  %v1049_v7 = vmul.f32 0.5, %v1041_v25  ;;  %v1036_v44 = vmul.f32 %v1018_v57, %v889_v62 }
 0x2c3   :  { %1078 = vst [vmem:[%s1868_s5 + $0x10] sm:$0xff] %v1070_v43  ;;  %v1061_v5 = vadd.f32 %v1814_v18, %v1049_v7  ;;  %v1044_v33 = vadd.f32 %v1036_v44, %v980_v16 }
 0x2c4   :  { %v1014_v23 = vpop.permute.xlu1 %1013 }
 0x2c5   :  { %v1069_v35 = vmax.f32 %v1061_v5, 0.0  ;;  %v1052_v10 = vmul.f32 0.5, %v1044_v33  ;;  %v1035_v21 = vmul.f32 %v1014_v23, %v888_v20 }
 0x2c7   :  { %1077 = vst [vmem:[%s1868_s5 + $0x8] sm:$0xff] %v1069_v35  ;;  %v1064_v19 = vadd.f32 %v1814_v18, %v1052_v10  ;;  %v1043_v9 = vadd.f32 %v1035_v21, %v979_v31 }
 0x2c8   :  { %v1030_v54 = vpop.permute.xlu2 %1029 }
 0x2c9   :  { %v1072_v45 = vmax.f32 %v1064_v19, 0.0  ;;  %v1051_v53 = vmul.f32 0.5, %v1043_v9  ;;  %v1039_v24 = vmul.f32 %v1030_v54, %v892_v34 }
 0x2cb   :  { %1080 = vst [vmem:[%s1868_s5 + $0x20] sm:$0xff] %v1072_v45  ;;  %v1063_v49 = vadd.f32 %v1814_v18, %v1051_v53  ;;  %v1047_v2 = vadd.f32 %v1039_v24, %v983_v55 }
 0x2cc   :  { %v1026_v0 = vpop.permute.xlu1 %1025 }
 0x2cd   :  { %v1071_v56 = vmax.f32 %v1063_v49, 0.0  ;;  %v1055_v40 = vmul.f32 0.5, %v1047_v2  ;;  %v1038_v17 = vmul.f32 %v1026_v0, %v891_v26 }
 0x2cf   :  { %1079 = vst [vmem:[%s1868_s5 + $0x18] sm:$0xff] %v1071_v56  ;;  %v1067_v38 = vadd.f32 %v1814_v18, %v1055_v40  ;;  %v1046_v30 = vadd.f32 %v1038_v17, %v982_v37 }
 0x2d1   :  { %v1075_v29 = vmax.f32 %v1067_v38, 0.0  ;;  %v1054_v12 = vmul.f32 0.5, %v1046_v30 }
 0x2d3   :  { %1083 = vst [vmem:[%s1868_s5 + $0x38] sm:$0xff] %v1075_v29  ;;  %v1066_v4 = vadd.f32 %v1814_v18, %v1054_v12 }
 0x2d5   :  { %v1074_v51 = vmax.f32 %v1066_v4, 0.0 }
 0x2d7   :  { %1082 = vst [vmem:[%s1868_s5 + $0x30] sm:$0xff] %v1074_v51 }

// kernel: gat_forward.5
= control target key start
LH: loop header
LB: loop body
LE: loop exit
PB: predicated region body
PF: predicated region fallthrough
CT: control target
= control target key end

     0   :  { %v1864_v0 = vmov 1   ;;  %v1866_v1 = vmov 0   ;;  %vm158_vm0 = vcmask 523264   ;;  %vm25_vm1 = vcmask 15360   ;;  %s1858_s0 = inlined_call_operand.vmem [shape: f32[64,2], index: 0, kind: input, shape index: {}]   ;;  %s1859_s1 = inlined_call_operand.vmem [shape: f32[2,64], index: 1, kind: input, shape index: {}]   ;;  %s1860_s3 = inlined_call_operand.vmem [shape: bf16[64,256], index: 3, kind: input, shape index: {}]   ;;  %s1861_s2 = inlined_call_operand.vmem [shape: s8[64,64], index: 2, kind: input, shape index: {}]   ;;  %s1862_s4 = inlined_call_operand.vmem [shape: f32[1,128], index: 4, kind: input, shape index: {}]   ;;  %s1863_s5 = inlined_call_operand.vmem [shape: f32[64,128], index: 5, kind: output, shape index: {}]  }
   0x1   :  { %1143 = vset.pattern.permute.xlu0 %v1864_v0  ;;  %1140 = vset.pattern.permute.xlu1 %v1866_v1  ;;  %v60_v2 = vld [vmem:[%s1858_s0 + $0x10] sm:$0xff]  ;;  %v59_v3 = vld [vmem:[%s1858_s0 + $0x8] sm:$0xff]  ;;  %v62_v4 = vld [vmem:[%s1858_s0 + $0x20] sm:$0xff]  ;;  %vm335_vm2 = vcmask 7168   ;;  %vm742_vm3 = vcmask 15368  }
   0x2   :  { %97 = vperm.xlu1 %1140, %v60_v2   ;;  %506 = vperm.xlu0 %1143, %v59_v3   ;;  %v61_v5 = vld [vmem:[%s1858_s0 + $0x18] sm:$0xff]  ;;  %v64_v6 = vld [vmem:[%s1858_s0 + $0x30] sm:$0xff]  ;;  %v63_v7 = vld [vmem:[%s1858_s0 + $0x28] sm:$0xff] }
   0x3   :  { %1141 = vset.pattern.permute.xlu2 %v1866_v1  ;;  %v65_v8 = vld [vmem:[%s1858_s0 + $0x38] sm:$0xff]  ;;  %v58_v9 = vld [vmem:[%s1858_s0] sm:$0xff] }
   0x4   :  { %107 = vperm.xlu2 %1141, %v62_v4   ;;  %v66_v10 = vld [vmem:[%s1859_s1] sm:$0x3] }
   0x5   :  { %v125_v11 = vperm.slane %v66_v10, 0  ;;  %v1325_v40 = vperm.slane %v66_v10, 1 }
   0xa   :  { %102 = vperm.xlu1 %1140, %v61_v5   ;;  %526 = vperm.xlu0 %1143, %v64_v6  }
   0xc   :  { %112 = vperm.xlu2 %1141, %v63_v7  }
  0x12   :  { %122 = vperm.xlu1 %1140, %v65_v8   ;;  %1145 = vset.pattern.permute.xlu0 %v1866_v1 }
  0x13   :  { %87 = vperm.xlu0 %1145, %v58_v9  }
  0x14   :  { %1142 = vset.pattern.permute.xlu2 %v1864_v0 }
  0x15   :  { %502 = vperm.xlu2 %1142, %v58_v9  }
  0x1a   :  { %1144 = vset.pattern.permute.xlu1 %v1864_v0 }
  0x1b   :  { %92 = vperm.xlu0 %1145, %v59_v3   ;;  %510 = vperm.xlu1 %1144, %v60_v2  }
  0x1d   :  { %518 = vperm.xlu2 %1142, %v62_v4   ;;  %v1244_v4 = vmov -1e+30  }
  0x1e   :  { %28 = vst.msk [vmem:[#allocation2 + $0x10] sm:$0xff] %vm25_vm1, %v1244_v4 }
  0x1f   :  { %26 = vst.msk [vmem:[#allocation2] sm:$0xff] %vm25_vm1, %v1244_v4 }
  0x20   :  { %27 = vst.msk [vmem:[#allocation2 + $0x8] sm:$0xff] %vm25_vm1, %v1244_v4 }
  0x21   :  { %29 = vst.msk [vmem:[#allocation2 + $0x18] sm:$0xff] %vm25_vm1, %v1244_v4 }
  0x22   :  { %30 = vst.msk [vmem:[#allocation2 + $0x20] sm:$0xff] %vm25_vm1, %v1244_v4 }
  0x23   :  { %117 = vperm.xlu0 %1145, %v64_v6   ;;  %522 = vperm.xlu1 %1144, %v63_v7   ;;  %31 = vst.msk [vmem:[#allocation2 + $0x28] sm:$0xff] %vm25_vm1, %v1244_v4 }
  0x24   :  { %32 = vst.msk [vmem:[#allocation2 + $0x30] sm:$0xff] %vm25_vm1, %v1244_v4 }
  0x25   :  { %514 = vperm.xlu2 %1142, %v61_v5   ;;  %33 = vst.msk [vmem:[#allocation2 + $0x38] sm:$0xff] %vm25_vm1, %v1244_v4 }
  0x2b   :  { %530 = vperm.xlu1 %1144, %v65_v8  }
  0x2c   :  { %v1452_v4 = vld [vmem:[#allocation2 + $0x38] sm:$0xff] }
  0x2d   :  { %1147 = vset.pattern.permute.xlu2 %v1866_v1 }
  0x33   :  { %1146 = vset.pattern.permute.xlu1 %v1866_v1 }
  0x5e   :  { %v108_v12 = vpop.permute.xlu2 %107 }
  0x5f   :  { %v130_v38 = vadd.f32 %v125_v11, %v108_v12 }
  0x61   :  { %v138_v44 = vmul.f32 0.2, %v130_v38 }
  0x63   :  { %v1335_v52 = vmax.f32 %v130_v38, %v138_v44  ;;  %v1415_v44 = vld [vmem:[#allocation2 + $0x18] sm:$0xff] }
  0x65   :  { %v171_v61 = vsel %vm158_vm0, %v1335_v52, -inf }
  0x66   :  { %v113_v20 = vpop.permute.xlu2 %112 }
  0x67   :  { %v131_v34 = vadd.f32 %v125_v11, %v113_v20 }
  0x69   :  { %v139_v41 = vmul.f32 0.2, %v131_v34 }
  0x6b   :  { %v1333_v50 = vmax.f32 %v131_v34, %v139_v41 }
  0x6d   :  { %v174_v58 = vsel %vm158_vm0, %v1333_v50, -inf }
  0x6f   :  { %v503_v24 = vpop.permute.xlu2 %502 }
  0x70   :  { %v534_v3 = vadd.f32 %v1325_v40, %v503_v24 }
  0x72   :  { %v542_v10 = vmul.f32 0.2, %v534_v3 }
  0x74   :  { %v98_v13 = vpop.permute.xlu1 %97  ;;  %v507_v14 = vpop.permute.xlu0 %506  ;;  %v1374_v20 = vmax.f32 %v534_v3, %v542_v10 }
  0x75   :  { %v128_v15 = vadd.f32 %v125_v11, %v98_v13  ;;  %v535_v48 = vadd.f32 %v1325_v40, %v507_v14 }
  0x77   :  { %v136_v16 = vmul.f32 0.2, %v128_v15  ;;  %v519_v37 = vpop.permute.xlu2 %518  ;;  %v543_v57 = vmul.f32 0.2, %v535_v48 }
  0x78   :  { %v538_v47 = vadd.f32 %v1325_v40, %v519_v37 }
  0x79   :  { %v1311_v17 = vmax.f32 %v128_v15, %v136_v16  ;;  %v1351_v5 = vmax.f32 %v535_v48, %v543_v57 }
  0x7a   :  { %v546_v54 = vmul.f32 0.2, %v538_v47 }
  0x7b   :  { %v165_v18 = vsel %vm158_vm0, %v1311_v17, -inf  ;;  %v569_v12 = vsel %vm158_vm0, %v1351_v5, -inf }
  0x7c   :  { %166 = vmax.xlane.f32.xlu1 %v165_v18  ;;  %v1315_v19 = vpop.permute.xlu0 %526  ;;  %v103_v21 = vpop.permute.xlu1 %102  ;;  %v1347_v2 = vmax.f32 %v538_v47, %v546_v54  ;;  %v155_v54 = vld [vmem:[#allocation2 + $0x28] sm:$0xff] }
  0x7d   :  { %v129_v26 = vadd.f32 %v125_v11, %v103_v21 }
  0x7e   :  { %v578_v9 = vsel %vm158_vm0, %v1347_v2, -inf }
  0x7f   :  { %v137_v29 = vmul.f32 0.2, %v129_v26  ;;  %v515_v56 = vpop.permute.xlu2 %514 }
  0x80   :  { %v537_v62 = vadd.f32 %v1325_v40, %v515_v56  ;;  %v1435_v56 = vld [vmem:[#allocation2 + $0x20] sm:$0xff] }
  0x81   :  { %v1321_v36 = vmax.f32 %v129_v26, %v137_v29  ;;  %v540_v29 = vadd.f32 %v1325_v40, %v1315_v19  ;;  %v152_v19 = vld [vmem:[#allocation2 + $0x10] sm:$0xff] }
  0x82   :  { %v545_v8 = vmul.f32 0.2, %v537_v62 }
  0x83   :  { %v168_v43 = vsel %vm158_vm0, %v1321_v36, -inf }
  0x84   :  { %v123_v25 = vpop.permute.xlu1 %122  ;;  %v1370_v16 = vmax.f32 %v537_v62, %v545_v8 }
  0x85   :  { %v88_v22 = vpop.permute.xlu0 %87  ;;  %v133_v51 = vadd.f32 %v125_v11, %v123_v25  ;;  %v566_v25 = vsel %vm158_vm0, %v1374_v20, -inf }
  0x86   :  { %v126_v23 = vadd.f32 %v125_v11, %v88_v22 }
  0x87   :  { %v141_v60 = vmul.f32 0.2, %v133_v51 }
  0x88   :  { %v134_v27 = vmul.f32 0.2, %v126_v23 }
  0x89   :  { %v1354_v6 = vmax.f32 %v133_v51, %v141_v60 }
  0x8a   :  { %v1317_v28 = vmax.f32 %v126_v23, %v134_v27  ;;  %v575_v23 = vsel %vm158_vm0, %v1370_v16, -inf }
  0x8b   :  { %v180_v13 = vsel %vm158_vm0, %v1354_v6, -inf }
  0x8c   :  { %v159_v30 = vsel %vm158_vm0, %v1317_v28, -inf }
  0x8d   :  { %v93_v31 = vpop.permute.xlu0 %92  ;;  %160 = vmax.xlane.f32.xlu2 %v159_v30  ;;  %v511_v33 = vpop.permute.xlu1 %510 }
  0x8e   :  { %v127_v32 = vadd.f32 %v125_v11, %v93_v31  ;;  %v536_v63 = vadd.f32 %v1325_v40, %v511_v33 }
  0x90   :  { %v135_v35 = vmul.f32 0.2, %v127_v32  ;;  %v544_v7 = vmul.f32 0.2, %v536_v63 }
  0x92   :  { %v1323_v39 = vmax.f32 %v127_v32, %v135_v35  ;;  %v1368_v15 = vmax.f32 %v536_v63, %v544_v7  ;;  %v548_v32 = vmul.f32 0.2, %v540_v29  ;;  %v1245_v35 = vmov 0.0  }
  0x93   :  { %36 = vst.msk [vmem:[#allocation3 + $0x10] sm:$0xff] %vm25_vm1, %v1245_v35 }
  0x94   :  { %v162_v42 = vsel %vm158_vm0, %v1323_v39, -inf  ;;  %v572_v22 = vsel %vm158_vm0, %v1368_v15, -inf  ;;  %v1392_v33 = vmax.f32 %v540_v29, %v548_v32  ;;  %34 = vst.msk [vmem:[#allocation3] sm:$0xff] %vm25_vm1, %v1245_v35 }
  0x95   :  { %163 = vmax.xlane.f32.xlu0 %v162_v42  ;;  %v118_v45 = vpop.permute.xlu0 %117  ;;  %169 = vmax.xlane.f32.xlu2 %v168_v43  ;;  %v523_v53 = vpop.permute.xlu1 %522  ;;  %35 = vst.msk [vmem:[#allocation3 + $0x8] sm:$0xff] %vm25_vm1, %v1245_v35  ;;  %v1413_v43 = vld [vmem:[#allocation2 + $0x8] sm:$0xff] }
  0x96   :  { %v132_v46 = vadd.f32 %v125_v11, %v118_v45  ;;  %v539_v18 = vadd.f32 %v1325_v40, %v523_v53  ;;  %v584_v34 = vsel %vm158_vm0, %v1392_v33, -inf  ;;  %37 = vst.msk [vmem:[#allocation3 + $0x18] sm:$0xff] %vm25_vm1, %v1245_v35  ;;  %v1433_v53 = vld [vmem:[#allocation2 + $0x30] sm:$0xff] }
  0x97   :  { %38 = vst.msk [vmem:[#allocation3 + $0x20] sm:$0xff] %vm25_vm1, %v1245_v35 }
  0x98   :  { %v140_v49 = vmul.f32 0.2, %v132_v46  ;;  %v547_v24 = vmul.f32 0.2, %v539_v18  ;;  %39 = vst.msk [vmem:[#allocation3 + $0x28] sm:$0xff] %vm25_vm1, %v1245_v35 }
  0x99   :  { %40 = vst.msk [vmem:[#allocation3 + $0x30] sm:$0xff] %vm25_vm1, %v1245_v35 }
  0x9a   :  { %v1337_v55 = vmax.f32 %v132_v46, %v140_v49  ;;  %v1384_v27 = vmax.f32 %v539_v18, %v547_v24  ;;  %41 = vst.msk [vmem:[#allocation3 + $0x38] sm:$0xff] %vm25_vm1, %v1245_v35 }
  0x9c   :  { %v177_v59 = vsel %vm158_vm0, %v1337_v55, -inf  ;;  %v581_v31 = vsel %vm158_vm0, %v1384_v27, -inf }
  0x9d   :  { %175 = vmax.xlane.f32.xlu0 %v174_v58  ;;  %178 = vmax.xlane.f32.xlu1 %v177_v59  ;;  %v531_v11 = vpop.permute.xlu1 %530 }
  0x9e   :  { %172 = vmax.xlane.f32.xlu2 %v171_v61  ;;  %v541_v14 = vadd.f32 %v1325_v40, %v531_v11  ;;  %v1405_v40 = vld [vmem:[#allocation2] sm:$0xff] }
  0xa0   :  { %v549_v21 = vmul.f32 0.2, %v541_v14 }
  0xa2   :  { %v1382_v26 = vmax.f32 %v541_v14, %v549_v21 }
  0xa4   :  { %v587_v30 = vsel %vm158_vm0, %v1382_v26, -inf }
  0xa5   :  { %570 = vmax.xlane.f32.xlu0 %v569_v12  ;;  %579 = vmax.xlane.f32.xlu1 %v578_v9 }
  0xa6   :  { %181 = vmax.xlane.f32.xlu2 %v180_v13 }
  0xad   :  { %573 = vmax.xlane.f32.xlu0 %v572_v22  ;;  %576 = vmax.xlane.f32.xlu1 %v575_v23 }
  0xae   :  { %567 = vmax.xlane.f32.xlu2 %v566_v25 }
  0xb5   :  { %588 = vmax.xlane.f32.xlu0 %v587_v30 }
  0xb6   :  { %582 = vmax.xlane.f32.xlu2 %v581_v31 }
  0xbe   :  { %585 = vmax.xlane.f32.xlu2 %v584_v34 }
  0xef   :  { %v167_v37 = vpop.xlane.xlu1 %166 }
  0xf0   :  { %v185_v38 = vmax.f32 %v152_v19, %v167_v37 }
  0xf2   :  { %495 = vst.msk [vmem:[#allocation2 + $0x10] sm:$0xff] %vm335_vm2, %v185_v38  ;;  %203 = vperm.xlu2 %1147, %v185_v38   ;;  %v265_v3 = vsub.f32 %v152_v19, %v185_v38 }
  0xf4   :  { %v275_v12 = vmul.f32 1.442695, %v265_v3 }
  0xf6   :  { %1162 = vpow2.f32 %v275_v12 }
  0xf9   :  { %v1483_v25 = vld [vmem:[#allocation2 + $0x10] sm:$0xff] }
 0x100   :  { %v161_v41 = vpop.xlane.xlu2 %160 }
 0x101   :  { %v1408_v42 = vmax.f32 %v1405_v40, %v161_v41  ;;  %v1125_v41 = vld [vmem:[%s1860_s3 + $0x18] sm:$0xf0] }
 0x103   :  { %493 = vst.msk [vmem:[#allocation2] sm:$0xff] %vm335_vm2, %v1408_v42  ;;  %193 = vperm.xlu0 %1145, %v1408_v42   ;;  %v263_v23 = vsub.f32 %v1405_v40, %v1408_v42 }
 0x105   :  { %v271_v40 = vmul.f32 1.442695, %v263_v23 }
 0x108   :  { %v164_v45 = vpop.xlane.xlu0 %163  ;;  %v170_v46 = vpop.xlane.xlu2 %169 }
 0x109   :  { %v1418_v47 = vmax.f32 %v1413_v43, %v164_v45  ;;  %v1421_v48 = vmax.f32 %v1415_v44, %v170_v46  ;;  %v1500_v45 = vpop.eup %1162 }
 0x10a   :  { %v558_v35 = vld [vmem:[#allocation2] sm:$0xff] }
 0x10b   :  { %494 = vst.msk [vmem:[#allocation2 + $0x8] sm:$0xff] %vm335_vm2, %v1418_v47  ;;  %198 = vperm.xlu1 %1146, %v1418_v47   ;;  %208 = vperm.xlu0 %1145, %v1421_v48  }
 0x10c   :  { %496 = vst.msk [vmem:[#allocation2 + $0x18] sm:$0xff] %vm335_vm2, %v1421_v48 }
 0x110   :  { %v179_v57 = vpop.xlane.xlu1 %178  ;;  %v176_v58 = vpop.xlane.xlu0 %175 }
 0x111   :  { %v1438_v59 = vmax.f32 %v1433_v53, %v179_v57  ;;  %v188_v60 = vmax.f32 %v155_v54, %v176_v58  ;;  %v173_v61 = vpop.xlane.xlu2 %172 }
 0x112   :  { %v1441_v62 = vmax.f32 %v1435_v56, %v173_v61  ;;  %v1454_v7 = vld [vmem:[#allocation2 + $0x8] sm:$0xff] }
 0x113   :  { %499 = vst.msk [vmem:[#allocation2 + $0x30] sm:$0xff] %vm335_vm2, %v1438_v59  ;;  %223 = vperm.xlu2 %1147, %v1438_v59   ;;  %218 = vperm.xlu0 %1145, %v188_v60   ;;  %v268_v22 = vsub.f32 %v155_v54, %v188_v60  ;;  %v1485_v31 = vld [vmem:[#allocation2 + $0x18] sm:$0xff] }
 0x114   :  { %498 = vst.msk [vmem:[#allocation2 + $0x28] sm:$0xff] %vm335_vm2, %v188_v60  ;;  %213 = vperm.xlu1 %1146, %v1441_v62   ;;  %v267_v46 = vsub.f32 %v1435_v56, %v1441_v62 }
 0x115   :  { %497 = vst.msk [vmem:[#allocation2 + $0x20] sm:$0xff] %vm335_vm2, %v1441_v62  ;;  %v281_v37 = vmul.f32 1.442695, %v268_v22 }
 0x117   :  { %1164 = vpow2.f32 %v281_v37 }
 0x118   :  { %v571_v8 = vpop.xlane.xlu0 %570  ;;  %v580_v9 = vpop.xlane.xlu1 %579  ;;  %1166 = vpow2.f32 %v271_v40  ;;  %v1094_v40 = vld [vmem:[%s1860_s3 + $0x30] sm:$0xf] }
 0x119   :  { %v1457_v10 = vmax.f32 %v1454_v7, %v571_v8  ;;  %v182_v11 = vpop.xlane.xlu2 %181  ;;  %v279_v8 = vmul.f32 1.442695, %v267_v46  ;;  %v1123_v46 = vld [vmem:[%s1860_s3 + $0x34] sm:$0xf0] }
 0x11a   :  { %v1460_v13 = vmax.f32 %v1452_v4, %v182_v11 }
 0x11b   :  { %902 = vst.msk [vmem:[#allocation2 + $0x8] sm:$0xff] %vm742_vm3, %v1457_v10  ;;  %1149 = vset.pattern.permute.xlu2 %v1864_v0  ;;  %1150 = vset.pattern.permute.xlu0 %v1864_v0  ;;  %v1515_v60 = vld [vmem:[#allocation2 + $0x28] sm:$0xff]  ;;  %1168 = vpow2.f32 %v279_v8  ;;  %v1090_v8 = vld [vmem:[%s1860_s3 + $0x20] sm:$0xf] }
 0x11c   :  { %v1468_v18 = vld [vmem:[#allocation2 + $0x20] sm:$0xff]  ;;  %500 = vst.msk [vmem:[#allocation2 + $0x38] sm:$0xff] %vm335_vm2, %v1460_v13  ;;  %228 = vperm.xlu1 %1146, %v1460_v13   ;;  %605 = vperm.xlu2 %1149, %v1457_v10   ;;  %v270_v22 = vsub.f32 %v1452_v4, %v1460_v13 }
 0x11d   :  { %v1475_v21 = vmax.f32 %v1468_v18, %v580_v9  ;;  %v1524_v56 = vpop.eup %1164  ;;  %v1114_v9 = vld [vmem:[%s1860_s3 + $0x34] sm:$0xf] }
 0x11e   :  { %v1531_v11 = vpop.eup %1166  ;;  %v285_v37 = vmul.f32 1.442695, %v270_v22 }
 0x11f   :  { %905 = vst.msk [vmem:[#allocation2 + $0x20] sm:$0xff] %vm742_vm3, %v1475_v21 }
 0x120   :  { %v574_v29 = vpop.xlane.xlu0 %573  ;;  %v577_v30 = vpop.xlane.xlu1 %576 }
 0x121   :  { %v1488_v32 = vmax.f32 %v1483_v25, %v574_v29  ;;  %v1491_v34 = vmax.f32 %v1485_v31, %v577_v30  ;;  %v568_v19 = vpop.xlane.xlu2 %567  ;;  %v1538_v29 = vld [vmem:[#allocation2 + $0x30] sm:$0xff] }
 0x122   :  { %v590_v38 = vmax.f32 %v558_v35, %v568_v19 }
 0x123   :  { %903 = vst.msk [vmem:[#allocation2 + $0x10] sm:$0xff] %vm742_vm3, %v1488_v32  ;;  %v673_v42 = vsub.f32 %v1485_v31, %v1491_v34  ;;  %610 = vperm.xlu0 %1150, %v1488_v32   ;;  %v1510_v57 = vld [vmem:[#allocation2 + $0x38] sm:$0xff] }
 0x124   :  { %904 = vst.msk [vmem:[#allocation2 + $0x18] sm:$0xff] %vm742_vm3, %v1491_v34  ;;  %1148 = vset.pattern.permute.xlu1 %v1864_v0  ;;  %1152 = vset.pattern.permute.xlu2 %v1866_v1  ;;  %v670_v12 = vsub.f32 %v558_v35, %v590_v38 }
 0x125   :  { %901 = vst.msk [vmem:[#allocation2] sm:$0xff] %vm742_vm3, %v590_v38  ;;  %600 = vperm.xlu1 %1148, %v590_v38   ;;  %372 = vperm.xlu2 %1152, %v1500_v45   ;;  %v1548_v38 = vpop.eup %1168 }
 0x126   :  { %v678_v23 = vmul.f32 1.442695, %v670_v12  ;;  %v1122_v12 = vld [vmem:[%s1860_s3 + $0x24] sm:$0xf0] }
 0x127   :  { %v1091_v22 = vor.u32 %v1122_v12, %v1090_v8 }
 0x128   :  { %v589_v54 = vpop.xlane.xlu0 %588  ;;  %1170 = vpow2.f32 %v678_v23 }
 0x129   :  { %v1513_v58 = vmax.f32 %v1510_v57, %v589_v54  ;;  %v583_v61 = vpop.xlane.xlu2 %582  ;;  %1172 = vpow2.f32 %v285_v37  ;;  %v1095_v54 = vor.u32 %v1123_v46, %v1094_v40  ;;  %v1121_v37 = vld [vmem:[%s1860_s3 + $0x14] sm:$0xf0] }
 0x12a   :  { %v1518_v3 = vmax.f32 %v1515_v60, %v583_v61 }
 0x12b   :  { %908 = vst.msk [vmem:[#allocation2 + $0x38] sm:$0xff] %vm742_vm3, %v1513_v58  ;;  %452 = vmatpush.bf16.msra.mxu0 %v1095_v54  ;;  %1128 = vmatpush.bf16.msra.mxu2 %v1095_v54  ;;  %v1584_v54 = vld [vmem:[%s1861_s2] sm:$0xff] }
 0x12c   :  { %906 = vst.msk [vmem:[#allocation2 + $0x28] sm:$0xff] %vm742_vm3, %v1518_v3  ;;  %625 = vperm.xlu0 %1150, %v1518_v3   ;;  %v71_v12 = vunpack.c.2.s8 %v1584_v54 }
 0x12d   :  { %1151 = vset.pattern.permute.xlu1 %v1866_v1  ;;  %387 = vperm.xlu2 %1152, %v1524_v56  }
 0x12e   :  { %362 = vperm.xlu1 %1151, %v1531_v11   ;;  %v1553_v4 = vpop.eup %1170 }
 0x12f   :  { %v1556_v13 = vpop.eup %1172  ;;  %453 = vmatpush.bf16.msra.mxu0 %v1091_v22  ;;  %1129 = vmatpush.bf16.msra.mxu2 %v1091_v22 }
 0x131   :  { %v586_v30 = vpop.xlane.xlu2 %585 }
 0x132   :  { %v1541_v19 = vmax.f32 %v1538_v29, %v586_v30  ;;  %v1086_v30 = vld [vmem:[%s1860_s3 + $0x10] sm:$0xf] }
 0x133   :  { %v1087_v40 = vor.u32 %v1121_v37, %v1086_v30 }
 0x134   :  { %907 = vst.msk [vmem:[#allocation2 + $0x30] sm:$0xff] %vm742_vm3, %v1541_v19  ;;  %635 = vperm.xlu0 %1150, %v1513_v58  }
 0x135   :  { %1154 = vset.pattern.permute.xlu2 %v1864_v0  ;;  %454 = vmatpush.bf16.msra.mxu0 %v1087_v40 }
 0x136   :  { %382 = vperm.xlu1 %1151, %v1548_v38   ;;  %615 = vperm.xlu2 %1154, %v1491_v34  }
 0x137   :  { %1130 = vmatpush.bf16.msra.mxu2 %v1087_v40 }
 0x13c   :  { %770 = vperm.xlu0 %1150, %v1553_v4  }
 0x13e   :  { %397 = vperm.xlu1 %1151, %v1556_v13  }
 0x146   :  { %1153 = vset.pattern.permute.xlu1 %v1864_v0 }
 0x147   :  { %620 = vperm.xlu1 %1153, %v1475_v21  }
 0x14c   :  { %v204_v61 = vpop.permute.xlu2 %203 }
 0x14d   :  { %v233_v23 = vsub.f32 %v1311_v17, %v204_v61  ;;  %v1082_v17 = vld [vmem:[%s1860_s3] sm:$0xf]  ;;  %v1120_v61 = vld [vmem:[%s1860_s3 + $0x4] sm:$0xf0] }
 0x14e   :  { %v1083_v8 = vor.u32 %v1120_v61, %v1082_v17 }
 0x14f   :  { %630 = vperm.xlu1 %1153, %v1541_v19   ;;  %v243_v46 = vmul.f32 1.442695, %v233_v23  ;;  %v1593_v23 = vcvt.s32.f32 %v71_v12 }
 0x150   :  { %455 = vmatpush.bf16.msra.mxu0 %v1083_v8  ;;  %1131 = vmatpush.bf16.msra.mxu2 %v1083_v8 }
 0x151   :  { %1174 = vpow2.f32 %v243_v46  ;;  %v1127_v46 = vld [vmem:[%s1860_s3 + $0x38] sm:$0xf0] }
 0x152   :  { %v1115_v61 = vor.u32 %v1127_v46, %v1114_v9 }
 0x154   :  { %860 = vmatpush.bf16.msra.mxu1 %v1115_v61  ;;  %1132 = vmatpush.bf16.msra.mxu3 %v1115_v61 }
 0x157   :  { %v1175_v30 = vpop.eup %1174 }
 0x158   :  { %v1596_v37 = vmul.f32 %v1175_v30, %v1593_v23  ;;  %v69_v30 = vunpack.c.0.s8 %v1584_v54 }
 0x15a   :  { %v309_v12 = vsel %vm158_vm0, %v1596_v37, 0.0  ;;  %v1614_v46 = vcvt.s32.f32 %v69_v30 }
 0x16d   :  { %v224_v22 = vpop.permute.xlu2 %223 }
 0x16e   :  { %v237_v61 = vsub.f32 %v1337_v55, %v224_v22  ;;  %v1124_v55 = vld [vmem:[%s1860_s3 + $0x8] sm:$0xf0] }
 0x175   :  { %v194_v40 = vpop.permute.xlu0 %193 }
 0x176   :  { %v231_v0 = vsub.f32 %v1317_v28, %v194_v40  ;;  %v606_v17 = vpop.permute.xlu2 %605  ;;  %v1110_v28 = vld [vmem:[%s1860_s3 + $0x24] sm:$0xf]  ;;  %v1126_v40 = vld [vmem:[%s1860_s3 + $0x28] sm:$0xf0] }
 0x177   :  { %v1111_v35 = vor.u32 %v1126_v40, %v1110_v28 }
 0x178   :  { %v239_v8 = vmul.f32 1.442695, %v231_v0 }
 0x179   :  { %310 = vadd.xlane.f32.xlu1 %v309_v12  ;;  %861 = vmatpush.bf16.msra.mxu1 %v1111_v35 }
 0x17a   :  { %1176 = vpow2.f32 %v239_v8  ;;  %v1106_v8 = vld [vmem:[%s1860_s3 + $0x14] sm:$0xf]  ;;  %1133 = vmatpush.bf16.msra.mxu3 %v1111_v35  ;;  %v1102_v35 = vld [vmem:[%s1860_s3 + $0x4] sm:$0xf] }
 0x17b   :  { %v1107_v28 = vor.u32 %v1125_v41, %v1106_v8  ;;  %v1103_v22 = vor.u32 %v1124_v55, %v1102_v35 }
 0x17d   :  { %v199_v9 = vpop.permute.xlu1 %198  ;;  %v209_v0 = vpop.permute.xlu0 %208  ;;  %862 = vmatpush.bf16.msra.mxu1 %v1107_v28 }
 0x17e   :  { %v232_v12 = vsub.f32 %v1323_v39, %v199_v9  ;;  %v234_v24 = vsub.f32 %v1321_v36, %v209_v0  ;;  %v70_v36 = vunpack.c.1.s8 %v1584_v54  ;;  %v72_v9 = vunpack.c.3.s8 %v1584_v54  ;;  %1134 = vmatpush.bf16.msra.mxu3 %v1107_v28  ;;  %v68_v54 = vld [vmem:[%s1861_s2 + $0x8] sm:$0xff] }
 0x17f   :  { %v1625_v63 = vpop.permute.xlu2 %372  ;;  %v75_v55 = vunpack.c.2.s8 %v68_v54  ;;  %v74_v49 = vunpack.c.1.s8 %v68_v54 }
 0x180   :  { %v1177_v40 = vpop.eup %1176  ;;  %v241_v30 = vmul.f32 1.442695, %v232_v12  ;;  %v245_v14 = vmul.f32 1.442695, %v234_v24  ;;  %v251_v24 = vmul.f32 1.442695, %v237_v61  ;;  %v639_v12 = vsub.f32 %v1351_v5, %v606_v17 }
 0x181   :  { %v255_v39 = vmul.f32 %v1177_v40, %v1614_v46  ;;  %863 = vmatpush.bf16.msra.mxu1 %v1103_v22  ;;  %v78_v61 = vcvt.s32.f32 %v70_v36  ;;  %v1650_v36 = vcvt.s32.f32 %v75_v55  ;;  %v76_v55 = vunpack.c.3.s8 %v68_v54 }
 0x182   :  { %1178 = vpow2.f32 %v241_v30  ;;  %v1642_v30 = vcvt.s32.f32 %v72_v9  ;;  %1135 = vmatpush.bf16.msra.mxu3 %v1103_v22  ;;  %v648_v62 = vmul.f32 1.442695, %v639_v12 }
 0x183   :  { %1180 = vpow2.f32 %v245_v14  ;;  %v303_v41 = vsel %vm158_vm0, %v255_v39, 0.0 }
 0x184   :  { %304 = vadd.xlane.f32.xlu0 %v303_v41  ;;  %1182 = vpow2.f32 %v251_v24 }
 0x185   :  { %v219_v0 = vpop.permute.xlu0 %218 }
 0x186   :  { %v236_v8 = vsub.f32 %v1333_v50, %v219_v0  ;;  %v214_v40 = vpop.permute.xlu1 %213  ;;  %v73_v50 = vunpack.c.0.s8 %v68_v54  ;;  %v1653_v0 = vcvt.s32.f32 %v74_v49 }
 0x187   :  { %v235_v14 = vsub.f32 %v1335_v52, %v214_v40  ;;  %v1646_v17 = vpop.permute.xlu2 %387 }
 0x188   :  { %v1179_v28 = vpop.eup %1178  ;;  %v249_v35 = vmul.f32 1.442695, %v236_v8  ;;  %v1655_v8 = vcvt.s32.f32 %v73_v50 }
 0x189   :  { %v1181_v41 = vpop.eup %1180  ;;  %v247_v1 = vmul.f32 1.442695, %v235_v14  ;;  %v256_v51 = vmul.f32 %v1179_v28, %v78_v61 }
 0x18a   :  { %1184 = vpow2.f32 %v249_v35  ;;  %v258_v5 = vmul.f32 %v1181_v41, %v1642_v30  ;;  %v1183_v22 = vpop.eup %1182 }
 0x18b   :  { %1186 = vpow2.f32 %v247_v1  ;;  %v306_v9 = vsel %vm158_vm0, %v256_v51, 0.0  ;;  %v408_v24 = vpack.c.bf16 %v256_v51, %v255_v39  ;;  %v261_v51 = vmul.f32 %v1183_v22, %v1650_v36 }
 0x18c   :  { %307 = vadd.xlane.f32.xlu2 %v306_v9  ;;  %v312_v52 = vsel %vm158_vm0, %v258_v5, 0.0  ;;  %1188 = vpow2.f32 %v648_v62  ;;  %v1666_v22 = vcvt.s32.f32 %v76_v55 }
 0x18d   :  { %313 = vadd.xlane.f32.xlu0 %v312_v52  ;;  %1096 = vmatmul.msk.bf16.vlgmr.msra.gmra.mxu0 %vm158_vm0, %v408_v24  ;;  %v321_v50 = vsel %vm158_vm0, %v261_v51, 0.0 }
 0x18e   :  { %v229_v12 = vpop.permute.xlu1 %228 }
 0x18f   :  { %v238_v1 = vsub.f32 %v1354_v6, %v229_v12 }
 0x190   :  { %v1185_v40 = vpop.eup %1184  ;;  %v616_v9 = vpop.permute.xlu2 %615 }
 0x191   :  { %v1187_v39 = vpop.eup %1186  ;;  %v253_v14 = vmul.f32 1.442695, %v238_v1  ;;  %v260_v28 = vmul.f32 %v1185_v40, %v1653_v0  ;;  %v641_v1 = vsub.f32 %v1370_v16, %v616_v9 }
 0x192   :  { %v259_v35 = vmul.f32 %v1187_v39, %v1655_v8  ;;  %v1189_v41 = vpop.eup %1188 }
 0x193   :  { %1190 = vpow2.f32 %v253_v14  ;;  %v318_v49 = vsel %vm158_vm0, %v260_v28, 0.0  ;;  %v663_v12 = vmul.f32 %v1189_v41, %v78_v61 }
 0x194   :  { %v315_v62 = vsel %vm158_vm0, %v259_v35, 0.0  ;;  %319 = vadd.xlane.f32.xlu1 %v318_v49  ;;  %v410_v6 = vpack.c.bf16 %v260_v28, %v259_v35 }
 0x195   :  { %316 = vadd.xlane.f32.xlu2 %v315_v62  ;;  %322 = vadd.xlane.f32.xlu0 %v321_v50  ;;  %v611_v24 = vpop.permute.xlu0 %610  ;;  %v713_v49 = vsel %vm158_vm0, %v663_v12, 0.0  ;;  %v652_v62 = vmul.f32 1.442695, %v641_v1 }
 0x196   :  { %v640_v52 = vsub.f32 %v1368_v15, %v611_v24  ;;  %1098 = vmatmul.msk.bf16.vlgmr.msra.gmra.mxu2 %vm158_vm0, %v410_v6  ;;  %v409_v15 = vpack.c.bf16 %v258_v5, %v1596_v37 }
 0x197   :  { %v601_v54 = vpop.permute.xlu1 %600 }
 0x198   :  { %v650_v40 = vmul.f32 1.442695, %v640_v52  ;;  %v638_v39 = vsub.f32 %v1374_v20, %v601_v54 }
 0x199   :  { %v1191_v14 = vpop.eup %1190 }
 0x19a   :  { %1192 = vpow2.f32 %v650_v40  ;;  %v646_v28 = vmul.f32 1.442695, %v638_v39  ;;  %v262_v35 = vmul.f32 %v1191_v14, %v1666_v22 }
 0x19c   :  { %1194 = vpow2.f32 %v646_v28  ;;  %v324_v55 = vsel %vm158_vm0, %v262_v35, 0.0  ;;  %714 = vadd.xlane.f32.xlu1 %v713_v49  ;;  %v411_v24 = vpack.c.bf16 %v262_v35, %v261_v51  ;;  %v684_v28 = vmul.f32 1.442695, %v673_v42 }
 0x19d   :  { %325 = vadd.xlane.f32.xlu2 %v324_v55  ;;  %1097 = vmatmul.msk.bf16.gmra.mxu0 %vm158_vm0, %v409_v15  ;;  %1196 = vpow2.f32 %v652_v62  ;;  %v1868_v62 = vsub.f32 %v1515_v60, %v1518_v3  ;;  %v1869_v60 = vsub.f32 %v1413_v43, %v1418_v47 }
 0x19e   :  { %v626_v16 = vpop.permute.xlu0 %625 }
 0x19f   :  { %v643_v20 = vsub.f32 %v1384_v27, %v626_v16  ;;  %v688_v55 = vmul.f32 1.442695, %v1868_v62  ;;  %v273_v3 = vmul.f32 1.442695, %v1869_v60  ;;  %v290_v62 = vld [vmem:[#allocation3 + $0x18] sm:$0xff]  ;;  %v291_v60 = vld [vmem:[#allocation3 + $0x20] sm:$0xff] }
 0x1a0   :  { %v1193_v61 = vpop.eup %1192  ;;  %v1676_v41 = vpop.permute.xlu1 %362 }
 0x1a1   :  { %v656_v50 = vmul.f32 1.442695, %v643_v20  ;;  %v664_v6 = vmul.f32 %v1193_v61, %v1593_v23 }
 0x1a2   :  { %v1195_v9 = vpop.eup %1194 }
 0x1a3   :  { %1198 = vpow2.f32 %v656_v50  ;;  %v716_v37 = vsel %vm158_vm0, %v664_v6, 0.0  ;;  %v662_v5 = vmul.f32 %v1195_v9, %v1614_v46  ;;  %v1197_v1 = vpop.eup %1196 }
 0x1a4   :  { %717 = vadd.xlane.f32.xlu0 %v716_v37  ;;  %v665_v40 = vmul.f32 %v1197_v1, %v1642_v30  ;;  %1200 = vpow2.f32 %v684_v28 }
 0x1a5   :  { %v710_v52 = vsel %vm158_vm0, %v662_v5, 0.0  ;;  %v816_v54 = vpack.c.bf16 %v663_v12, %v662_v5  ;;  %v1870_v5 = vsub.f32 %v1415_v44, %v1421_v48  ;;  %v1873_v44 = vsub.f32 %v1454_v7, %v1457_v10  ;;  %v289_v7 = vld [vmem:[#allocation3 + $0x10] sm:$0xff] }
 0x1a6   :  { %711 = vadd.xlane.f32.xlu2 %v710_v52  ;;  %1099 = vmatmul.msk.bf16.gmra.mxu2 %vm158_vm0, %v411_v24  ;;  %v719_v51 = vsel %vm158_vm0, %v665_v40, 0.0  ;;  %v817_v14 = vpack.c.bf16 %v665_v40, %v664_v6  ;;  %v636_v35 = vpop.permute.xlu0 %635  ;;  %v1874_v40 = vsub.f32 %v1483_v25, %v1488_v32  ;;  %v297_v10 = vmul.f32 %v1500_v45, %v289_v7  ;;  %v287_v45 = vld [vmem:[#allocation3] sm:$0xff] }
 0x1a7   :  { %1116 = vmatmul.msk.bf16.vlgmr.msra.gmra.mxu1 %vm158_vm0, %v816_v54  ;;  %v645_v30 = vsub.f32 %v1382_v26, %v636_v35  ;;  %v277_v43 = vmul.f32 1.442695, %v1870_v5  ;;  %v1871_v54 = vmov 0   ;;  %v680_v48 = vmul.f32 1.442695, %v1873_v44 }
 0x1a8   :  { %v1684_v27 = vpop.permute.xlu1 %382 }
 0x1a9   :  { %v1199_v23 = vpop.eup %1198  ;;  %v660_v16 = vmul.f32 1.442695, %v645_v30  ;;  %v295_v30 = vmul.f32 %v1531_v11, %v287_v45 }
 0x1aa   :  { %v667_v39 = vmul.f32 %v1199_v23, %v1653_v0  ;;  %v1701_v20 = vpop.eup %1200 }
 0x1ac   :  { %v725_v46 = vsel %vm158_vm0, %v667_v39, 0.0 }
 0x1ad   :  { %726 = vadd.xlane.f32.xlu0 %v725_v46 }
 0x1ae   :  { %720 = vadd.xlane.f32.xlu2 %v719_v51  ;;  %v1876_v51 = vsub.f32 %v1538_v29, %v1541_v19  ;;  %v1747_v29 = vpop.permute.xlu0 %770 }
 0x1b0   :  { %v1690_v12 = vpop.permute.xlu1 %397 }
 0x1b7   :  { %1117 = vmatmul.msk.bf16.gmra.mxu1 %vm158_vm0, %v817_v14  ;;  %v690_v14 = vmul.f32 1.442695, %v1876_v51 }
 0x1b9   :  { %v621_v49 = vpop.permute.xlu1 %620 }
 0x1ba   :  { %v642_v0 = vsub.f32 %v1347_v2, %v621_v49 }
 0x1bc   :  { %v654_v15 = vmul.f32 1.442695, %v642_v0 }
 0x1be   :  { %1202 = vpow2.f32 %v654_v15  ;;  %v288_v15 = vld [vmem:[#allocation3 + $0x8] sm:$0xff] }
 0x1bf   :  { %1204 = vpow2.f32 %v688_v55 }
 0x1c0   :  { %1206 = vpow2.f32 %v660_v16 }
 0x1c1   :  { %v631_v31 = vpop.permute.xlu1 %630  ;;  %785 = vperm.xlu0 %1150, %v1701_v20  }
 0x1c2   :  { %v644_v34 = vsub.f32 %v1392_v33, %v631_v31 }
 0x1c4   :  { %v1203_v42 = vpop.eup %1202  ;;  %v658_v26 = vmul.f32 1.442695, %v644_v34 }
 0x1c5   :  { %v666_v2 = vmul.f32 %v1203_v42, %v1655_v8  ;;  %v1706_v61 = vpop.eup %1204 }
 0x1c6   :  { %1208 = vpow2.f32 %v658_v26  ;;  %v1207_v9 = vpop.eup %1206  ;;  %v292_v26 = vld [vmem:[#allocation3 + $0x28] sm:$0xff] }
 0x1c7   :  { %v722_v50 = vsel %vm158_vm0, %v666_v2, 0.0  ;;  %v818_v6 = vpack.c.bf16 %v667_v39, %v666_v2  ;;  %1210 = vpow2.f32 %v273_v3  ;;  %v669_v33 = vmul.f32 %v1207_v9, %v1666_v22  ;;  %v293_v2 = vld [vmem:[#allocation3 + $0x30] sm:$0xff] }
 0x1c8   :  { %723 = vadd.xlane.f32.xlu1 %v722_v50  ;;  %1212 = vpow2.f32 %v277_v43  ;;  %v1872_v22 = vsub.f32 %v1433_v53, %v1438_v59  ;;  %v682_v39 = vmul.f32 1.442695, %v1874_v40  ;;  %v1875_v53 = vsub.f32 %v1468_v18, %v1475_v21 }
 0x1c9   :  { %1118 = vmatmul.msk.bf16.vlgmr.msra.gmra.mxu3 %vm158_vm0, %v818_v6  ;;  %795 = vperm.xlu0 %1150, %v1706_v61   ;;  %v731_v47 = vsel %vm158_vm0, %v669_v33, 0.0  ;;  %v1877_v18 = vsub.f32 %v1510_v57, %v1513_v58  ;;  %v300_v3 = vmul.f32 %v1524_v56, %v292_v26  ;;  %v299_v9 = vmul.f32 %v1548_v38, %v291_v60 }
 0x1ca   :  { %v283_v1 = vmul.f32 1.442695, %v1872_v22  ;;  %v686_v59 = vmul.f32 1.442695, %v1875_v53 }
 0x1cb   :  { %v692_v21 = vmul.f32 1.442695, %v1877_v18 }
 0x1cc   :  { %v1209_v8 = vpop.eup %1208  ;;  %1214 = vpow2.f32 %v283_v1 }
 0x1cd   :  { %v668_v37 = vmul.f32 %v1209_v8, %v1650_v36  ;;  %v1211_v52 = vpop.eup %1210  ;;  %1216 = vpow2.f32 %v680_v48 }
 0x1ce   :  { %v1213_v23 = vpop.eup %1212  ;;  %1218 = vpow2.f32 %v682_v39  ;;  %v296_v55 = vmul.f32 %v1211_v52, %v288_v15 }
 0x1cf   :  { %v728_v24 = vsel %vm158_vm0, %v668_v37, 0.0  ;;  %v819_v36 = vpack.c.bf16 %v669_v33, %v668_v37  ;;  %1220 = vpow2.f32 %v686_v59  ;;  %v298_v16 = vmul.f32 %v1213_v23, %v290_v62 }
 0x1d0   :  { %732 = vadd.xlane.f32.xlu1 %v731_v47  ;;  %729 = vadd.xlane.f32.xlu2 %v728_v24  ;;  %1222 = vpow2.f32 %v690_v14  ;;  %v294_v24 = vld [vmem:[#allocation3 + $0x38] sm:$0xff] }
 0x1d1   :  { %1155 = vset.pattern.permute.xlu0 %v1871_v54  ;;  %1224 = vpow2.f32 %v692_v21  ;;  %v302_v56 = vmul.f32 %v1556_v13, %v294_v24 }
 0x1d2   :  { %367 = vperm.xlu0 %1155, %v1211_v52   ;;  %v1215_v46 = vpop.eup %1214 }
 0x1d3   :  { %v1217_v28 = vpop.eup %1216  ;;  %v301_v6 = vmul.f32 %v1215_v46, %v293_v2 }
 0x1d4   :  { %v1738_v35 = vpop.eup %1218 }
 0x1d5   :  { %v1745_v49 = vpop.eup %1220 }
 0x1d6   :  { %v1750_v19 = vpop.eup %1222 }
 0x1d7   :  { %v1755_v0 = vpop.eup %1224 }
 0x1d9   :  { %1119 = vmatmul.msk.bf16.gmra.mxu3 %vm158_vm0, %v819_v36 }
 0x1da   :  { %377 = vperm.xlu0 %1155, %v1213_v23  }
 0x1e2   :  { %392 = vperm.xlu0 %1155, %v1215_v46  }
 0x1e8   :  { %775 = vperm.xlu2 %1154, %v1217_v28  }
 0x1e9   :  { %780 = vperm.xlu1 %1153, %v1738_v35  }
 0x1ec   :  { %v311_v25 = vpop.xlane.xlu1 %310 }
 0x1ed   :  { %v329_v32 = vadd.f32 %v311_v25, %v297_v10 }
 0x1ef   :  { %338 = vst.msk [vmem:[#allocation3 + $0x10] sm:$0xff] %vm335_vm2, %v329_v32 }
 0x1f0   :  { %790 = vperm.xlu2 %1154, %v1745_v49  }
 0x1f1   :  { %800 = vperm.xlu1 %1153, %v1750_v19  }
 0x1f6   :  { %v696_v36 = vld [vmem:[#allocation3 + $0x10] sm:$0xff] }
 0x1f7   :  { %v305_v57 = vpop.xlane.xlu0 %304  ;;  %v704_v44 = vmul.f32 %v1738_v35, %v696_v36 }
 0x1f8   :  { %v327_v58 = vadd.f32 %v305_v57, %v295_v30  ;;  %805 = vperm.xlu2 %1154, %v1755_v0  }
 0x1f9   :  { %1156 = vset.pattern.permute.xlu1 %v1871_v54 }
 0x1fa   :  { %336 = vst.msk [vmem:[#allocation3] sm:$0xff] %vm335_vm2, %v327_v58 }
 0x1ff   :  { %v308_v31 = vpop.xlane.xlu2 %307 }
 0x200   :  { %v314_v34 = vpop.xlane.xlu0 %313  ;;  %v328_v42 = vadd.f32 %v308_v31, %v296_v55  ;;  %1157 = vset.pattern.permute.xlu2 %v1871_v54  ;;  %v1878_v55 = vmov 1  }
 0x201   :  { %v330_v11 = vadd.f32 %v314_v34, %v298_v16  ;;  %v694_v23 = vld [vmem:[#allocation3] sm:$0xff] }
 0x202   :  { %337 = vst.msk [vmem:[#allocation3 + $0x8] sm:$0xff] %vm335_vm2, %v328_v42  ;;  %v702_v39 = vmul.f32 %v1553_v4, %v694_v23 }
 0x203   :  { %339 = vst.msk [vmem:[#allocation3 + $0x18] sm:$0xff] %vm335_vm2, %v330_v11 }
 0x207   :  { %v320_v50 = vpop.xlane.xlu1 %319 }
 0x208   :  { %v332_v33 = vadd.f32 %v320_v50, %v300_v3  ;;  %v323_v8 = vpop.xlane.xlu0 %322  ;;  %v317_v37 = vpop.xlane.xlu2 %316 }
 0x209   :  { %v333_v5 = vadd.f32 %v323_v8, %v301_v6  ;;  %v331_v43 = vadd.f32 %v317_v37, %v299_v9  ;;  %v695_v47 = vld [vmem:[#allocation3 + $0x8] sm:$0xff] }
 0x20a   :  { %341 = vst.msk [vmem:[#allocation3 + $0x28] sm:$0xff] %vm335_vm2, %v332_v33  ;;  %v703_v52 = vmul.f32 %v1217_v28, %v695_v47  ;;  %v697_v51 = vld [vmem:[#allocation3 + $0x18] sm:$0xff] }
 0x20b   :  { %342 = vst.msk [vmem:[#allocation3 + $0x30] sm:$0xff] %vm335_vm2, %v333_v5  ;;  %v705_v35 = vmul.f32 %v1701_v20, %v697_v51 }
 0x20c   :  { %340 = vst.msk [vmem:[#allocation3 + $0x20] sm:$0xff] %vm335_vm2, %v331_v43 }
 0x20f   :  { %v715_v54 = vpop.xlane.xlu1 %714 }
 0x210   :  { %v735_v22 = vadd.f32 %v715_v54, %v703_v52  ;;  %v326_v1 = vpop.xlane.xlu2 %325 }
 0x211   :  { %v334_v38 = vadd.f32 %v326_v1, %v302_v56  ;;  %v699_v59 = vld [vmem:[#allocation3 + $0x28] sm:$0xff] }
 0x212   :  { %744 = vst.msk [vmem:[#allocation3 + $0x8] sm:$0xff] %vm742_vm3, %v735_v22  ;;  %v707_v14 = vmul.f32 %v1706_v61, %v699_v59  ;;  %v700_v34 = vld [vmem:[#allocation3 + $0x30] sm:$0xff]  ;;  %v457_v22 = vpop.f32.mrf.mxu0 }
 0x213   :  { %343 = vst.msk [vmem:[#allocation3 + $0x38] sm:$0xff] %vm335_vm2, %v334_v38  ;;  %v698_v58 = vld [vmem:[#allocation3 + $0x20] sm:$0xff]  ;;  %v708_v11 = vmul.f32 %v1750_v19, %v700_v34 }
 0x214   :  { %v706_v15 = vmul.f32 %v1745_v49, %v698_v58 }
 0x217   :  { %v718_v48 = vpop.xlane.xlu0 %717 }
 0x218   :  { %v736_v40 = vadd.f32 %v718_v48, %v704_v44 }
 0x219   :  { %v712_v46 = vpop.xlane.xlu2 %711  ;;  %v913_v53 = vld [vmem:[#allocation3 + $0x8] sm:$0xff]  ;;  %v467_v38 = vpop.f32.mrf.mxu2 }
 0x21a   :  { %745 = vst.msk [vmem:[#allocation3 + $0x10] sm:$0xff] %vm742_vm3, %v736_v40  ;;  %v734_v13 = vadd.f32 %v712_v46, %v702_v39  ;;  %1226 = vrcp.f32 %v913_v53  ;;  %v701_v31 = vld [vmem:[#allocation3 + $0x38] sm:$0xff]  ;;  %v1800_v40 = vpop.f32.mrf.mxu0  ;;  %v400_v39 = vmul.f32 0.0, %v1676_v41  ;;  %v808_v46 = vmul.f32 0.0, %v1747_v29 }
 0x21b   :  { %v709_v42 = vmul.f32 %v1755_v0, %v701_v31  ;;  %v405_v29 = vmul.f32 0.0, %v1646_v17 }
 0x21c   :  { %743 = vst.msk [vmem:[#allocation3] sm:$0xff] %vm742_vm3, %v734_v13  ;;  %v477_v13 = vadd.f32 %v457_v22, %v400_v39 }
 0x220   :  { %v1227_v28 = vpop.eup %1226  ;;  %v727_v7 = vpop.xlane.xlu0 %726 }
 0x221   :  { %v739_v10 = vadd.f32 %v727_v7, %v707_v14  ;;  %v721_v25 = vpop.xlane.xlu2 %720  ;;  %943 = vperm.xlu1 %1156, %v1227_v28   ;;  %v914_v4 = vld [vmem:[#allocation3 + $0x10] sm:$0xff]  ;;  %v469_v14 = vpop.f32.mrf.mxu2 }
 0x222   :  { %v737_v18 = vadd.f32 %v721_v25, %v705_v35  ;;  %1228 = vrcp.f32 %v914_v4  ;;  %v1811_v4 = vld [vmem:[%s1862_s4] ss:$0 sm:$0xff] }
 0x223   :  { %748 = vst.msk [vmem:[#allocation3 + $0x28] sm:$0xff] %vm742_vm3, %v739_v10  ;;  %v912_v21 = vld [vmem:[#allocation3] sm:$0xff] }
 0x224   :  { %746 = vst.msk [vmem:[#allocation3 + $0x18] sm:$0xff] %vm742_vm3, %v737_v18  ;;  %1230 = vrcp.f32 %v912_v21  ;;  %v865_v1 = vpop.f32.mrf.mxu1 }
 0x225   :  { %v885_v59 = vadd.f32 %v865_v1, %v808_v46 }
 0x228   :  { %v1229_v32 = vpop.eup %1228 }
 0x229   :  { %948 = vperm.xlu2 %1157, %v1229_v32  }
 0x22a   :  { %v1231_v45 = vpop.eup %1230  ;;  %v917_v61 = vld [vmem:[#allocation3 + $0x28] sm:$0xff] }
 0x22b   :  { %938 = vperm.xlu0 %1155, %v1231_v45   ;;  %1232 = vrcp.f32 %v917_v61  ;;  %v915_v30 = vld [vmem:[#allocation3 + $0x18] sm:$0xff]  ;;  %v402_v61 = vmul.f32 0.0, %v1625_v63  ;;  %v472_v63 = vpop.f32.mrf.mxu2 }
 0x22c   :  { %1234 = vrcp.f32 %v915_v30  ;;  %v1804_v53 = vpop.f32.mrf.mxu1  ;;  %v482_v30 = vadd.f32 %v469_v14, %v405_v29 }
 0x231   :  { %v1233_v20 = vpop.eup %1232 }
 0x232   :  { %v1235_v57 = vpop.eup %1234 }
 0x233   :  { %963 = vperm.xlu0 %1155, %v1233_v20   ;;  %953 = vperm.xlu1 %1156, %v1235_v57   ;;  %v1788_v19 = vpop.permute.xlu0 %785  ;;  %v474_v1 = vpop.f32.mrf.mxu2 }
 0x234   :  { %v870_v58 = vpop.f32.mrf.mxu1 }
 0x23b   :  { %v724_v62 = vpop.xlane.xlu1 %723  ;;  %1158 = vset.pattern.permute.xlu0 %v1878_v55  ;;  %v796_v8 = vpop.permute.xlu0 %795 }
 0x23c   :  { %v738_v16 = vadd.f32 %v724_v62, %v706_v15  ;;  %1001 = vperm.xlu0 %1158, %v1231_v45   ;;  %v813_v18 = vmul.f32 0.0, %v796_v8  ;;  %v462_v45 = vpop.f32.mrf.mxu0 }
 0x23d   :  { %v479_v62 = vadd.f32 %v462_v45, %v402_v61 }
 0x23e   :  { %747 = vst.msk [vmem:[#allocation3 + $0x20] sm:$0xff] %vm742_vm3, %v738_v16 }
 0x243   :  { %v733_v26 = vpop.xlane.xlu1 %732  ;;  %v730_v2 = vpop.xlane.xlu2 %729 }
 0x244   :  { %v741_v60 = vadd.f32 %v733_v26, %v709_v42  ;;  %v740_v3 = vadd.f32 %v730_v2, %v708_v11  ;;  %1021 = vperm.xlu0 %1158, %v1233_v20   ;;  %v1790_v37 = vpop.permute.xlu0 %367 }
 0x245   :  { %v916_v50 = vld [vmem:[#allocation3 + $0x20] sm:$0xff] }
 0x246   :  { %750 = vst.msk [vmem:[#allocation3 + $0x38] sm:$0xff] %vm742_vm3, %v741_v60  ;;  %1236 = vrcp.f32 %v916_v50 }
 0x247   :  { %749 = vst.msk [vmem:[#allocation3 + $0x30] sm:$0xff] %vm742_vm3, %v740_v3 }
 0x24b   :  { %v1792_v5 = vpop.permute.xlu2 %775 }
 0x24c   :  { %v1237_v49 = vpop.eup %1236  ;;  %v1794_v43 = vpop.permute.xlu0 %377 }
 0x24d   :  { %958 = vperm.xlu2 %1157, %v1237_v49   ;;  %v919_v6 = vld [vmem:[#allocation3 + $0x38] sm:$0xff]  ;;  %v875_v23 = vpop.f32.mrf.mxu3 }
 0x24e   :  { %1238 = vrcp.f32 %v919_v6  ;;  %v918_v9 = vld [vmem:[#allocation3 + $0x30] sm:$0xff] }
 0x24f   :  { %1240 = vrcp.f32 %v918_v9 }
 0x253   :  { %v791_v47 = vpop.permute.xlu2 %790 }
 0x254   :  { %v1239_v0 = vpop.eup %1238  ;;  %v1796_v24 = vpop.permute.xlu0 %392  ;;  %v812_v60 = vmul.f32 0.0, %v791_v47 }
 0x255   :  { %v1241_v33 = vpop.eup %1240  ;;  %973 = vperm.xlu2 %1157, %v1239_v0   ;;  %v877_v10 = vpop.f32.mrf.mxu3 }
 0x256   :  { %968 = vperm.xlu1 %1156, %v1241_v33   ;;  %v890_v20 = vadd.f32 %v877_v10, %v813_v18  ;;  %v889_v8 = vadd.f32 %v875_v23, %v812_v60 }
 0x25b   :  { %v1798_v52 = vpop.permute.xlu2 %805  ;;  %v781_v44 = vpop.permute.xlu1 %780 }
 0x25c   :  { %v810_v21 = vmul.f32 0.0, %v781_v44  ;;  %v815_v44 = vmul.f32 0.0, %v1798_v52 }
 0x25d   :  { %1160 = vset.pattern.permute.xlu2 %v1878_v55  ;;  %v880_v2 = vpop.f32.mrf.mxu3 }
 0x25e   :  { %1159 = vset.pattern.permute.xlu1 %v1878_v55  ;;  %1009 = vperm.xlu2 %1160, %v1229_v32   ;;  %v887_v17 = vadd.f32 %v870_v58, %v810_v21 }
 0x25f   :  { %1005 = vperm.xlu1 %1159, %v1227_v28  }
 0x263   :  { %v1806_v25 = vpop.permute.xlu1 %800 }
 0x266   :  { %1017 = vperm.xlu2 %1160, %v1237_v49   ;;  %v404_v49 = vmul.f32 0.0, %v1684_v27 }
 0x267   :  { %1013 = vperm.xlu1 %1159, %v1235_v57  }
 0x26e   :  { %1029 = vperm.xlu2 %1160, %v1239_v0   ;;  %v481_v0 = vadd.f32 %v467_v38, %v404_v49  ;;  %v407_v38 = vmul.f32 0.0, %v1690_v12  ;;  %v809_v12 = vmul.f32 0.0, %v1792_v5  ;;  %v811_v5 = vmul.f32 0.0, %v1788_v19 }
 0x26f   :  { %1025 = vperm.xlu1 %1159, %v1241_v33  }
 0x270   :  { %v484_v46 = vadd.f32 %v474_v1, %v407_v38  ;;  %v886_v29 = vadd.f32 %v1804_v53, %v809_v12 }
 0x283   :  { %v949_v56 = vpop.permute.xlu2 %948 }
 0x284   :  { %v978_v42 = vmul.f32 %v949_v56, %v479_v62  ;;  %v406_v62 = vmul.f32 0.0, %v1796_v24 }
 0x286   :  { %v483_v19 = vadd.f32 %v472_v63, %v406_v62 }
 0x293   :  { %v944_v31 = vpop.permute.xlu1 %943 }
 0x29d   :  { %v939_v54 = vpop.permute.xlu0 %938 }
 0x29e   :  { %v976_v28 = vmul.f32 %v939_v54, %v477_v13 }
 0x2a5   :  { %v964_v36 = vpop.permute.xlu0 %963  ;;  %v954_v54 = vpop.permute.xlu1 %953 }
 0x2a6   :  { %v981_v55 = vmul.f32 %v964_v36, %v482_v30  ;;  %v882_v36 = vpop.f32.mrf.mxu3  ;;  %v464_v30 = vpop.f32.mrf.mxu0 }
 0x2a7   :  { %v959_v48 = vpop.permute.xlu2 %958  ;;  %v892_v13 = vadd.f32 %v882_v36, %v815_v44 }
 0x2a8   :  { %v980_v22 = vmul.f32 %v959_v48, %v481_v0 }
 0x2ae   :  { %v1002_v51 = vpop.permute.xlu0 %1001 }
 0x2af   :  { %v1032_v7 = vmul.f32 %v1002_v51, %v885_v59  ;;  %v974_v35 = vpop.permute.xlu2 %973 }
 0x2b0   :  { %v983_v48 = vmul.f32 %v974_v35, %v484_v46 }
 0x2b1   :  { %v1040_v41 = vadd.f32 %v1032_v7, %v976_v28  ;;  %v401_v7 = vmul.f32 0.0, %v1790_v37  ;;  %v872_v37 = vpop.f32.mrf.mxu1 }
 0x2b3   :  { %v1048_v32 = vmul.f32 0.5, %v1040_v41  ;;  %v478_v41 = vadd.f32 %v1800_v40, %v401_v7 }
 0x2b5   :  { %v1060_v57 = vadd.f32 %v1811_v4, %v1048_v32  ;;  %v977_v18 = vmul.f32 %v944_v31, %v478_v41  ;;  %v403_v32 = vmul.f32 0.0, %v1794_v43  ;;  %v814_v43 = vmul.f32 0.0, %v1806_v25 }
 0x2b6   :  { %v1022_v15 = vpop.permute.xlu0 %1021 }
 0x2b7   :  { %1068 = vst [vmem:[%s1863_s5] sm:$0xff] %v1060_v57  ;;  %v1037_v16 = vmul.f32 %v1022_v15, %v890_v20  ;;  %v888_v20 = vadd.f32 %v872_v37, %v811_v5  ;;  %v480_v57 = vadd.f32 %v464_v30, %v403_v32  ;;  %v891_v31 = vadd.f32 %v880_v2, %v814_v43 }
 0x2b8   :  { %v1010_v34 = vpop.permute.xlu2 %1009 }
 0x2b9   :  { %v1045_v11 = vadd.f32 %v1037_v16, %v981_v55  ;;  %v1034_v26 = vmul.f32 %v1010_v34, %v887_v17  ;;  %v979_v58 = vmul.f32 %v954_v54, %v480_v57 }
 0x2bb   :  { %v1053_v3 = vmul.f32 0.5, %v1045_v11  ;;  %v1042_v50 = vadd.f32 %v1034_v26, %v978_v42 }
 0x2bd   :  { %v1065_v6 = vadd.f32 %v1811_v4, %v1053_v3  ;;  %v1050_v9 = vmul.f32 0.5, %v1042_v50 }
 0x2bf   :  { %1073 = vst [vmem:[%s1863_s5 + $0x28] sm:$0xff] %v1065_v6  ;;  %v1062_v33 = vadd.f32 %v1811_v4, %v1050_v9 }
 0x2c0   :  { %v1018_v56 = vpop.permute.xlu2 %1017 }
 0x2c1   :  { %1070 = vst [vmem:[%s1863_s5 + $0x10] sm:$0xff] %v1062_v33  ;;  %v1036_v47 = vmul.f32 %v1018_v56, %v889_v8 }
 0x2c3   :  { %v1044_v27 = vadd.f32 %v1036_v47, %v980_v22 }
 0x2c5   :  { %v1052_v39 = vmul.f32 0.5, %v1044_v27 }
 0x2c7   :  { %v1064_v23 = vadd.f32 %v1811_v4, %v1052_v39 }
 0x2c8   :  { %v969_v59 = vpop.permute.xlu1 %968  ;;  %v1030_v51 = vpop.permute.xlu2 %1029 }
 0x2c9   :  { %1072 = vst [vmem:[%s1863_s5 + $0x20] sm:$0xff] %v1064_v23  ;;  %v1039_v14 = vmul.f32 %v1030_v51, %v892_v13  ;;  %v982_v42 = vmul.f32 %v969_v59, %v483_v19 }
 0x2cb   :  { %v1047_v28 = vadd.f32 %v1039_v14, %v983_v48 }
 0x2cd   :  { %v1055_v10 = vmul.f32 0.5, %v1047_v28 }
 0x2cf   :  { %v1067_v52 = vadd.f32 %v1811_v4, %v1055_v10 }
 0x2d1   :  { %1075 = vst [vmem:[%s1863_s5 + $0x38] sm:$0xff] %v1067_v52  ;;  %v1006_v35 = vpop.permute.xlu1 %1005 }
 0x2d2   :  { %v1033_v21 = vmul.f32 %v1006_v35, %v886_v29 }
 0x2d4   :  { %v1041_v45 = vadd.f32 %v1033_v21, %v977_v18 }
 0x2d6   :  { %v1049_v61 = vmul.f32 0.5, %v1041_v45 }
 0x2d8   :  { %v1061_v40 = vadd.f32 %v1811_v4, %v1049_v61 }
 0x2d9   :  { %v1014_v53 = vpop.permute.xlu1 %1013 }
 0x2da   :  { %1069 = vst [vmem:[%s1863_s5 + $0x8] sm:$0xff] %v1061_v40  ;;  %v1035_v15 = vmul.f32 %v1014_v53, %v888_v20 }
 0x2dc   :  { %v1043_v55 = vadd.f32 %v1035_v15, %v979_v58 }
 0x2de   :  { %v1051_v16 = vmul.f32 0.5, %v1043_v55 }
 0x2e0   :  { %v1063_v17 = vadd.f32 %v1811_v4, %v1051_v16 }
 0x2e1   :  { %v1026_v34 = vpop.permute.xlu1 %1025 }
 0x2e2   :  { %1071 = vst [vmem:[%s1863_s5 + $0x18] sm:$0xff] %v1063_v17  ;;  %v1038_v11 = vmul.f32 %v1026_v34, %v891_v31 }
 0x2e4   :  { %v1046_v26 = vadd.f32 %v1038_v11, %v982_v42 }
 0x2e6   :  { %v1054_v60 = vmul.f32 0.5, %v1046_v26 }
 0x2e8   :  { %v1066_v3 = vadd.f32 %v1811_v4, %v1054_v60 }
 0x2ea   :  { %1074 = vst [vmem:[%s1863_s5 + $0x30] sm:$0xff] %v1066_v3 }

</bundles_post_ra>
